<compile_context>
chip_gen: v5e
topology: v5e:2x2
jax: 0.10.0
libtpu: 0.0.40
codegen_flags: <defaults>
</compile_context>

<pallas_src>
import math

import jax
import jax.numpy as jnp
from jax.experimental import pallas as pl
from jax.experimental.pallas import tpu as pltpu

# ---------------- configuration (small shapes consistent with the module) ----
D_MODEL = 32            # args.d_model
N_HEADS = 4             # args.n_heads
N_LAYERS = 2            # args.n_layers
D_FF = 2048             # module-level d_ff
GPT_VOCAB_SIZE = 50000  # module-level gpt_vocab_size
D_K = D_MODEL // N_HEADS
LN_EPS = 1e-5           # nn.LayerNorm default eps

ENC_VOCAB = 128         # synthetic vocab for the (replaced) BERT encoder
DEC_VOCAB = 128         # synthetic vocab for the (replaced) kogpt2 model

VOCAB_TILE = 2048
VOCAB_PAD = ((GPT_VOCAB_SIZE + VOCAB_TILE - 1) // VOCAB_TILE) * VOCAB_TILE  # 51200


# ----------------------------- Pallas kernels --------------------------------
def _layer_norm(y, g, b):
    # Biased variance, eps=1e-5 -> matches torch.nn.LayerNorm defaults.
    mean = jnp.mean(y, axis=-1, keepdims=True)
    var = jnp.mean(jnp.square(y - mean), axis=-1, keepdims=True)
    return (y - mean) * jax.lax.rsqrt(var + LN_EPS) * g + b


def _decoder_layer_kernel(x_ref, enc_ref,
                          wq_ref, bq_ref, wk_ref, bk_ref, wv_ref, bv_ref,
                          wo_ref, bo_ref, ln1g_ref, ln1b_ref,
                          w1_ref, b1_ref, w2_ref, b2_ref, ln2g_ref, ln2b_ref,
                          o_ref):
    """One (batch,) grid point: fused MultiheadAttention + PoswiseFFN."""
    x = x_ref[0]      # (SD, D)  decoder-side activations (residual)
    enc = enc_ref[0]  # (SE, D)  encoder outputs (K/V source)

    # QKV projections (nn.Linear: y = x @ W^T + b; weights stored pre-transposed).
    q = jnp.dot(x, wq_ref[...], preferred_element_type=jnp.float32) + bq_ref[...]
    k = jnp.dot(enc, wk_ref[...], preferred_element_type=jnp.float32) + bk_ref[...]
    v = jnp.dot(enc, wv_ref[...], preferred_element_type=jnp.float32) + bv_ref[...]

    # Per-head scaled-dot-product attention, fused with the output projection:
    # concat_h(ctx_h) @ Wo == sum_h ctx_h @ Wo[h*dk:(h+1)*dk, :]  (no concat needed).
    scale = 1.0 / math.sqrt(D_K)
    sd = x.shape[0]
    attn_out = jnp.zeros((sd, D_MODEL), jnp.float32)
    for h in range(N_HEADS):  # static unroll, N_HEADS=4
        lo, hi = h * D_K, (h + 1) * D_K
        qh = q[:, lo:hi]          # (SD, dk)
        kh = k[:, lo:hi]          # (SE, dk)
        vh = v[:, lo:hi]          # (SE, dk)
        scores = jax.lax.dot_general(
            qh, kh, (((1,), (1,)), ((), ())),
            preferred_element_type=jnp.float32) * scale          # (SD, SE)
        scores = scores - jnp.max(scores, axis=-1, keepdims=True)
        e = jnp.exp(scores)
        p = e / jnp.sum(e, axis=-1, keepdims=True)                # softmax(dim=-1)
        ctx = jnp.dot(p, vh, preferred_element_type=jnp.float32)  # (SD, dk)
        attn_out = attn_out + jnp.dot(
            ctx, wo_ref[lo:hi, :], preferred_element_type=jnp.float32)

    attn_out = attn_out + bo_ref[...]
    y = _layer_norm(attn_out + x, ln1g_ref[...], ln1b_ref[...])   # LN(out + residual)

    # PoswiseFeedForwardNet: kernel_size=1 Conv1d pair == per-position linears.
    h1 = jnp.maximum(
        jnp.dot(y, w1_ref[...], preferred_element_type=jnp.float32) + b1_ref[...],
        0.0)
    f = jnp.dot(h1, w2_ref[...], preferred_element_type=jnp.float32) + b2_ref[...]
    o_ref[0] = _layer_norm(f + y, ln2g_ref[...], ln2b_ref[...])


def decoder_layer(p, dec_in, enc_out):
    """dec_in: (B, SD, D) f32, enc_out: (B, SE, D) f32 -> (B, SD, D) f32."""
    B, SD, D = dec_in.shape
    SE = enc_out.shape[1]

    def wspec(arr):
        return pl.BlockSpec(arr.shape, lambda b: (0, 0))

    return pl.pallas_call(
        _decoder_layer_kernel,
        grid=(B,),
        in_specs=[
            pl.BlockSpec((1, SD, D), lambda b: (b, 0, 0)),
            pl.BlockSpec((1, SE, D), lambda b: (b, 0, 0)),
            wspec(p["wq"]), wspec(p["bq"]),
            wspec(p["wk"]), wspec(p["bk"]),
            wspec(p["wv"]), wspec(p["bv"]),
            wspec(p["wo"]), wspec(p["bo"]),
            wspec(p["ln1_g"]), wspec(p["ln1_b"]),
            wspec(p["w1"]), wspec(p["b1"]),
            wspec(p["w2"]), wspec(p["b2"]),
            wspec(p["ln2_g"]), wspec(p["ln2_b"]),
        ],
        out_specs=pl.BlockSpec((1, SD, D), lambda b: (b, 0, 0)),
        out_shape=jax.ShapeDtypeStruct((B, SD, D), jnp.float32),
        compiler_params=pltpu.CompilerParams(dimension_semantics=("parallel",)),
    )(dec_in, enc_out,
      p["wq"], p["bq"], p["wk"], p["bk"], p["wv"], p["bv"],
      p["wo"], p["bo"], p["ln1_g"], p["ln1_b"],
      p["w1"], p["b1"], p["w2"], p["b2"], p["ln2_g"], p["ln2_b"])


def _proj_kernel(x_ref, w_ref, o_ref):
    # bias=False projection; bf16 x bf16 -> f32 accumulation on the MXU.
    o_ref[...] = jnp.dot(x_ref[...].astype(jnp.bfloat16), w_ref[...],
                         preferred_element_type=jnp.float32)


def vocab_projection(x2d, w_bf16):
    """x2d: (M, D) f32, w_bf16: (D, VOCAB_PAD) bf16 -> (M, GPT_VOCAB_SIZE) f32."""
    M, D = x2d.shape
    V = w_bf16.shape[1]
    n_tiles = V // VOCAB_TILE
    out = pl.pallas_call(
        _proj_kernel,
        grid=(n_tiles,),
        in_specs=[
            pl.BlockSpec((M, D), lambda j: (0, 0)),
            pl.BlockSpec((D, VOCAB_TILE), lambda j: (0, j)),
        ],
        out_specs=pl.BlockSpec((M, VOCAB_TILE), lambda j: (0, j)),
        out_shape=jax.ShapeDtypeStruct((M, V), jnp.float32),
        compiler_params=pltpu.CompilerParams(dimension_semantics=("parallel",)),
    )(x2d, w_bf16)
    return out[:, :GPT_VOCAB_SIZE]


# ----------------------------- model glue (plain JAX) ------------------------
@jax.jit
def transformer_forward(params, enc_inputs, dec_inputs):
    # TODO(synk): ETRI_KOBERT / BertModel (pretrained) has no Pallas equivalent;
    # replaced with a deterministic embedding lookup producing (B, Se, d_model).
    enc_outputs = params["bert_emb"][enc_inputs]
    # TODO(synk): `keyword(...)` hook is undefined in the source and keyword_ is
    # None in this path, so that branch is skipped (matches original control flow).
    # TODO(synk): kogpt2 inside each DecoderLayer replaced by an embedding lookup
    # for the first layer and identity afterwards; `position` threading unused.
    x = params["gpt_emb"][dec_inputs]
    for layer_p in params["layers"]:
        x = decoder_layer(layer_p, x, enc_outputs)
    B, SD, D = x.shape
    logits = vocab_projection(x.reshape(B * SD, D), params["proj_w"])
    return logits  # (B*SD, gpt_vocab_size) == dec_logits.view(-1, vocab)


# ----------------------------- deterministic params --------------------------
def init_params(key):
    def dense(k, fan_in, fan_out):
        kw, kb = jax.random.split(k)
        w = jax.random.normal(kw, (fan_in, fan_out), jnp.float32) * 0.02
        b = jax.random.normal(kb, (1, fan_out), jnp.float32) * 0.02
        return w, b

    keys = jax.random.split(key, 3 + N_LAYERS)
    proj_w = jax.random.normal(keys[2], (D_MODEL, GPT_VOCAB_SIZE), jnp.float32) * 0.02
    proj_w = jnp.pad(proj_w, ((0, 0), (0, VOCAB_PAD - GPT_VOCAB_SIZE)))
    params = {
        "bert_emb": jax.random.normal(keys[0], (ENC_VOCAB, D_MODEL), jnp.float32) * 0.02,
        "gpt_emb": jax.random.normal(keys[1], (DEC_VOCAB, D_MODEL), jnp.float32) * 0.02,
        # bf16 weights (f32 accumulation in-kernel) halve the dominant HBM read.
        "proj_w": proj_w.astype(jnp.bfloat16),
        "layers": [],
    }
    for li in range(N_LAYERS):
        ks = jax.random.split(keys[3 + li], 6)
        wq, bq = dense(ks[0], D_MODEL, D_MODEL)
        wk, bk = dense(ks[1], D_MODEL, D_MODEL)
        wv, bv = dense(ks[2], D_MODEL, D_MODEL)
        wo, bo = dense(ks[3], D_MODEL, D_MODEL)
        w1, b1 = dense(ks[4], D_MODEL, D_FF)   # conv1 (kernel_size=1), channels-last
        w2, b2 = dense(ks[5], D_FF, D_MODEL)   # conv2 (kernel_size=1), channels-last
        params["layers"].append(
            dict(
                wq=wq, bq=bq, wk=wk, bk=bk, wv=wv, bv=bv, wo=wo, bo=bo,
                ln1_g=jnp.ones((1, D_MODEL), jnp.float32),
                ln1_b=jnp.zeros((1, D_MODEL), jnp.float32),
                w1=w1, b1=b1, w2=w2, b2=b2,
                ln2_g=jnp.ones((1, D_MODEL), jnp.float32),
                ln2_b=jnp.zeros((1, D_MODEL), jnp.float32),
            )
        )
    return params


# ----------------------------------- main -------------------------------------
if __name__ == "__main__":
    key = jax.random.PRNGKey(0)
    kp, ke, kd = jax.random.split(key, 3)

    params = init_params(kp)

    B, SE, SD = 2, 16, 8  # batch, encoder seq len, decoder seq len
    enc_inputs = jax.random.randint(ke, (B, SE), 0, ENC_VOCAB, dtype=jnp.int32)
    dec_inputs = jax.random.randint(kd, (B, SD), 0, DEC_VOCAB, dtype=jnp.int32)

    logits = transformer_forward(params, enc_inputs, dec_inputs)
    logits = jax.block_until_ready(logits)

    assert logits.shape == (B * SD, GPT_VOCAB_SIZE), logits.shape
    assert logits.dtype == jnp.float32
    assert bool(jnp.all(jnp.isfinite(logits)))
    print("KERNEL_OK")
</pallas_src>

<mosaic_0001>
module attributes {stable_mosaic.version = 11 : i64} {
  func.func @_proj_kernel(%arg0: i32, %arg1: memref<16x32xf32, #tpu.memory_space<vmem>>, %arg2: memref<32x2048xbf16, #tpu.memory_space<vmem>>, %arg3: memref<16x2048xf32, #tpu.memory_space<vmem>>) attributes {dimension_semantics = [#tpu.dimension_semantics<parallel>], iteration_bounds = array<i64: 25>, scalar_prefetch = 0 : i64, scratch_operands = 0 : i64, tpu.core_type = #tpu.core_type<tc>, window_params = [{pipeline_mode = #tpu.pipeline_mode<synchronous>, transform_indices = @transform_0, window_bounds = array<i64: 16, 32>}, {transform_indices = @transform_1, window_bounds = array<i64: 32, 2048>}, {transform_indices = @transform_2, window_bounds = array<i64: 16, 2048>}]} {
    %c0 = arith.constant 0 : index
    %c0_0 = arith.constant 0 : index
    %0 = vector.load %arg1[%c0, %c0_0] : memref<16x32xf32, #tpu.memory_space<vmem>>, vector<16x32xf32>
    %1 = arith.truncf %0 : vector<16x32xf32> to vector<16x32xbf16>
    %c0_1 = arith.constant 0 : index
    %c0_2 = arith.constant 0 : index
    %2 = vector.load %arg2[%c0_1, %c0_2] : memref<32x2048xbf16, #tpu.memory_space<vmem>>, vector<32x2048xbf16>
    %cst = arith.constant dense<0.000000e+00> : vector<16x2048xf32>
    %3 = tpu.matmul %1, %2, %cst {dimension_numbers = #tpu.dot_dimension_numbers<[1], [0], [0], [1], [0, 0, 1, 1], [], []>} : vector<16x32xbf16>, vector<32x2048xbf16>, vector<16x2048xf32> -> vector<16x2048xf32>
    %c0_3 = arith.constant 0 : index
    %c0_4 = arith.constant 0 : index
    %4 = vector.load %arg3[%c0_3, %c0_4] : memref<16x2048xf32, #tpu.memory_space<vmem>>, vector<16x2048xf32>
    tpu.vector_store %arg3[%c0_3, %c0_4], %3 {strides = array<i32>} : memref<16x2048xf32, #tpu.memory_space<vmem>>, vector<16x2048xf32>,
    return
  }
  func.func @transform_0(%arg0: i32) -> (i32, i32) {
    %c0_i32 = arith.constant 0 : i32
    %c0_i32_0 = arith.constant 0 : i32
    %c0_i32_1 = arith.constant 0 : i32
    return %c0_i32, %c0_i32_0 : i32, i32
  }
  func.func @transform_1(%arg0: i32) -> (i32, i32) {
    %c0_i32 = arith.constant 0 : i32
    %c0_i32_0 = arith.constant 0 : i32
    return %c0_i32, %arg0 : i32, i32
  }
  func.func @transform_2(%arg0: i32) -> (i32, i32) {
    %c0_i32 = arith.constant 0 : i32
    %c0_i32_0 = arith.constant 0 : i32
    return %c0_i32, %arg0 : i32, i32
  }
}

module attributes {stable_mosaic.version = 11 : i64} {
  func.func @_decoder_layer_kernel(%arg0: i32, %arg1: memref<1x8x32xf32, #tpu.memory_space<vmem>>, %arg2: memref<1x16x32xf32, #tpu.memory_space<vmem>>, %arg3: memref<32x32xf32, #tpu.memory_space<vmem>>, %arg4: memref<1x32xf32, #tpu.memory_space<vmem>>, %arg5: memref<32x32xf32, #tpu.memory_space<vmem>>, %arg6: memref<1x32xf32, #tpu.memory_space<vmem>>, %arg7: memref<32x32xf32, #tpu.memory_space<vmem>>, %arg8: memref<1x32xf32, #tpu.memory_space<vmem>>, %arg9: memref<32x32xf32, #tpu.memory_space<vmem>>, %arg10: memref<1x32xf32, #tpu.memory_space<vmem>>, %arg11: memref<1x32xf32, #tpu.memory_space<vmem>>, %arg12: memref<1x32xf32, #tpu.memory_space<vmem>>, %arg13: memref<32x2048xf32, #tpu.memory_space<vmem>>, %arg14: memref<1x2048xf32, #tpu.memory_space<vmem>>, %arg15: memref<2048x32xf32, #tpu.memory_space<vmem>>, %arg16: memref<1x32xf32, #tpu.memory_space<vmem>>, %arg17: memref<1x32xf32, #tpu.memory_space<vmem>>, %arg18: memref<1x32xf32, #tpu.memory_space<vmem>>, %arg19: memref<1x8x32xf32, #tpu.memory_space<vmem>>) attributes {dimension_semantics = [#tpu.dimension_semantics<parallel>], iteration_bounds = array<i64: 2>, scalar_prefetch = 0 : i64, scratch_operands = 0 : i64, tpu.core_type = #tpu.core_type<tc>, window_params = [{transform_indices = @transform_0, window_bounds = array<i64: 1, 8, 32>}, {transform_indices = @transform_1, window_bounds = array<i64: 1, 16, 32>}, {pipeline_mode = #tpu.pipeline_mode<synchronous>, transform_indices = @transform_2, window_bounds = array<i64: 32, 32>}, {pipeline_mode = #tpu.pipeline_mode<synchronous>, transform_indices = @transform_3, window_bounds = array<i64: 1, 32>}, {pipeline_mode = #tpu.pipeline_mode<synchronous>, transform_indices = @transform_4, window_bounds = array<i64: 32, 32>}, {pipeline_mode = #tpu.pipeline_mode<synchronous>, transform_indices = @transform_5, window_bounds = array<i64: 1, 32>}, {pipeline_mode = #tpu.pipeline_mode<synchronous>, transform_indices = @transform_6, window_bounds = array<i64: 32, 32>}, {pipeline_mode = #tpu.pipeline_mode<synchronous>, transform_indices = @transform_7, window_bounds = array<i64: 1, 32>}, {pipeline_mode = #tpu.pipeline_mode<synchronous>, transform_indices = @transform_8, window_bounds = array<i64: 32, 32>}, {pipeline_mode = #tpu.pipeline_mode<synchronous>, transform_indices = @transform_9, window_bounds = array<i64: 1, 32>}, {pipeline_mode = #tpu.pipeline_mode<synchronous>, transform_indices = @transform_10, window_bounds = array<i64: 1, 32>}, {pipeline_mode = #tpu.pipeline_mode<synchronous>, transform_indices = @transform_11, window_bounds = array<i64: 1, 32>}, {pipeline_mode = #tpu.pipeline_mode<synchronous>, transform_indices = @transform_12, window_bounds = array<i64: 32, 2048>}, {pipeline_mode = #tpu.pipeline_mode<synchronous>, transform_indices = @transform_13, window_bounds = array<i64: 1, 2048>}, {pipeline_mode = #tpu.pipeline_mode<synchronous>, transform_indices = @transform_14, window_bounds = array<i64: 2048, 32>}, {pipeline_mode = #tpu.pipeline_mode<synchronous>, transform_indices = @transform_15, window_bounds = array<i64: 1, 32>}, {pipeline_mode = #tpu.pipeline_mode<synchronous>, transform_indices = @transform_16, window_bounds = array<i64: 1, 32>}, {pipeline_mode = #tpu.pipeline_mode<synchronous>, transform_indices = @transform_17, window_bounds = array<i64: 1, 32>}, {transform_indices = @transform_18, window_bounds = array<i64: 1, 8, 32>}]} {
    %c0 = arith.constant 0 : index
    %c0_0 = arith.constant 0 : index
    %c0_1 = arith.constant 0 : index
    %0 = vector.load %arg1[%c0, %c0_0, %c0_1] : memref<1x8x32xf32, #tpu.memory_space<vmem>>, vector<1x8x32xf32>
    %1 = vector.shape_cast %0 : vector<1x8x32xf32> to vector<8x32xf32>
    %c0_2 = arith.constant 0 : index
    %c0_3 = arith.constant 0 : index
    %c0_4 = arith.constant 0 : index
    %2 = vector.load %arg2[%c0_2, %c0_3, %c0_4] : memref<1x16x32xf32, #tpu.memory_space<vmem>>, vector<1x16x32xf32>
    %3 = vector.shape_cast %2 : vector<1x16x32xf32> to vector<16x32xf32>
    %c0_5 = arith.constant 0 : index
    %c0_6 = arith.constant 0 : index
    %4 = vector.load %arg3[%c0_5, %c0_6] : memref<32x32xf32, #tpu.memory_space<vmem>>, vector<32x32xf32>
    %cst = arith.constant dense<0.000000e+00> : vector<8x32xf32>
    %5 = tpu.matmul %1, %4, %cst {dimension_numbers = #tpu.dot_dimension_numbers<[1], [0], [0], [1], [0, 0, 1, 1], [], []>} : vector<8x32xf32>, vector<32x32xf32>, vector<8x32xf32> -> vector<8x32xf32>
    %c0_7 = arith.constant 0 : index
    %c0_8 = arith.constant 0 : index
    %6 = vector.load %arg4[%c0_7, %c0_8] : memref<1x32xf32, #tpu.memory_space<vmem>>, vector<1x32xf32>
    %7 = vector.broadcast %6 : vector<1x32xf32> to vector<8x32xf32>
    %8 = arith.addf %5, %7 : vector<8x32xf32>
    %c0_9 = arith.constant 0 : index
    %c0_10 = arith.constant 0 : index
    %9 = vector.load %arg5[%c0_9, %c0_10] : memref<32x32xf32, #tpu.memory_space<vmem>>, vector<32x32xf32>
    %cst_11 = arith.constant dense<0.000000e+00> : vector<16x32xf32>
    %10 = tpu.matmul %3, %9, %cst_11 {dimension_numbers = #tpu.dot_dimension_numbers<[1], [0], [0], [1], [0, 0, 1, 1], [], []>} : vector<16x32xf32>, vector<32x32xf32>, vector<16x32xf32> -> vector<16x32xf32>
    %c0_12 = arith.constant 0 : index
    %c0_13 = arith.constant 0 : index
    %11 = vector.load %arg6[%c0_12, %c0_13] : memref<1x32xf32, #tpu.memory_space<vmem>>, vector<1x32xf32>
    %12 = vector.broadcast %11 : vector<1x32xf32> to vector<16x32xf32>
    %13 = arith.addf %10, %12 : vector<16x32xf32>
    %c0_14 = arith.constant 0 : index
    %c0_15 = arith.constant 0 : index
    %14 = vector.load %arg7[%c0_14, %c0_15] : memref<32x32xf32, #tpu.memory_space<vmem>>, vector<32x32xf32>
    %cst_16 = arith.constant dense<0.000000e+00> : vector<16x32xf32>
    %15 = tpu.matmul %3, %14, %cst_16 {dimension_numbers = #tpu.dot_dimension_numbers<[1], [0], [0], [1], [0, 0, 1, 1], [], []>} : vector<16x32xf32>, vector<32x32xf32>, vector<16x32xf32> -> vector<16x32xf32>
    %c0_17 = arith.constant 0 : index
    %c0_18 = arith.constant 0 : index
    %16 = vector.load %arg8[%c0_17, %c0_18] : memref<1x32xf32, #tpu.memory_space<vmem>>, vector<1x32xf32>
    %17 = vector.broadcast %16 : vector<1x32xf32> to vector<16x32xf32>
    %18 = arith.addf %15, %17 : vector<16x32xf32>
    %cst_19 = arith.constant 0.000000e+00 : f32
    %19 = vector.broadcast %cst_19 : f32 to vector<8x32xf32>
    %20 = vector.extract_strided_slice %8 {offsets = [0, 0], sizes = [8, 8], strides = [1, 1]} : vector<8x32xf32> to vector<8x8xf32>
    %21 = vector.extract_strided_slice %13 {offsets = [0, 0], sizes = [16, 8], strides = [1, 1]} : vector<16x32xf32> to vector<16x8xf32>
    %22 = vector.extract_strided_slice %18 {offsets = [0, 0], sizes = [16, 8], strides = [1, 1]} : vector<16x32xf32> to vector<16x8xf32>
    %cst_20 = arith.constant dense<0.000000e+00> : vector<8x16xf32>
    %23 = tpu.matmul %20, %21, %cst_20 {dimension_numbers = #tpu.dot_dimension_numbers<[1], [1], [0], [0], [0, 0, 1, 0], [], []>} : vector<8x8xf32>, vector<16x8xf32>, vector<8x16xf32> -> vector<8x16xf32>
    %cst_21 = arith.constant 0.353553385 : f32
    %24 = vector.broadcast %cst_21 : f32 to vector<8x16xf32>
    %25 = arith.mulf %23, %24 : vector<8x16xf32>
    %cst_22 = arith.constant dense<0xFF800000> : vector<8xf32>
    %26 = vector.multi_reduction <maximumf>, %25, %cst_22 [1] : vector<8x16xf32> to vector<8xf32>
    %27 = vector.shape_cast %26 : vector<8xf32> to vector<8x1xf32>
    %28 = vector.broadcast %27 : vector<8x1xf32> to vector<8x16xf32>
    %29 = arith.subf %25, %28 : vector<8x16xf32>
    %30 = math.exp %29 : vector<8x16xf32>
    %cst_23 = arith.constant dense<0.000000e+00> : vector<8xf32>
    %31 = vector.multi_reduction <add>, %30, %cst_23 [1] : vector<8x16xf32> to vector<8xf32>
    %32 = vector.shape_cast %31 : vector<8xf32> to vector<8x1xf32>
    %33 = vector.broadcast %32 : vector<8x1xf32> to vector<8x16xf32>
    %34 = arith.divf %30, %33 : vector<8x16xf32>
    %cst_24 = arith.constant dense<0.000000e+00> : vector<8x8xf32>
    %35 = tpu.matmul %34, %22, %cst_24 {dimension_numbers = #tpu.dot_dimension_numbers<[1], [0], [0], [1], [0, 0, 1, 1], [], []>} : vector<8x16xf32>, vector<16x8xf32>, vector<8x8xf32> -> vector<8x8xf32>
    %c0_25 = arith.constant 0 : index
    %c0_26 = arith.constant 0 : index
    %36 = vector.load %arg9[%c0_25, %c0_26] : memref<32x32xf32, #tpu.memory_space<vmem>>, vector<8x32xf32>
    %cst_27 = arith.constant dense<0.000000e+00> : vector<8x32xf32>
    %37 = tpu.matmul %35, %36, %cst_27 {dimension_numbers = #tpu.dot_dimension_numbers<[1], [0], [0], [1], [0, 0, 1, 1], [], []>} : vector<8x8xf32>, vector<8x32xf32>, vector<8x32xf32> -> vector<8x32xf32>
    %38 = arith.addf %19, %37 : vector<8x32xf32>
    %39 = vector.extract_strided_slice %8 {offsets = [0, 8], sizes = [8, 8], strides = [1, 1]} : vector<8x32xf32> to vector<8x8xf32>
    %40 = vector.extract_strided_slice %13 {offsets = [0, 8], sizes = [16, 8], strides = [1, 1]} : vector<16x32xf32> to vector<16x8xf32>
    %41 = vector.extract_strided_slice %18 {offsets = [0, 8], sizes = [16, 8], strides = [1, 1]} : vector<16x32xf32> to vector<16x8xf32>
    %cst_28 = arith.constant dense<0.000000e+00> : vector<8x16xf32>
    %42 = tpu.matmul %39, %40, %cst_28 {dimension_numbers = #tpu.dot_dimension_numbers<[1], [1], [0], [0], [0, 0, 1, 0], [], []>} : vector<8x8xf32>, vector<16x8xf32>, vector<8x16xf32> -> vector<8x16xf32>
    %cst_29 = arith.constant 0.353553385 : f32
    %43 = vector.broadcast %cst_29 : f32 to vector<8x16xf32>
    %44 = arith.mulf %42, %43 : vector<8x16xf32>
    %cst_30 = arith.constant dense<0xFF800000> : vector<8xf32>
    %45 = vector.multi_reduction <maximumf>, %44, %cst_30 [1] : vector<8x16xf32> to vector<8xf32>
    %46 = vector.shape_cast %45 : vector<8xf32> to vector<8x1xf32>
    %47 = vector.broadcast %46 : vector<8x1xf32> to vector<8x16xf32>
    %48 = arith.subf %44, %47 : vector<8x16xf32>
    %49 = math.exp %48 : vector<8x16xf32>
    %cst_31 = arith.constant dense<0.000000e+00> : vector<8xf32>
    %50 = vector.multi_reduction <add>, %49, %cst_31 [1] : vector<8x16xf32> to vector<8xf32>
    %51 = vector.shape_cast %50 : vector<8xf32> to vector<8x1xf32>
    %52 = vector.broadcast %51 : vector<8x1xf32> to vector<8x16xf32>
    %53 = arith.divf %49, %52 : vector<8x16xf32>
    %cst_32 = arith.constant dense<0.000000e+00> : vector<8x8xf32>
    %54 = tpu.matmul %53, %41, %cst_32 {dimension_numbers = #tpu.dot_dimension_numbers<[1], [0], [0], [1], [0, 0, 1, 1], [], []>} : vector<8x16xf32>, vector<16x8xf32>, vector<8x8xf32> -> vector<8x8xf32>
    %c8 = arith.constant 8 : index
    %c0_33 = arith.constant 0 : index
    %55 = vector.load %arg9[%c8, %c0_33] : memref<32x32xf32, #tpu.memory_space<vmem>>, vector<8x32xf32>
    %cst_34 = arith.constant dense<0.000000e+00> : vector<8x32xf32>
    %56 = tpu.matmul %54, %55, %cst_34 {dimension_numbers = #tpu.dot_dimension_numbers<[1], [0], [0], [1], [0, 0, 1, 1], [], []>} : vector<8x8xf32>, vector<8x32xf32>, vector<8x32xf32> -> vector<8x32xf32>
    %57 = arith.addf %38, %56 : vector<8x32xf32>
    %58 = vector.extract_strided_slice %8 {offsets = [0, 16], sizes = [8, 8], strides = [1, 1]} : vector<8x32xf32> to vector<8x8xf32>
    %59 = vector.extract_strided_slice %13 {offsets = [0, 16], sizes = [16, 8], strides = [1, 1]} : vector<16x32xf32> to vector<16x8xf32>
    %60 = vector.extract_strided_slice %18 {offsets = [0, 16], sizes = [16, 8], strides = [1, 1]} : vector<16x32xf32> to vector<16x8xf32>
    %cst_35 = arith.constant dense<0.000000e+00> : vector<8x16xf32>
    %61 = tpu.matmul %58, %59, %cst_35 {dimension_numbers = #tpu.dot_dimension_numbers<[1], [1], [0], [0], [0, 0, 1, 0], [], []>} : vector<8x8xf32>, vector<16x8xf32>, vector<8x16xf32> -> vector<8x16xf32>
    %cst_36 = arith.constant 0.353553385 : f32
    %62 = vector.broadcast %cst_36 : f32 to vector<8x16xf32>
    %63 = arith.mulf %61, %62 : vector<8x16xf32>
    %cst_37 = arith.constant dense<0xFF800000> : vector<8xf32>
    %64 = vector.multi_reduction <maximumf>, %63, %cst_37 [1] : vector<8x16xf32> to vector<8xf32>
    %65 = vector.shape_cast %64 : vector<8xf32> to vector<8x1xf32>
    %66 = vector.broadcast %65 : vector<8x1xf32> to vector<8x16xf32>
    %67 = arith.subf %63, %66 : vector<8x16xf32>
    %68 = math.exp %67 : vector<8x16xf32>
    %cst_38 = arith.constant dense<0.000000e+00> : vector<8xf32>
    %69 = vector.multi_reduction <add>, %68, %cst_38 [1] : vector<8x16xf32> to vector<8xf32>
    %70 = vector.shape_cast %69 : vector<8xf32> to vector<8x1xf32>
    %71 = vector.broadcast %70 : vector<8x1xf32> to vector<8x16xf32>
    %72 = arith.divf %68, %71 : vector<8x16xf32>
    %cst_39 = arith.constant dense<0.000000e+00> : vector<8x8xf32>
    %73 = tpu.matmul %72, %60, %cst_39 {dimension_numbers = #tpu.dot_dimension_numbers<[1], [0], [0], [1], [0, 0, 1, 1], [], []>} : vector<8x16xf32>, vector<16x8xf32>, vector<8x8xf32> -> vector<8x8xf32>
    %c16 = arith.constant 16 : index
    %c0_40 = arith.constant 0 : index
    %74 = vector.load %arg9[%c16, %c0_40] : memref<32x32xf32, #tpu.memory_space<vmem>>, vector<8x32xf32>
    %cst_41 = arith.constant dense<0.000000e+00> : vector<8x32xf32>
    %75 = tpu.matmul %73, %74, %cst_41 {dimension_numbers = #tpu.dot_dimension_numbers<[1], [0], [0], [1], [0, 0, 1, 1], [], []>} : vector<8x8xf32>, vector<8x32xf32>, vector<8x32xf32> -> vector<8x32xf32>
    %76 = arith.addf %57, %75 : vector<8x32xf32>
    %77 = vector.extract_strided_slice %8 {offsets = [0, 24], sizes = [8, 8], strides = [1, 1]} : vector<8x32xf32> to vector<8x8xf32>
    %78 = vector.extract_strided_slice %13 {offsets = [0, 24], sizes = [16, 8], strides = [1, 1]} : vector<16x32xf32> to vector<16x8xf32>
    %79 = vector.extract_strided_slice %18 {offsets = [0, 24], sizes = [16, 8], strides = [1, 1]} : vector<16x32xf32> to vector<16x8xf32>
    %cst_42 = arith.constant dense<0.000000e+00> : vector<8x16xf32>
    %80 = tpu.matmul %77, %78, %cst_42 {dimension_numbers = #tpu.dot_dimension_numbers<[1], [1], [0], [0], [0, 0, 1, 0], [], []>} : vector<8x8xf32>, vector<16x8xf32>, vector<8x16xf32> -> vector<8x16xf32>
    %cst_43 = arith.constant 0.353553385 : f32
    %81 = vector.broadcast %cst_43 : f32 to vector<8x16xf32>
    %82 = arith.mulf %80, %81 : vector<8x16xf32>
    %cst_44 = arith.constant dense<0xFF800000> : vector<8xf32>
    %83 = vector.multi_reduction <maximumf>, %82, %cst_44 [1] : vector<8x16xf32> to vector<8xf32>
    %84 = vector.shape_cast %83 : vector<8xf32> to vector<8x1xf32>
    %85 = vector.broadcast %84 : vector<8x1xf32> to vector<8x16xf32>
    %86 = arith.subf %82, %85 : vector<8x16xf32>
    %87 = math.exp %86 : vector<8x16xf32>
    %cst_45 = arith.constant dense<0.000000e+00> : vector<8xf32>
    %88 = vector.multi_reduction <add>, %87, %cst_45 [1] : vector<8x16xf32> to vector<8xf32>
    %89 = vector.shape_cast %88 : vector<8xf32> to vector<8x1xf32>
    %90 = vector.broadcast %89 : vector<8x1xf32> to vector<8x16xf32>
    %91 = arith.divf %87, %90 : vector<8x16xf32>
    %cst_46 = arith.constant dense<0.000000e+00> : vector<8x8xf32>
    %92 = tpu.matmul %91, %79, %cst_46 {dimension_numbers = #tpu.dot_dimension_numbers<[1], [0], [0], [1], [0, 0, 1, 1], [], []>} : vector<8x16xf32>, vector<16x8xf32>, vector<8x8xf32> -> vector<8x8xf32>
    %c24 = arith.constant 24 : index
    %c0_47 = arith.constant 0 : index
    %93 = vector.load %arg9[%c24, %c0_47] : memref<32x32xf32, #tpu.memory_space<vmem>>, vector<8x32xf32>
    %cst_48 = arith.constant dense<0.000000e+00> : vector<8x32xf32>
    %94 = tpu.matmul %92, %93, %cst_48 {dimension_numbers = #tpu.dot_dimension_numbers<[1], [0], [0], [1], [0, 0, 1, 1], [], []>} : vector<8x8xf32>, vector<8x32xf32>, vector<8x32xf32> -> vector<8x32xf32>
    %95 = arith.addf %76, %94 : vector<8x32xf32>
    %c0_49 = arith.constant 0 : index
    %c0_50 = arith.constant 0 : index
    %96 = vector.load %arg10[%c0_49, %c0_50] : memref<1x32xf32, #tpu.memory_space<vmem>>, vector<1x32xf32>
    %97 = vector.broadcast %96 : vector<1x32xf32> to vector<8x32xf32>
    %98 = arith.addf %95, %97 : vector<8x32xf32>
    %99 = arith.addf %98, %1 : vector<8x32xf32>
    %c0_51 = arith.constant 0 : index
    %c0_52 = arith.constant 0 : index
    %100 = vector.load %arg11[%c0_51, %c0_52] : memref<1x32xf32, #tpu.memory_space<vmem>>, vector<1x32xf32>
    %c0_53 = arith.constant 0 : index
    %c0_54 = arith.constant 0 : index
    %101 = vector.load %arg12[%c0_53, %c0_54] : memref<1x32xf32, #tpu.memory_space<vmem>>, vector<1x32xf32>
    %cst_55 = arith.constant dense<0.000000e+00> : vector<8xf32>
    %102 = vector.multi_reduction <add>, %99, %cst_55 [1] : vector<8x32xf32> to vector<8xf32>
    %103 = vector.shape_cast %102 : vector<8xf32> to vector<8x1xf32>
    %cst_56 = arith.constant 3.200000e+01 : f32
    %104 = vector.broadcast %cst_56 : f32 to vector<8x1xf32>
    %105 = arith.divf %103, %104 : vector<8x1xf32>
    %106 = vector.broadcast %105 : vector<8x1xf32> to vector<8x32xf32>
    %107 = arith.subf %99, %106 : vector<8x32xf32>
    %108 = arith.mulf %107, %107 : vector<8x32xf32>
    %cst_57 = arith.constant dense<0.000000e+00> : vector<8xf32>
    %109 = vector.multi_reduction <add>, %108, %cst_57 [1] : vector<8x32xf32> to vector<8xf32>
    %110 = vector.shape_cast %109 : vector<8xf32> to vector<8x1xf32>
    %cst_58 = arith.constant 3.200000e+01 : f32
    %111 = vector.broadcast %cst_58 : f32 to vector<8x1xf32>
    %112 = arith.divf %110, %111 : vector<8x1xf32>
    %113 = vector.broadcast %105 : vector<8x1xf32> to vector<8x32xf32>
    %114 = arith.subf %99, %113 : vector<8x32xf32>
    %cst_59 = arith.constant 9.99999974E-6 : f32
    %115 = vector.broadcast %cst_59 : f32 to vector<8x1xf32>
    %116 = arith.addf %112, %115 : vector<8x1xf32>
    %117 = math.rsqrt %116 : vector<8x1xf32>
    %118 = vector.broadcast %117 : vector<8x1xf32> to vector<8x32xf32>
    %119 = arith.mulf %114, %118 : vector<8x32xf32>
    %120 = vector.broadcast %100 : vector<1x32xf32> to vector<8x32xf32>
    %121 = arith.mulf %119, %120 : vector<8x32xf32>
    %122 = vector.broadcast %101 : vector<1x32xf32> to vector<8x32xf32>
    %123 = arith.addf %121, %122 : vector<8x32xf32>
    %c0_60 = arith.constant 0 : index
    %c0_61 = arith.constant 0 : index
    %124 = vector.load %arg13[%c0_60, %c0_61] : memref<32x2048xf32, #tpu.memory_space<vmem>>, vector<32x2048xf32>
    %cst_62 = arith.constant dense<0.000000e+00> : vector<8x2048xf32>
    %125 = tpu.matmul %123, %124, %cst_62 {dimension_numbers = #tpu.dot_dimension_numbers<[1], [0], [0], [1], [0, 0, 1, 1], [], []>} : vector<8x32xf32>, vector<32x2048xf32>, vector<8x2048xf32> -> vector<8x2048xf32>
    %c0_63 = arith.constant 0 : index
    %c0_64 = arith.constant 0 : index
    %126 = vector.load %arg14[%c0_63, %c0_64] : memref<1x2048xf32, #tpu.memory_space<vmem>>, vector<1x2048xf32>
    %127 = vector.broadcast %126 : vector<1x2048xf32> to vector<8x2048xf32>
    %128 = arith.addf %125, %127 : vector<8x2048xf32>
    %cst_65 = arith.constant 0.000000e+00 : f32
    %129 = vector.broadcast %cst_65 : f32 to vector<8x2048xf32>
    %130 = arith.maximumf %128, %129 : vector<8x2048xf32>
    %c0_66 = arith.constant 0 : index
    %c0_67 = arith.constant 0 : index
    %131 = vector.load %arg15[%c0_66, %c0_67] : memref<2048x32xf32, #tpu.memory_space<vmem>>, vector<2048x32xf32>
    %cst_68 = arith.constant dense<0.000000e+00> : vector<8x32xf32>
    %132 = tpu.matmul %130, %131, %cst_68 {dimension_numbers = #tpu.dot_dimension_numbers<[1], [0], [0], [1], [0, 0, 1, 1], [], []>} : vector<8x2048xf32>, vector<2048x32xf32>, vector<8x32xf32> -> vector<8x32xf32>
    %c0_69 = arith.constant 0 : index
    %c0_70 = arith.constant 0 : index
    %133 = vector.load %arg16[%c0_69, %c0_70] : memref<1x32xf32, #tpu.memory_space<vmem>>, vector<1x32xf32>
    %134 = vector.broadcast %133 : vector<1x32xf32> to vector<8x32xf32>
    %135 = arith.addf %132, %134 : vector<8x32xf32>
    %136 = arith.addf %135, %123 : vector<8x32xf32>
    %c0_71 = arith.constant 0 : index
    %c0_72 = arith.constant 0 : index
    %137 = vector.load %arg17[%c0_71, %c0_72] : memref<1x32xf32, #tpu.memory_space<vmem>>, vector<1x32xf32>
    %c0_73 = arith.constant 0 : index
    %c0_74 = arith.constant 0 : index
    %138 = vector.load %arg18[%c0_73, %c0_74] : memref<1x32xf32, #tpu.memory_space<vmem>>, vector<1x32xf32>
    %cst_75 = arith.constant dense<0.000000e+00> : vector<8xf32>
    %139 = vector.multi_reduction <add>, %136, %cst_75 [1] : vector<8x32xf32> to vector<8xf32>
    %140 = vector.shape_cast %139 : vector<8xf32> to vector<8x1xf32>
    %cst_76 = arith.constant 3.200000e+01 : f32
    %141 = vector.broadcast %cst_76 : f32 to vector<8x1xf32>
    %142 = arith.divf %140, %141 : vector<8x1xf32>
    %143 = vector.broadcast %142 : vector<8x1xf32> to vector<8x32xf32>
    %144 = arith.subf %136, %143 : vector<8x32xf32>
    %145 = arith.mulf %144, %144 : vector<8x32xf32>
    %cst_77 = arith.constant dense<0.000000e+00> : vector<8xf32>
    %146 = vector.multi_reduction <add>, %145, %cst_77 [1] : vector<8x32xf32> to vector<8xf32>
    %147 = vector.shape_cast %146 : vector<8xf32> to vector<8x1xf32>
    %cst_78 = arith.constant 3.200000e+01 : f32
    %148 = vector.broadcast %cst_78 : f32 to vector<8x1xf32>
    %149 = arith.divf %147, %148 : vector<8x1xf32>
    %150 = vector.broadcast %142 : vector<8x1xf32> to vector<8x32xf32>
    %151 = arith.subf %136, %150 : vector<8x32xf32>
    %cst_79 = arith.constant 9.99999974E-6 : f32
    %152 = vector.broadcast %cst_79 : f32 to vector<8x1xf32>
    %153 = arith.addf %149, %152 : vector<8x1xf32>
    %154 = math.rsqrt %153 : vector<8x1xf32>
    %155 = vector.broadcast %154 : vector<8x1xf32> to vector<8x32xf32>
    %156 = arith.mulf %151, %155 : vector<8x32xf32>
    %157 = vector.broadcast %137 : vector<1x32xf32> to vector<8x32xf32>
    %158 = arith.mulf %156, %157 : vector<8x32xf32>
    %159 = vector.broadcast %138 : vector<1x32xf32> to vector<8x32xf32>
    %160 = arith.addf %158, %159 : vector<8x32xf32>
    %c0_80 = arith.constant 0 : index
    %c0_81 = arith.constant 0 : index
    %c0_82 = arith.constant 0 : index
    %161 = vector.load %arg19[%c0_80, %c0_81, %c0_82] : memref<1x8x32xf32, #tpu.memory_space<vmem>>, vector<1x8x32xf32>
    %162 = vector.shape_cast %161 : vector<1x8x32xf32> to vector<8x32xf32>
    %163 = vector.shape_cast %160 : vector<8x32xf32> to vector<1x8x32xf32>
    tpu.vector_store %arg19[%c0_80, %c0_81, %c0_82], %163 {strides = array<i32>} : memref<1x8x32xf32, #tpu.memory_space<vmem>>, vector<1x8x32xf32>,
    return
  }
  func.func @transform_0(%arg0: i32) -> (i32, i32, i32) {
    %c0_i32 = arith.constant 0 : i32
    %c0_i32_0 = arith.constant 0 : i32
    %c0_i32_1 = arith.constant 0 : i32
    return %arg0, %c0_i32, %c0_i32_0 : i32, i32, i32
  }
  func.func @transform_1(%arg0: i32) -> (i32, i32, i32) {
    %c0_i32 = arith.constant 0 : i32
    %c0_i32_0 = arith.constant 0 : i32
    %c0_i32_1 = arith.constant 0 : i32
    return %arg0, %c0_i32, %c0_i32_0 : i32, i32, i32
  }
  func.func @transform_2(%arg0: i32) -> (i32, i32) {
    %c0_i32 = arith.constant 0 : i32
    %c0_i32_0 = arith.constant 0 : i32
    %c0_i32_1 = arith.constant 0 : i32
    return %c0_i32, %c0_i32_0 : i32, i32
  }
  func.func @transform_3(%arg0: i32) -> (i32, i32) {
    %c0_i32 = arith.constant 0 : i32
    %c0_i32_0 = arith.constant 0 : i32
    %c0_i32_1 = arith.constant 0 : i32
    return %c0_i32, %c0_i32_0 : i32, i32
  }
  func.func @transform_4(%arg0: i32) -> (i32, i32) {
    %c0_i32 = arith.constant 0 : i32
    %c0_i32_0 = arith.constant 0 : i32
    %c0_i32_1 = arith.constant 0 : i32
    return %c0_i32, %c0_i32_0 : i32, i32
  }
  func.func @transform_5(%arg0: i32) -> (i32, i32) {
    %c0_i32 = arith.constant 0 : i32
    %c0_i32_0 = arith.constant 0 : i32
    %c0_i32_1 = arith.constant 0 : i32
    return %c0_i32, %c0_i32_0 : i32, i32
  }
  func.func @transform_6(%arg0: i32) -> (i32, i32) {
    %c0_i32 = arith.constant 0 : i32
    %c0_i32_0 = arith.constant 0 : i32
    %c0_i32_1 = arith.constant 0 : i32
    return %c0_i32, %c0_i32_0 : i32, i32
  }
  func.func @transform_7(%arg0: i32) -> (i32, i32) {
    %c0_i32 = arith.constant 0 : i32
    %c0_i32_0 = arith.constant 0 : i32
    %c0_i32_1 = arith.constant 0 : i32
    return %c0_i32, %c0_i32_0 : i32, i32
  }
  func.func @transform_8(%arg0: i32) -> (i32, i32) {
    %c0_i32 = arith.constant 0 : i32
    %c0_i32_0 = arith.constant 0 : i32
    %c0_i32_1 = arith.constant 0 : i32
    return %c0_i32, %c0_i32_0 : i32, i32
  }
  func.func @transform_9(%arg0: i32) -> (i32, i32) {
    %c0_i32 = arith.constant 0 : i32
    %c0_i32_0 = arith.constant 0 : i32
    %c0_i32_1 = arith.constant 0 : i32
    return %c0_i32, %c0_i32_0 : i32, i32
  }
  func.func @transform_10(%arg0: i32) -> (i32, i32) {
    %c0_i32 = arith.constant 0 : i32
    %c0_i32_0 = arith.constant 0 : i32
    %c0_i32_1 = arith.constant 0 : i32
    return %c0_i32, %c0_i32_0 : i32, i32
  }
  func.func @transform_11(%arg0: i32) -> (i32, i32) {
    %c0_i32 = arith.constant 0 : i32
    %c0_i32_0 = arith.constant 0 : i32
    %c0_i32_1 = arith.constant 0 : i32
    return %c0_i32, %c0_i32_0 : i32, i32
  }
  func.func @transform_12(%arg0: i32) -> (i32, i32) {
    %c0_i32 = arith.constant 0 : i32
    %c0_i32_0 = arith.constant 0 : i32
    %c0_i32_1 = arith.constant 0 : i32
    return %c0_i32, %c0_i32_0 : i32, i32
  }
  func.func @transform_13(%arg0: i32) -> (i32, i32) {
    %c0_i32 = arith.constant 0 : i32
    %c0_i32_0 = arith.constant 0 : i32
    %c0_i32_1 = arith.constant 0 : i32
    return %c0_i32, %c0_i32_0 : i32, i32
  }
  func.func @transform_14(%arg0: i32) -> (i32, i32) {
    %c0_i32 = arith.constant 0 : i32
    %c0_i32_0 = arith.constant 0 : i32
    %c0_i32_1 = arith.constant 0 : i32
    return %c0_i32, %c0_i32_0 : i32, i32
  }
  func.func @transform_15(%arg0: i32) -> (i32, i32) {
    %c0_i32 = arith.constant 0 : i32
    %c0_i32_0 = arith.constant 0 : i32
    %c0_i32_1 = arith.constant 0 : i32
    return %c0_i32, %c0_i32_0 : i32, i32
  }
  func.func @transform_16(%arg0: i32) -> (i32, i32) {
    %c0_i32 = arith.constant 0 : i32
    %c0_i32_0 = arith.constant 0 : i32
    %c0_i32_1 = arith.constant 0 : i32
    return %c0_i32, %c0_i32_0 : i32, i32
  }
  func.func @transform_17(%arg0: i32) -> (i32, i32) {
    %c0_i32 = arith.constant 0 : i32
    %c0_i32_0 = arith.constant 0 : i32
    %c0_i32_1 = arith.constant 0 : i32
    return %c0_i32, %c0_i32_0 : i32, i32
  }
  func.func @transform_18(%arg0: i32) -> (i32, i32, i32) {
    %c0_i32 = arith.constant 0 : i32
    %c0_i32_0 = arith.constant 0 : i32
    %c0_i32_1 = arith.constant 0 : i32
    return %arg0, %c0_i32, %c0_i32_0 : i32, i32, i32
  }
}

</mosaic_0001>

<bundles_post_ra>
// kernel: transformer_forward.5
= control target key start
LH: loop header
LB: loop body
LE: loop exit
PB: predicated region body
PF: predicated region fallthrough
CT: control target
= control target key end

     0   :  { %7 = vsyncpa [#allocation3], 0  ;;  %s1393_s0 = inlined_call_operand.vmem [shape: f32[16,32], index: 0, kind: input, shape index: {}]   ;;  %s1394_s1 = inlined_call_operand.hbm [shape: bf16[32,51200], index: 1, kind: input, shape index: {}]   ;;  %s1395_s2 = inlined_call_operand.vmem [shape: f32[16,51200], index: 2, kind: output, shape index: {}]  }
   0x1   :  { %9 = vsyncpa [#allocation3 + $0x1], 0  ;;  %s1087_s9 = smov 0   ;;  %s1089_s10 = smov 0  }
   0x2   :  { %s1091_s11 = smov 0   ;;  %s1093_s12 = smov 0  }
   0x3 LB: > { %s1106_s13 = sadd.s32 4294967295, %s1067_s12   ;;  %s1109_s14 = sadd.s32 1, %s1067_s12   ;;  %s1067_s12 = sphi %s1093_s12, %s1403_s12   ;;  %s1063_s11 = sphi %s1091_s11, %s1402_s11   ;;  %s1059_s10 = sphi %s1089_s10, %s1401_s10   ;;  %s1055_s9 = sphi %s1087_s9, %s1400_s9  }
   0x4   : > { %s40_s15 = ssub.s32 %s1067_s12, %s1109_s14  ;;  %s43_s16 = sadd.s32 1, %s1063_s11 }
   0x5   : > { %p41_p0 = scmp.eq.s32.totalorder %s40_s15, 0  ;;  %p50_p1 = scmp.ne.s32.totalorder %s1063_s11, %s1059_s10 }
   0x6   : > { %p51_p2 = scmp.eq.s32.totalorder %s1067_s12, 0  ;;  %p56_p3 = scmp.ne.s32.totalorder %s1059_s10, %s1055_s9 }
   0x7   : > { %s1119_s17 = scalar_select %p41_p0, %s1063_s11, %s43_s16  }
   0x8   : > { %p1121_p4 = por %p51_p2, %p50_p1  ;;  %p57_p5 = scmp.eq.s32.totalorder %s1106_s13, 0 }
   0x9   : > { %p80_p6 = scmp.eq.s32.totalorder %s1106_s13, 24  ;;  %p967_p8 = scmp.lt.s32.totalorder %s1067_s12, 25 }
   0xa   : > { %p1127_p7 = por %p57_p5, %p56_p3  ;;  %s109_s21 = sand.u32 1, %s1063_s11  }
   0xb   : > { %p1132_p9 = por %p80_p6, %p50_p1  ;;  %s772_s22 = sshll.u32 %s109_s21, 8 }
   0xc   : > { %s927_s23 = sshll.u32 %s1067_s12, 6  ;;  %s113_s27 = scalar_lea.vmem [#allocation2], %s772_s22 }
   0xd   : > { %s118_s26 = scalar_lea.hbm %s1394_s1, %s927_s23  ;;  %s121_s28 = sshll.u32 %s113_s27, 4  ;;  %s122_s28 = int_to_ptr.vmem [resolvable:$true] %s121_s28 }
   0xe   : > { %s119_s29 = sshll.u32 %s118_s26, 4  ;;  %p1143_p10 = pnand %p967_p8, %p1121_p4  ;;  %s120_s29 = int_to_ptr.hbm [resolvable:$true] %s119_s29 }
   0xf   : > { %s110_s3 = scalar_lea.sflag [#allocation3], %s109_s21  ;;  %s1003_s4 = sshra.s32 %s120_s29, 4  ;;  %s1004_s4 = int_to_ptr.hbm [resolvable:$true] %s1003_s4 }
  0x10   : > { %s1005_s5 = scalar_lea.hbm %s1004_s4, 256  ;;  %p1007_p12 = pneg %p1143_p10 }
  0x11   : > { %p1006_p11 = scmp.ne.s32.totalorder %s1004_s4, %s1005_s5  ;;  %s1010_s8 = scalar_lea.hbm %s1394_s1, 6400 }
  0x12   : > { %p1011_p1 = scmp.lt.s32.totalorder %s1004_s4, %s1394_s1  ;;  %p1012_p2 = scmp.lt.s32.totalorder %s1010_s8, %s1005_s5 }
  0x13   : > { %p1008_p13 = pnand %p1007_p12, %p1006_p11 }
  0x14   : > { %p1013_p3 = por %p1012_p2, %p1011_p1 }
  0x15   : > { %p1009_p0 = pneg %p1008_p13 }
  0x17   : > { %p1014_p4 = pnand %p1013_p3, %p1009_p0 }
  0x19   : > { %1017 = shalt.err (!%p1014_p4)
}
  0x1a   : > { %s1069_s16 = smov 25600   ;;  %s1070_s18 = smov 1024  }
  0x1b   : > { %s1071_s21 = smov 64   ;;  %p775_p5 = scmp.ge.s32.totalorder %s1067_s12, 1 }
  0x1c   : > { %966 = dma.hbm_to_vmem [thread:$0]  (!%p1143_p10), %s120_s29, 4096, %s122_s28, %s110_s3, %s1069_s16, %s1070_s18, %s1071_s21  }
  0x1d   : > { %p129_p6 = scmp.lt.s32.totalorder %s1067_s12, 26 }
  0x1f   : > { %p130_p8 = pnand %p775_p5, %p129_p6 }
  0x20   : > { %s135_s22 = sand.u32 (!%p130_p8), 1, %s1059_s10  }
  0x21   : > { %133 = sbr.rel (%p130_p8) target bundleno = 249 (0xf9), region = 28  ;;  %s1160_s23 = sshll.u32 (!%p130_p8), %s135_s22, 8 }
  0x22   : > { %s136_s24 = scalar_lea.sflag (!%p130_p8), [#allocation3], %s135_s22  ;;  %s1163_s25 = scalar_lea.vmem (!%p130_p8), [#allocation2], %s1160_s23 }
  0x26   : > { %1050 = dma.done.wait (%p1127_p7), %s136_s24, 4096  }
  0x27   : > { %1052 = vsyncadd (%p1127_p7), %s136_s24, 4294963200  ;;  %v844_v0 = vld [vmem:[%s1163_s25 + $0x80] sm:$0xf]  ;;  %v944_v2 = vld [vmem:[%s1163_s25 + $0x84] sm:$0xf]  ;;  %vm358_vm0 = vcmask 261120  }
  0x28   : > { %v952_v1 = vld [vmem:[%s1163_s25 + $0xbc] sm:$0xf0]  ;;  %v846_v4 = vld [vmem:[%s1163_s25 + $0xc0] sm:$0xf0]  ;;  %v852_v5 = vld [vmem:[%s1163_s25 + $0x88] sm:$0xf] }
  0x29   : > { %v845_v3 = vor.u32 %v952_v1, %v844_v0  ;;  %v953_v6 = vld [vmem:[%s1163_s25 + $0xc4] sm:$0xf0]  ;;  %v849_v7 = vor.u32 %v944_v2, %v846_v4  ;;  %v945_v9 = vld [vmem:[%s1163_s25 + $0x8c] sm:$0xf]  ;;  %v780_v11 = vld [vmem:[%s1163_s25] sm:$0xf] }
  0x2a   : > { %v853_v8 = vor.u32 %v953_v6, %v852_v5  ;;  %v854_v10 = vld [vmem:[%s1163_s25 + $0xc8] sm:$0xf0]  ;;  %v936_v13 = vld [vmem:[%s1163_s25 + $0x3c] sm:$0xf0]  ;;  %v928_v14 = vld [vmem:[%s1163_s25 + $0x4] sm:$0xf] }
  0x2b   : > { %368 = vmatpush.bf16.msra.mxu0 %v845_v3  ;;  %v857_v12 = vor.u32 %v945_v9, %v854_v10  ;;  %v782_v15 = vld [vmem:[%s1163_s25 + $0x40] sm:$0xf0]  ;;  %382 = vmatpush.bf16.msra.mxu1 %v849_v7  ;;  %v781_v16 = vor.u32 %v936_v13, %v780_v11  ;;  %v788_v18 = vld [vmem:[%s1163_s25 + $0x8] sm:$0xf]  ;;  %v929_v20 = vld [vmem:[%s1163_s25 + $0xc] sm:$0xf] }
  0x2c   : > { %396 = vmatpush.bf16.msra.mxu2 %v853_v8  ;;  %v785_v17 = vor.u32 %v928_v14, %v782_v15  ;;  %v937_v19 = vld [vmem:[%s1163_s25 + $0x44] sm:$0xf0]  ;;  %v790_v22 = vld [vmem:[%s1163_s25 + $0x48] sm:$0xf0]  ;;  %v163_v23 = vld [vmem:[%s1393_s0] sm:$0xff]  ;;  %s1274_s28 = scalar_lea.vmem [#allocation4], %s1160_s23 }
  0x2d   : > { %410 = vmatpush.bf16.msra.mxu3 %v857_v12  ;;  %v789_v21 = vor.u32 %v937_v19, %v788_v18  ;;  %v164_v24 = vld [vmem:[%s1393_s0 + $0x8] sm:$0xff]  ;;  %v793_v25 = vor.u32 %v929_v20, %v790_v22  ;;  %v868_v27 = vld [vmem:[%s1163_s25 + $0x98] sm:$0xf]  ;;  %v947_v29 = vld [vmem:[%s1163_s25 + $0x9c] sm:$0xf]  ;;  %s960_s29 = sshll.u32 (%p1132_p9), %s1106_s13, 7 }
  0x2e   : > { %v1191_v26 = vpack.c.bf16 %v164_v24, %v163_v23  ;;  %v955_v28 = vld [vmem:[%s1163_s25 + $0xd4] sm:$0xf0]  ;;  %v870_v31 = vld [vmem:[%s1163_s25 + $0xd8] sm:$0xf0]  ;;  %v860_v32 = vld [vmem:[%s1163_s25 + $0x90] sm:$0xf]  ;;  %s1316_s4 = scalar_lea.vmem (%p1132_p9), %s1395_s2, %s960_s29 }
  0x2f   : > { %369 = vmatpush.bf16.msra.mxu0 %v781_v16  ;;  %v869_v30 = vor.u32 %v955_v28, %v868_v27  ;;  %v954_v33 = vld [vmem:[%s1163_s25 + $0xcc] sm:$0xf0]  ;;  %383 = vmatpush.bf16.msra.mxu1 %v785_v17  ;;  %v873_v34 = vor.u32 %v947_v29, %v870_v31  ;;  %v946_v36 = vld [vmem:[%s1163_s25 + $0x94] sm:$0xf]  ;;  %v804_v38 = vld [vmem:[%s1163_s25 + $0x18] sm:$0xf] }
  0x30   : > { %397 = vmatpush.bf16.msra.mxu2 %v789_v21  ;;  %v861_v35 = vor.u32 %v954_v33, %v860_v32  ;;  %v862_v37 = vld [vmem:[%s1163_s25 + $0xd0] sm:$0xf0]  ;;  %v939_v40 = vld [vmem:[%s1163_s25 + $0x54] sm:$0xf0]  ;;  %v931_v41 = vld [vmem:[%s1163_s25 + $0x1c] sm:$0xf] }
  0x31   : > { %411 = vmatpush.bf16.msra.mxu3 %v793_v25  ;;  %v865_v39 = vor.u32 %v946_v36, %v862_v37  ;;  %v806_v42 = vld [vmem:[%s1163_s25 + $0x58] sm:$0xf0]  ;;  %v805_v43 = vor.u32 %v939_v40, %v804_v38  ;;  %v796_v45 = vld [vmem:[%s1163_s25 + $0x10] sm:$0xf]  ;;  %v930_v47 = vld [vmem:[%s1163_s25 + $0x14] sm:$0xf] }
  0x32   : > { %906 = vmatmul.msk.bf16.vlgmr.msra.gmra.mxu0 %vm358_vm0, %v1191_v26  ;;  %v809_v44 = vor.u32 %v931_v41, %v806_v42  ;;  %v938_v46 = vld [vmem:[%s1163_s25 + $0x4c] sm:$0xf0]  ;;  %907 = vmatmul.msk.bf16.vlgmr.msra.gmra.mxu1 %vm358_vm0, %v1191_v26  ;;  %v798_v48 = vld [vmem:[%s1163_s25 + $0x50] sm:$0xf0]  ;;  %v884_v49 = vld [vmem:[%s1163_s25 + $0xa8] sm:$0xf] }
  0x33   : > { %908 = vmatmul.msk.bf16.vlgmr.msra.gmra.mxu2 %vm358_vm0, %v1191_v26  ;;  %v957_v50 = vld [vmem:[%s1163_s25 + $0xe4] sm:$0xf0]  ;;  %424 = vmatpush.bf16.msrb.mxu0 %v861_v35  ;;  %v797_v51 = vor.u32 %v938_v46, %v796_v45  ;;  %v949_v53 = vld [vmem:[%s1163_s25 + $0xac] sm:$0xf]  ;;  %v876_v55 = vld [vmem:[%s1163_s25 + $0xa0] sm:$0xf]  ;;  %v801_v56 = vor.u32 %v930_v47, %v798_v48 }
  0x34   : > { %452 = vmatpush.bf16.msrb.mxu2 %v869_v30  ;;  %909 = vmatmul.msk.bf16.vlgmr.msra.gmra.mxu3 %vm358_vm0, %v1191_v26  ;;  %v885_v52 = vor.u32 %v957_v50, %v884_v49  ;;  %v886_v54 = vld [vmem:[%s1163_s25 + $0xe8] sm:$0xf0]  ;;  %v956_v58 = vld [vmem:[%s1163_s25 + $0xdc] sm:$0xf0]  ;;  %v948_v59 = vld [vmem:[%s1163_s25 + $0xa4] sm:$0xf] }
  0x35   : > { %466 = vmatpush.bf16.msrb.mxu3 %v873_v34  ;;  %438 = vmatpush.bf16.msrb.mxu1 %v865_v39  ;;  %v889_v57 = vor.u32 %v949_v53, %v886_v54  ;;  %v878_v60 = vld [vmem:[%s1163_s25 + $0xe0] sm:$0xf0]  ;;  %v877_v61 = vor.u32 %v956_v58, %v876_v55  ;;  %v820_v63 = vld [vmem:[%s1163_s25 + $0x28] sm:$0xf]  ;;  %v933_v1 = vld [vmem:[%s1163_s25 + $0x2c] sm:$0xf] }
  0x36   : > { %v881_v62 = vor.u32 %v948_v59, %v878_v60  ;;  %v941_v0 = vld [vmem:[%s1163_s25 + $0x64] sm:$0xf0]  ;;  %v822_v3 = vld [vmem:[%s1163_s25 + $0x68] sm:$0xf0]  ;;  %v812_v4 = vld [vmem:[%s1163_s25 + $0x20] sm:$0xf] }
  0x37   : > { %v821_v2 = vor.u32 %v941_v0, %v820_v63  ;;  %v940_v5 = vld [vmem:[%s1163_s25 + $0x5c] sm:$0xf0]  ;;  %425 = vmatpush.bf16.msrb.mxu0 %v797_v51  ;;  %v825_v6 = vor.u32 %v933_v1, %v822_v3  ;;  %v932_v7 = vld [vmem:[%s1163_s25 + $0x24] sm:$0xf]  ;;  %v900_v11 = vld [vmem:[%s1163_s25 + $0xb8] sm:$0xf] }
  0x38   : > { %453 = vmatpush.bf16.msrb.mxu2 %v805_v43  ;;  %v814_v8 = vld [vmem:[%s1163_s25 + $0x60] sm:$0xf0]  ;;  %v813_v9 = vor.u32 %v940_v5, %v812_v4  ;;  %v959_v12 = vld [vmem:[%s1163_s25 + $0xf4] sm:$0xf0]  ;;  %v951_v13 = vld [vmem:[%s1163_s25 + $0xbc] sm:$0xf] }
  0x39   : > { %467 = vmatpush.bf16.msrb.mxu3 %v809_v44  ;;  %439 = vmatpush.bf16.msrb.mxu1 %v801_v56  ;;  %v817_v10 = vor.u32 %v932_v7, %v814_v8  ;;  %v902_v14 = vld [vmem:[%s1163_s25 + $0xf8] sm:$0xf0]  ;;  %v892_v15 = vld [vmem:[%s1163_s25 + $0xb0] sm:$0xf]  ;;  %v950_v17 = vld [vmem:[%s1163_s25 + $0xb4] sm:$0xf]  ;;  %v901_v19 = vor.u32 %v959_v12, %v900_v11 }
  0x3a   : > { %v958_v16 = vld [vmem:[%s1163_s25 + $0xec] sm:$0xf0]  ;;  %v894_v18 = vld [vmem:[%s1163_s25 + $0xf0] sm:$0xf0]  ;;  %v905_v20 = vor.u32 %v951_v13, %v902_v14  ;;  %v836_v22 = vld [vmem:[%s1163_s25 + $0x38] sm:$0xf] }
  0x3b   : > { %480 = vmatpush.bf16.msra.mxu0 %v877_v61  ;;  %v893_v21 = vor.u32 %v958_v16, %v892_v15  ;;  %v943_v23 = vld [vmem:[%s1163_s25 + $0x74] sm:$0xf0]  ;;  %v935_v24 = vld [vmem:[%s1163_s25 + $0x3c] sm:$0xf]  ;;  %v897_v25 = vor.u32 %v950_v17, %v894_v18  ;;  %v828_v28 = vld [vmem:[%s1163_s25 + $0x30] sm:$0xf] }
  0x3c   : > { %508 = vmatpush.bf16.msra.mxu2 %v885_v52  ;;  %v838_v27 = vld [vmem:[%s1163_s25 + $0x78] sm:$0xf0]  ;;  %v942_v29 = vld [vmem:[%s1163_s25 + $0x6c] sm:$0xf0]  ;;  %v934_v30 = vld [vmem:[%s1163_s25 + $0x34] sm:$0xf]  ;;  %v837_v32 = vor.u32 %v943_v23, %v836_v22 }
  0x3d   : > { %522 = vmatpush.bf16.msra.mxu3 %v889_v57  ;;  %494 = vmatpush.bf16.msra.mxu1 %v881_v62  ;;  %v830_v31 = vld [vmem:[%s1163_s25 + $0x70] sm:$0xf0]  ;;  %v841_v33 = vor.u32 %v935_v24, %v838_v27  ;;  %v829_v34 = vor.u32 %v942_v29, %v828_v28 }
  0x3e   : > { %v833_v35 = vor.u32 %v934_v30, %v830_v31 }
  0x3f   : > { %481 = vmatpush.bf16.msra.mxu0 %v813_v9 }
  0x40   : > { %509 = vmatpush.bf16.msra.mxu2 %v821_v2 }
  0x41   : > { %523 = vmatpush.bf16.msra.mxu3 %v825_v6  ;;  %495 = vmatpush.bf16.msra.mxu1 %v817_v10 }
  0x42   : > { %910 = vmatmul.msk.bf16.vlgmr.msrb.gmra.mxu0 %vm358_vm0, %v1191_v26  ;;  %911 = vmatmul.msk.bf16.vlgmr.msrb.gmra.mxu1 %vm358_vm0, %v1191_v26 }
  0x43   : > { %912 = vmatmul.msk.bf16.vlgmr.msrb.gmra.mxu2 %vm358_vm0, %v1191_v26  ;;  %536 = vmatpush.bf16.msrb.mxu0 %v893_v21 }
  0x44   : > { %913 = vmatmul.msk.bf16.vlgmr.msrb.gmra.mxu3 %vm358_vm0, %v1191_v26  ;;  %564 = vmatpush.bf16.msrb.mxu2 %v901_v19 }
  0x45   : > { %578 = vmatpush.bf16.msrb.mxu3 %v905_v20  ;;  %550 = vmatpush.bf16.msrb.mxu1 %v897_v25 }
  0x47   : > { %537 = vmatpush.bf16.msrb.mxu0 %v829_v34 }
  0x48   : > { %565 = vmatpush.bf16.msrb.mxu2 %v837_v32 }
  0x49   : > { %579 = vmatpush.bf16.msrb.mxu3 %v841_v33  ;;  %551 = vmatpush.bf16.msrb.mxu1 %v833_v35 }
  0x52   : > { %914 = vmatmul.msk.bf16.vlgmr.msra.gmra.mxu0 %vm358_vm0, %v1191_v26  ;;  %915 = vmatmul.msk.bf16.vlgmr.msra.gmra.mxu1 %vm358_vm0, %v1191_v26 }
  0x53   : > { %916 = vmatmul.msk.bf16.vlgmr.msra.gmra.mxu2 %vm358_vm0, %v1191_v26 }
  0x54   : > { %917 = vmatmul.msk.bf16.vlgmr.msra.gmra.mxu3 %vm358_vm0, %v1191_v26 }
  0x62   : > { %918 = vmatmul.msk.bf16.vlgmr.msrb.gmra.mxu0 %vm358_vm0, %v1191_v26  ;;  %919 = vmatmul.msk.bf16.vlgmr.msrb.gmra.mxu1 %vm358_vm0, %v1191_v26 }
  0x63   : > { %920 = vmatmul.msk.bf16.vlgmr.msrb.gmra.mxu2 %vm358_vm0, %v1191_v26 }
  0x64   : > { %921 = vmatmul.msk.bf16.vlgmr.msrb.gmra.mxu3 %vm358_vm0, %v1191_v26 }
  0xaf   : > { %v371_v36 = vpop.f32.mrf.mxu0  ;;  %v385_v37 = vpop.f32.mrf.mxu1 }
  0xb0   : > { %586 = vst [vmem:[%s1274_s28] sm:$0xff] %v371_v36 }
  0xb1   : > { %587 = vst [vmem:[%s1274_s28 + $0x8] sm:$0xff] %v385_v37 }
  0xb6   : > { %v399_v38 = vpop.f32.mrf.mxu2 }
  0xb7   : > { %588 = vst [vmem:[%s1274_s28 + $0x10] sm:$0xff] %v399_v38  ;;  %v413_v26 = vpop.f32.mrf.mxu3  ;;  %v373_v39 = vpop.f32.mrf.mxu0  ;;  %v640_v3 = vld [vmem:[%s1274_s28] sm:$0xff] (%p1132_p9) }
  0xb8   : > { %589 = vst [vmem:[%s1274_s28 + $0x18] sm:$0xff] %v413_v26  ;;  %v387_v40 = vpop.f32.mrf.mxu1  ;;  %v642_v4 = vld [vmem:[%s1274_s28 + $0x8] sm:$0xff] (%p1132_p9) }
  0xb9   : > { %602 = vst [vmem:[%s1274_s28 + $0x80] sm:$0xff] %v373_v39 }
  0xba   : > { %603 = vst [vmem:[%s1274_s28 + $0x88] sm:$0xff] %v387_v40 }
  0xbb   : > { %641 = vst [vmem:[%s1316_s4] sm:$0xff] (%p1132_p9), %v640_v3 }
  0xbc   : > { %643 = vst [vmem:[%s1316_s4 + $0x8] sm:$0xff] (%p1132_p9), %v642_v4 }
  0xbe   : > { %v401_v41 = vpop.f32.mrf.mxu2  ;;  %v644_v5 = vld [vmem:[%s1274_s28 + $0x10] sm:$0xff] (%p1132_p9) }
  0xbf   : > { %604 = vst [vmem:[%s1274_s28 + $0x90] sm:$0xff] %v401_v41  ;;  %v415_v42 = vpop.f32.mrf.mxu3  ;;  %v427_v43 = vpop.f32.mrf.mxu0  ;;  %v646_v6 = vld [vmem:[%s1274_s28 + $0x18] sm:$0xff] (%p1132_p9) }
  0xc0   : > { %605 = vst [vmem:[%s1274_s28 + $0x98] sm:$0xff] %v415_v42  ;;  %v441_v44 = vpop.f32.mrf.mxu1  ;;  %v672_v19 = vld [vmem:[%s1274_s28 + $0x80] sm:$0xff] (%p1132_p9) }
  0xc1   : > { %590 = vst [vmem:[%s1274_s28 + $0x20] sm:$0xff] %v427_v43  ;;  %v674_v20 = vld [vmem:[%s1274_s28 + $0x88] sm:$0xff] (%p1132_p9) }
  0xc2   : > { %591 = vst [vmem:[%s1274_s28 + $0x28] sm:$0xff] %v441_v44 }
  0xc3   : > { %645 = vst [vmem:[%s1316_s4 + $0x10] sm:$0xff] (%p1132_p9), %v644_v5 }
  0xc4   : > { %647 = vst [vmem:[%s1316_s4 + $0x18] sm:$0xff] (%p1132_p9), %v646_v6 }
  0xc5   : > { %673 = vst [vmem:[%s1316_s4 + $0xc80] sm:$0xff] (%p1132_p9), %v672_v19 }
  0xc6   : > { %v455_v45 = vpop.f32.mrf.mxu2  ;;  %v676_v21 = vld [vmem:[%s1274_s28 + $0x90] sm:$0xff] (%p1132_p9)  ;;  %675 = vst [vmem:[%s1316_s4 + $0xc88] sm:$0xff] (%p1132_p9), %v674_v20 }
  0xc7   : > { %592 = vst [vmem:[%s1274_s28 + $0x30] sm:$0xff] %v455_v45  ;;  %v469_v46 = vpop.f32.mrf.mxu3  ;;  %v429_v47 = vpop.f32.mrf.mxu0  ;;  %v678_v22 = vld [vmem:[%s1274_s28 + $0x98] sm:$0xff] (%p1132_p9) }
  0xc8   : > { %593 = vst [vmem:[%s1274_s28 + $0x38] sm:$0xff] %v469_v46  ;;  %v443_v48 = vpop.f32.mrf.mxu1  ;;  %v648_v7 = vld [vmem:[%s1274_s28 + $0x20] sm:$0xff] (%p1132_p9) }
  0xc9   : > { %606 = vst [vmem:[%s1274_s28 + $0xa0] sm:$0xff] %v429_v47  ;;  %v650_v8 = vld [vmem:[%s1274_s28 + $0x28] sm:$0xff] (%p1132_p9) }
  0xca   : > { %607 = vst [vmem:[%s1274_s28 + $0xa8] sm:$0xff] %v443_v48 }
  0xcb   : > { %649 = vst [vmem:[%s1316_s4 + $0x20] sm:$0xff] (%p1132_p9), %v648_v7 }
  0xcc   : > { %651 = vst [vmem:[%s1316_s4 + $0x28] sm:$0xff] (%p1132_p9), %v650_v8 }
  0xcd   : > { %677 = vst [vmem:[%s1316_s4 + $0xc90] sm:$0xff] (%p1132_p9), %v676_v21 }
  0xce   : > { %v457_v49 = vpop.f32.mrf.mxu2  ;;  %v652_v9 = vld [vmem:[%s1274_s28 + $0x30] sm:$0xff] (%p1132_p9)  ;;  %679 = vst [vmem:[%s1316_s4 + $0xc98] sm:$0xff] (%p1132_p9), %v678_v22 }
  0xcf   : > { %608 = vst [vmem:[%s1274_s28 + $0xb0] sm:$0xff] %v457_v49  ;;  %v471_v50 = vpop.f32.mrf.mxu3  ;;  %v483_v51 = vpop.f32.mrf.mxu0  ;;  %v654_v10 = vld [vmem:[%s1274_s28 + $0x38] sm:$0xff] (%p1132_p9) }
  0xd0   : > { %609 = vst [vmem:[%s1274_s28 + $0xb8] sm:$0xff] %v471_v50  ;;  %v497_v52 = vpop.f32.mrf.mxu1  ;;  %v680_v23 = vld [vmem:[%s1274_s28 + $0xa0] sm:$0xff] (%p1132_p9) }
  0xd1   : > { %594 = vst [vmem:[%s1274_s28 + $0x40] sm:$0xff] %v483_v51  ;;  %v682_v24 = vld [vmem:[%s1274_s28 + $0xa8] sm:$0xff] (%p1132_p9) }
  0xd2   : > { %595 = vst [vmem:[%s1274_s28 + $0x48] sm:$0xff] %v497_v52 }
  0xd3   : > { %653 = vst [vmem:[%s1316_s4 + $0x30] sm:$0xff] (%p1132_p9), %v652_v9 }
  0xd4   : > { %655 = vst [vmem:[%s1316_s4 + $0x38] sm:$0xff] (%p1132_p9), %v654_v10 }
  0xd5   : > { %681 = vst [vmem:[%s1316_s4 + $0xca0] sm:$0xff] (%p1132_p9), %v680_v23 }
  0xd6   : > { %v511_v53 = vpop.f32.mrf.mxu2  ;;  %v684_v25 = vld [vmem:[%s1274_s28 + $0xb0] sm:$0xff] (%p1132_p9)  ;;  %683 = vst [vmem:[%s1316_s4 + $0xca8] sm:$0xff] (%p1132_p9), %v682_v24 }
  0xd7   : > { %596 = vst [vmem:[%s1274_s28 + $0x50] sm:$0xff] %v511_v53  ;;  %v525_v54 = vpop.f32.mrf.mxu3  ;;  %v485_v55 = vpop.f32.mrf.mxu0  ;;  %v686_v27 = vld [vmem:[%s1274_s28 + $0xb8] sm:$0xff] (%p1132_p9) }
  0xd8   : > { %597 = vst [vmem:[%s1274_s28 + $0x58] sm:$0xff] %v525_v54  ;;  %v499_v56 = vpop.f32.mrf.mxu1  ;;  %v656_v11 = vld [vmem:[%s1274_s28 + $0x40] sm:$0xff] (%p1132_p9) }
  0xd9   : > { %610 = vst [vmem:[%s1274_s28 + $0xc0] sm:$0xff] %v485_v55  ;;  %v658_v12 = vld [vmem:[%s1274_s28 + $0x48] sm:$0xff] (%p1132_p9) }
  0xda   : > { %611 = vst [vmem:[%s1274_s28 + $0xc8] sm:$0xff] %v499_v56 }
  0xdb   : > { %657 = vst [vmem:[%s1316_s4 + $0x40] sm:$0xff] (%p1132_p9), %v656_v11 }
  0xdc   : > { %659 = vst [vmem:[%s1316_s4 + $0x48] sm:$0xff] (%p1132_p9), %v658_v12 }
  0xdd   : > { %685 = vst [vmem:[%s1316_s4 + $0xcb0] sm:$0xff] (%p1132_p9), %v684_v25 }
  0xde   : > { %v513_v57 = vpop.f32.mrf.mxu2  ;;  %v660_v13 = vld [vmem:[%s1274_s28 + $0x50] sm:$0xff] (%p1132_p9)  ;;  %687 = vst [vmem:[%s1316_s4 + $0xcb8] sm:$0xff] (%p1132_p9), %v686_v27 }
  0xdf   : > { %612 = vst [vmem:[%s1274_s28 + $0xd0] sm:$0xff] %v513_v57  ;;  %v527_v58 = vpop.f32.mrf.mxu3  ;;  %v539_v59 = vpop.f32.mrf.mxu0  ;;  %v662_v14 = vld [vmem:[%s1274_s28 + $0x58] sm:$0xff] (%p1132_p9) }
  0xe0   : > { %613 = vst [vmem:[%s1274_s28 + $0xd8] sm:$0xff] %v527_v58  ;;  %v553_v60 = vpop.f32.mrf.mxu1  ;;  %v688_v28 = vld [vmem:[%s1274_s28 + $0xc0] sm:$0xff] (%p1132_p9) }
  0xe1   : > { %598 = vst [vmem:[%s1274_s28 + $0x60] sm:$0xff] %v539_v59  ;;  %v690_v29 = vld [vmem:[%s1274_s28 + $0xc8] sm:$0xff] (%p1132_p9) }
  0xe2   : > { %599 = vst [vmem:[%s1274_s28 + $0x68] sm:$0xff] %v553_v60 }
  0xe3   : > { %661 = vst [vmem:[%s1316_s4 + $0x50] sm:$0xff] (%p1132_p9), %v660_v13 }
  0xe4   : > { %663 = vst [vmem:[%s1316_s4 + $0x58] sm:$0xff] (%p1132_p9), %v662_v14 }
  0xe5   : > { %689 = vst [vmem:[%s1316_s4 + $0xcc0] sm:$0xff] (%p1132_p9), %v688_v28 }
  0xe6   : > { %v567_v61 = vpop.f32.mrf.mxu2  ;;  %v692_v30 = vld [vmem:[%s1274_s28 + $0xd0] sm:$0xff] (%p1132_p9)  ;;  %691 = vst [vmem:[%s1316_s4 + $0xcc8] sm:$0xff] (%p1132_p9), %v690_v29 }
  0xe7   : > { %600 = vst [vmem:[%s1274_s28 + $0x70] sm:$0xff] %v567_v61  ;;  %v581_v62 = vpop.f32.mrf.mxu3  ;;  %v541_v63 = vpop.f32.mrf.mxu0  ;;  %v694_v31 = vld [vmem:[%s1274_s28 + $0xd8] sm:$0xff] (%p1132_p9) }
  0xe8   : > { %601 = vst [vmem:[%s1274_s28 + $0x78] sm:$0xff] %v581_v62  ;;  %v555_v0 = vpop.f32.mrf.mxu1  ;;  %v664_v15 = vld [vmem:[%s1274_s28 + $0x60] sm:$0xff] (%p1132_p9) }
  0xe9   : > { %614 = vst [vmem:[%s1274_s28 + $0xe0] sm:$0xff] %v541_v63  ;;  %v666_v16 = vld [vmem:[%s1274_s28 + $0x68] sm:$0xff] (%p1132_p9) }
  0xea   : > { %615 = vst [vmem:[%s1274_s28 + $0xe8] sm:$0xff] %v555_v0 }
  0xeb   : > { %665 = vst [vmem:[%s1316_s4 + $0x60] sm:$0xff] (%p1132_p9), %v664_v15 }
  0xec   : > { %624 = sbr.rel (!%p1132_p9) target bundleno = 249 (0xf9), region = 36  ;;  %667 = vst [vmem:[%s1316_s4 + $0x68] sm:$0xff] (%p1132_p9), %v666_v16 }
  0xed   : > { %693 = vst [vmem:[%s1316_s4 + $0xcd0] sm:$0xff] (%p1132_p9), %v692_v30 }
  0xee   : > { %v569_v1 = vpop.f32.mrf.mxu2  ;;  %v668_v17 = vld [vmem:[%s1274_s28 + $0x70] sm:$0xff] (%p1132_p9)  ;;  %695 = vst [vmem:[%s1316_s4 + $0xcd8] sm:$0xff] (%p1132_p9), %v694_v31 }
  0xef   : > { %616 = vst [vmem:[%s1274_s28 + $0xf0] sm:$0xff] %v569_v1  ;;  %v583_v2 = vpop.f32.mrf.mxu3  ;;  %v670_v18 = vld [vmem:[%s1274_s28 + $0x78] sm:$0xff] (%p1132_p9) }
  0xf0   : > { %617 = vst [vmem:[%s1274_s28 + $0xf8] sm:$0xff] %v583_v2  ;;  %v696_v32 = vld [vmem:[%s1274_s28 + $0xe0] sm:$0xff] (%p1132_p9) }
  0xf1   : > { %669 = vst [vmem:[%s1316_s4 + $0x70] sm:$0xff] %v668_v17  ;;  %v698_v33 = vld [vmem:[%s1274_s28 + $0xe8] sm:$0xff] }
  0xf2   : > { %671 = vst [vmem:[%s1316_s4 + $0x78] sm:$0xff] %v670_v18 }
  0xf3   : > { %697 = vst [vmem:[%s1316_s4 + $0xce0] sm:$0xff] %v696_v32 }
  0xf4   : > { %699 = vst [vmem:[%s1316_s4 + $0xce8] sm:$0xff] %v698_v33 }
  0xf6   : > { %v700_v34 = vld [vmem:[%s1274_s28 + $0xf0] sm:$0xff] }
  0xf7   : > { %v702_v35 = vld [vmem:[%s1274_s28 + $0xf8] sm:$0xff]  ;;  %701 = vst [vmem:[%s1316_s4 + $0xcf0] sm:$0xff] %v700_v34 }
  0xf8   : > { %703 = vst [vmem:[%s1316_s4 + $0xcf8] sm:$0xff] %v702_v35 }
  0xf9 PF: > { %p12_p7 = scmp.ge.s32.totalorder %s1109_s14, 27   ;;  %s1400_s9 = smov %s1059_s10 }
  0xfa   : > { %s1401_s10 = smov %s1063_s11  ;;  %s1402_s11 = smov %s1119_s17 }
  0xfb   : > { %s1403_s12 = smov %s1109_s14  ;;  %14 = sbr.rel (!%p12_p7) target bundleno = 3 (0x3), region = 91 }
 0x100   :  { %719 = vsyncpa [#allocation3], 1 }
 0x101   :  { %721 = vsyncpa [#allocation3 + $0x1], 1 }

// kernel: transformer_forward.3
= control target key start
LH: loop header
LB: loop body
LE: loop exit
PB: predicated region body
PF: predicated region fallthrough
CT: control target
= control target key end

     0   :  { %s4632_s0 = inlined_call_operand.vmem [shape: f32[2,8,32], index: 0, kind: input, shape index: {}]   ;;  %s4633_s1 = inlined_call_operand.vmem [shape: f32[2,16,32], index: 1, kind: input, shape index: {}]   ;;  %s4634_s2 = inlined_call_operand.hbm [shape: f32[32,32], index: 2, kind: input, shape index: {}]   ;;  %s4635_s3 = inlined_call_operand.hbm [shape: f32[1,32], index: 3, kind: input, shape index: {}]   ;;  %s4636_s4 = inlined_call_operand.hbm [shape: f32[32,32], index: 4, kind: input, shape index: {}]   ;;  %s4637_s5 = inlined_call_operand.hbm [shape: f32[1,32], index: 5, kind: input, shape index: {}]   ;;  %s4638_s6 = inlined_call_operand.hbm [shape: f32[32,32], index: 6, kind: input, shape index: {}]   ;;  %s4639_s7 = inlined_call_operand.hbm [shape: f32[1,32], index: 7, kind: input, shape index: {}]   ;;  %s4640_s8 = inlined_call_operand.hbm [shape: f32[32,32], index: 8, kind: input, shape index: {}]   ;;  %s4641_s9 = inlined_call_operand.hbm [shape: f32[1,32], index: 9, kind: input, shape index: {}]   ;;  %s4642_s10 = inlined_call_operand.hbm [shape: f32[1,32], index: 10, kind: input, shape index: {}]   ;;  %s4643_s11 = inlined_call_operand.hbm [shape: f32[1,32], index: 11, kind: input, shape index: {}]   ;;  %s4644_s12 = inlined_call_operand.hbm [shape: f32[32,2048], index: 12, kind: input, shape index: {}]   ;;  %s4645_s13 = inlined_call_operand.hbm [shape: f32[1,2048], index: 13, kind: input, shape index: {}]   ;;  %s4646_s14 = inlined_call_operand.vmem [shape: f32[2048,32], index: 14, kind: input, shape index: {}]   ;;  %s4647_s15 = inlined_call_operand.hbm [shape: f32[1,32], index: 15, kind: input, shape index: {}]   ;;  %s4648_s16 = inlined_call_operand.hbm [shape: f32[1,32], index: 16, kind: input, shape index: {}]   ;;  %s4649_s17 = inlined_call_operand.hbm [shape: f32[1,32], index: 17, kind: input, shape index: {}]   ;;  %s4650_s18 = inlined_call_operand.vmem [shape: f32[2,8,32], index: 18, kind: output, shape index: {}]  }
   0x1   :  { %4651 = sst [smem:[#allocation33_spill]] %s4632_s0 }
   0x2   :  { %4652 = sst [smem:[#allocation34_spill]] %s4633_s1 }
   0x3   :  { %4653 = sst [smem:[#allocation35_spill]] %s4634_s2 }
   0x4   :  { %4654 = sst [smem:[#allocation36_spill]] %s4635_s3 }
   0x5   :  { %4655 = sst [smem:[#allocation37_spill]] %s4636_s4 }
   0x6   :  { %4656 = sst [smem:[#allocation38_spill]] %s4637_s5 }
   0x7   :  { %4657 = sst [smem:[#allocation39_spill]] %s4639_s7 }
   0x8   :  { %23 = vsyncpa [#allocation3], 0 }
   0x9   :  { %24 = vsyncpa [#allocation5], 0 }
   0xa   :  { %25 = vsyncpa [#allocation8], 0 }
   0xb   :  { %26 = vsyncpa [#allocation11], 0 }
   0xc   :  { %27 = vsyncpa [#allocation14], 0 }
   0xd   :  { %28 = vsyncpa [#allocation17], 0 }
   0xe   :  { %29 = vsyncpa [#allocation20], 0 }
   0xf   :  { %30 = vsyncpa [#allocation23], 0  ;;  %s3569_s27 = smov 0  }
  0x10 LB: > { %s4658_s3 = sld [smem:[#allocation36_spill]]  ;;  %s3578_s0 = sadd.s32 4294967295, %s3450_s27   ;;  %s3450_s27 = sphi %s3569_s27, %s36_s27  }
  0x11   : > { %p2669_p0 = scmp.ge.s32.totalorder %s3450_s27, 1  ;;  %p455_p1 = scmp.lt.s32.totalorder %s3450_s27, 3 }
  0x12   : > { %p2856_p2 = scmp.eq.s32.totalorder %s3578_s0, 0  ;;  %s3452_s1 = smov [#allocation4]  }
  0x13   : > { %p3583_p3 = pnand %p2669_p0, %p455_p1  ;;  %s483_s20 = sshll.u32 %s3452_s1, 4  ;;  %s484_s20 = int_to_ptr.vmem [resolvable:$true] %s483_s20 }
  0x14   : > { %s4660_s5 = sld [smem:[#allocation38_spill]]  ;;  %s3453_s28 = smov [#allocation7]  }
  0x15   : > { %p2810_p4 = pneg %p3583_p3  ;;  %s4661_s7 = sld [smem:[#allocation39_spill]] }
  0x16   : > { %s481_s30 = sshll.u32 %s4658_s3, 4  ;;  %s509_s29 = sshll.u32 %s3453_s28, 4  ;;  %s482_s30 = int_to_ptr.hbm [resolvable:$true] %s481_s30  ;;  %s510_s29 = int_to_ptr.vmem [resolvable:$true] %s509_s29 }
  0x17   : > { %p3597_p5 = pnand %p2856_p2, %p2810_p4  ;;  %s3454_s1 = smov [#allocation10]  }
  0x18   : > { %s535_s21 = sshll.u32 %s3454_s1, 4  ;;  %s559_s24 = sshll.u32 %s4641_s9, 4  ;;  %s536_s21 = int_to_ptr.vmem [resolvable:$true] %s535_s21  ;;  %s560_s24 = int_to_ptr.hbm [resolvable:$true] %s559_s24 }
  0x19   : > { %2816 = dma.hbm_to_vmem [thread:$0]  (!%p3597_p5), %s482_s30, 16, %s484_s20, [#allocation5]  }
  0x1a   : > { %s507_s2 = sshll.u32 %s4660_s5, 4  ;;  %s583_s5 = sshll.u32 %s4643_s11, 4  ;;  %s508_s2 = int_to_ptr.hbm [resolvable:$true] %s507_s2  ;;  %s584_s5 = int_to_ptr.hbm [resolvable:$true] %s583_s5 }
  0x1b   : > { %s533_s25 = sshll.u32 %s4661_s7, 4  ;;  %s3455_s7 = smov [#allocation13]   ;;  %s534_s25 = int_to_ptr.hbm [resolvable:$true] %s533_s25 }
  0x1c   : > { %2822 = dma.hbm_to_vmem [thread:$0]  (!%p3597_p5), %s508_s2, 16, %s510_s29, [#allocation8]  }
  0x1d   : > { %2828 = dma.hbm_to_vmem [thread:$0]  (!%p3597_p5), %s534_s25, 16, %s536_s21, [#allocation11]  }
  0x1e   : > { %s561_s30 = sshll.u32 %s3455_s7, 4  ;;  %s3456_s20 = smov [#allocation16]   ;;  %s562_s30 = int_to_ptr.vmem [resolvable:$true] %s561_s30 }
  0x1f   : > { %2834 = dma.hbm_to_vmem [thread:$0]  (!%p3597_p5), %s560_s24, 16, %s562_s30, [#allocation14]  }
  0x20   : > { %s585_s2 = sshll.u32 %s3456_s20, 4  ;;  %s609_s22 = sshll.u32 %s4645_s13, 4  ;;  %s586_s2 = int_to_ptr.vmem [resolvable:$true] %s585_s2  ;;  %s610_s22 = int_to_ptr.hbm [resolvable:$true] %s609_s22 }
  0x21   : > { %2840 = dma.hbm_to_vmem [thread:$0]  (!%p3597_p5), %s584_s5, 16, %s586_s2, [#allocation17]  }
  0x22   : > { %s636_s21 = sshll.u32 %s4648_s16, 4  ;;  %s3457_s7 = smov [#allocation19]   ;;  %s637_s21 = int_to_ptr.hbm [resolvable:$true] %s636_s21 }
  0x23   : > { %s611_s23 = sshll.u32 %s3457_s7, 4  ;;  %s3458_s24 = smov [#allocation22]   ;;  %s612_s23 = int_to_ptr.vmem [resolvable:$true] %s611_s23 }
  0x24   : > { %2846 = dma.hbm_to_vmem [thread:$0]  (!%p3597_p5), %s610_s22, 256, %s612_s23, [#allocation20]  }
  0x25   : > { %s638_s28 = sshll.u32 %s3458_s24, 4  ;;  %s4663_s29 = sld [smem:[#allocation35_spill]]  ;;  %s639_s28 = int_to_ptr.vmem [resolvable:$true] %s638_s28 }
  0x26   : > { %2852 = dma.hbm_to_vmem [thread:$0]  (!%p3597_p5), %s637_s21, 16, %s639_s28, [#allocation23]  }
  0x27   : > { %s3459_s5 = smov [#allocation2]   ;;  %s4664_s4 = sld [smem:[#allocation37_spill]] }
  0x28   : > { %s468_s2 = sshll.u32 %s3459_s5, 4  ;;  %s3460_s22 = smov 128   ;;  %s469_s2 = int_to_ptr.vmem [resolvable:$true] %s468_s2 }
  0x29   : > { %s3461_s23 = smov 8   ;;  %s3462_s24 = smov [#allocation6]  }
  0x2a   : > { %s494_s30 = sshll.u32 %s3462_s24, 4  ;;  %s518_s21 = sshll.u32 %s4638_s6, 4  ;;  %s495_s30 = int_to_ptr.vmem [resolvable:$true] %s494_s30  ;;  %s519_s21 = int_to_ptr.hbm [resolvable:$true] %s518_s21 }
  0x2b   : > { %s466_s1 = sshll.u32 %s4663_s29, 4  ;;  %s544_s3 = sshll.u32 %s4640_s8, 4  ;;  %s467_s1 = int_to_ptr.hbm [resolvable:$true] %s466_s1  ;;  %s545_s3 = int_to_ptr.hbm [resolvable:$true] %s544_s3 }
  0x2c   : > { %2813 = dma.hbm_to_vmem [thread:$0]  (!%p3597_p5), %s467_s1, 512, %s469_s2, [#allocation3], %s3460_s22, %s3460_s22, %s3461_s23  }
  0x2d   : > { %s492_s7 = sshll.u32 %s4664_s4, 4  ;;  %s3463_s25 = smov [#allocation9]   ;;  %s493_s7 = int_to_ptr.hbm [resolvable:$true] %s492_s7 }
  0x2e   : > { %2819 = dma.hbm_to_vmem [thread:$0]  (!%p3597_p5), %s493_s7, 512, %s495_s30, [#allocation5], %s3460_s22, %s3460_s22, %s3461_s23  }
  0x2f   : > { %s520_s1 = sshll.u32 %s3463_s25, 4  ;;  %s3464_s2 = smov [#allocation12]   ;;  %s521_s1 = int_to_ptr.vmem [resolvable:$true] %s520_s1 }
  0x30   : > { %2825 = dma.hbm_to_vmem [thread:$0]  (!%p3597_p5), %s519_s21, 512, %s521_s1, [#allocation8], %s3460_s22, %s3460_s22, %s3461_s23  }
  0x31   : > { %s546_s24 = sshll.u32 %s3464_s2, 4  ;;  %s571_s7 = sshll.u32 %s4642_s10, 4  ;;  %s547_s24 = int_to_ptr.vmem [resolvable:$true] %s546_s24  ;;  %s572_s7 = int_to_ptr.hbm [resolvable:$true] %s571_s7 }
  0x32   : > { %2831 = dma.hbm_to_vmem [thread:$0]  (!%p3597_p5), %s545_s3, 512, %s547_s24, [#allocation11], %s3460_s22, %s3460_s22, %s3461_s23  }
  0x33   : > { %s594_s5 = sshll.u32 %s4644_s12, 4  ;;  %s3465_s25 = smov [#allocation15]   ;;  %s595_s5 = int_to_ptr.hbm [resolvable:$true] %s594_s5 }
  0x34   : > { %s573_s21 = sshll.u32 %s3465_s25, 4  ;;  %s3466_s1 = smov [#allocation18]   ;;  %s574_s21 = int_to_ptr.vmem [resolvable:$true] %s573_s21 }
  0x35   : > { %2837 = dma.hbm_to_vmem [thread:$0]  (!%p3597_p5), %s572_s7, 16, %s574_s21, [#allocation14]  }
  0x36   : > { %s596_s2 = sshll.u32 %s3466_s1, 4  ;;  %s624_s4 = sshll.u32 %s4647_s15, 4  ;;  %s597_s2 = int_to_ptr.vmem [resolvable:$true] %s596_s2  ;;  %s625_s4 = int_to_ptr.hbm [resolvable:$true] %s624_s4 }
  0x37   : > { %s3467_s23 = smov 2048   ;;  %s3468_s3 = smov [#allocation21]  }
  0x38   : > { %2843 = dma.hbm_to_vmem [thread:$0]  (!%p3597_p5), %s595_s5, 8192, %s597_s2, [#allocation17], %s3467_s23, %s3467_s23, %s3460_s22  }
  0x39   : > { %s626_s24 = sshll.u32 %s3468_s3, 4  ;;  %s648_s25 = sshll.u32 %s4649_s17, 4  ;;  %s627_s24 = int_to_ptr.vmem [resolvable:$true] %s626_s24  ;;  %s649_s25 = int_to_ptr.hbm [resolvable:$true] %s648_s25 }
  0x3a   : > { %2849 = dma.hbm_to_vmem [thread:$0]  (!%p3597_p5), %s625_s4, 16, %s627_s24, [#allocation20]  }
  0x3b   : > { %s3469_s7 = smov [#allocation24]   ;;  %678 = sbr.rel (%p3583_p3) target bundleno = 2317 (0x90d), region = 92 }
  0x3c   : > { %s650_s21 = sshll.u32 %s3469_s7, 4  ;;  %s651_s21 = int_to_ptr.vmem [resolvable:$true] %s650_s21 }
  0x3d   : > { %2855 = dma.hbm_to_vmem [thread:$0]  (!%p3597_p5), %s649_s25, 16, %s651_s21, [#allocation23]  }
  0x40   : > { %3417 = dma.done.wait (%p2856_p2), [#allocation3], 512  }
  0x41   : > { %3419 = vsyncadd (%p2856_p2), [#allocation3], 4294966784 }
  0x42   : > { %3421 = dma.done.wait (%p2856_p2), [#allocation5], 528  }
  0x43   : > { %3423 = vsyncadd (%p2856_p2), [#allocation5], 4294966768 }
  0x44   : > { %3425 = dma.done.wait (%p2856_p2), [#allocation8], 528  }
  0x45   : > { %3427 = vsyncadd (%p2856_p2), [#allocation8], 4294966768 }
  0x46   : > { %3429 = dma.done.wait (%p2856_p2), [#allocation11], 528  }
  0x47   : > { %3431 = vsyncadd (%p2856_p2), [#allocation11], 4294966768 }
  0x48   : > { %3433 = dma.done.wait (%p2856_p2), [#allocation14], 32  }
  0x49   : > { %3435 = vsyncadd (%p2856_p2), [#allocation14], 4294967264 }
  0x4a   : > { %3437 = dma.done.wait (%p2856_p2), [#allocation17], 8208  }
  0x4b   : > { %3439 = vsyncadd (%p2856_p2), [#allocation17], 4294959088 }
  0x4c   : > { %3441 = dma.done.wait (%p2856_p2), [#allocation20], 272  }
  0x4d   : > { %3443 = vsyncadd (%p2856_p2), [#allocation20], 4294967024 }
  0x4e   : > { %3445 = dma.done.wait (%p2856_p2), [#allocation23], 32  }
  0x4f   : > { %3447 = vsyncadd (%p2856_p2), [#allocation23], 4294967264  ;;  %p806_p6 = scmp.lt.s32.totalorder %s3578_s0, 1  ;;  %v857_v0 = vld [vmem:[#allocation6 + $0x18] sm:$0xff]  ;;  %v856_v1 = vld [vmem:[#allocation6 + $0x10] sm:$0xff]  ;;  %s4665_s5 = sld [smem:[#allocation34_spill]] }
  0x50   : > { %880 = vmatpush.msra.mxu1 %v857_v0  ;;  %v825_v2 = vld [vmem:[#allocation2 + $0x18] sm:$0xff]  ;;  %s4666_s29 = sld [smem:[#allocation33_spill]]  ;;  %v855_v3 = vld [vmem:[#allocation6 + $0x8] sm:$0xff]  ;;  %v854_v4 = vld [vmem:[#allocation6] sm:$0xff]  ;;  %vm830_vm0 = vcmask 261120   ;;  %vm922_vm1 = vcmask 64512  }
  0x51   : > { %s4668_s0 = smov (!%p806_p6, %s3578_s0), 1  ;;  %846 = vmatpush.msra.mxu0 %v825_v2  ;;  %v824_v5 = vld [vmem:[#allocation2 + $0x10] sm:$0xff]  ;;  %v823_v7 = vld [vmem:[#allocation2 + $0x8] sm:$0xff]  ;;  %v822_v8 = vld [vmem:[#allocation2] sm:$0xff]  ;;  %s3470_s3 = smov 104   ;;  %vm953_vm2 = vcmask 130048  }
  0x52   : > { %s2749_s4 = sshll.u32 %s4668_s0, 4  ;;  %s2702_s19 = sshll.u32 %s4668_s0, 3  ;;  %881 = vmatpush.msra.mxu1 %v856_v1  ;;  %v894_v12 = vld [vmem:[#allocation9 + $0x18] sm:$0xff]  ;;  %v893_v13 = vld [vmem:[#allocation9 + $0x10] sm:$0xff]  ;;  %v892_v14 = vld [vmem:[#allocation9 + $0x8] sm:$0xff] }
  0x53   : > { %847 = vmatpush.msra.mxu0 %v824_v5  ;;  %911 = vmatpush.msra.mxu2 %v894_v12  ;;  %v2931_v15 = vld [vmem:[#allocation7] ss:$0 sm:$0xff]  ;;  %v891_v18 = vld [vmem:[#allocation9] sm:$0xff]  ;;  %s3471_s24 = smov 120   ;;  %v2932_v20 = vld [vmem:[#allocation4] ss:$0 sm:$0xff]  ;;  %s818_s7 = scalar_lea.vmem %s4650_s18, %s2702_s19 }
  0x54   : > { %882 = vmatpush.msra.mxu1 %v855_v3  ;;  %v1001_v19 = vld [vmem:[#allocation12] sm:$0xff]  ;;  %s3472_s30 = smov 112   ;;  %v2933_v41 = vld [vmem:[#allocation10] ss:$0 sm:$0xff] }
  0x55   : > { %s814_s1 = scalar_lea.vmem %s4665_s5, %s2749_s4  ;;  %848 = vmatpush.msra.mxu0 %v823_v7  ;;  %912 = vmatpush.msra.mxu2 %v893_v13 }
  0x56   : > { %s809_s23 = scalar_lea.vmem %s4666_s29, %s2702_s19  ;;  %v820_v6 = vld [vmem:[%s814_s1] sm:$0xff]  ;;  %883 = vmatpush.msra.mxu1 %v854_v4  ;;  %v821_v10 = vld [vmem:[%s814_s1 + $0x8] sm:$0xff] }
  0x57   : > { %v3724_v9 = vld [vmem:[%s809_s23] sm:$0xff]  ;;  %2707 = vmatmul.msk.f32.vlgmr.msra.gmra.mxu1 %vm830_vm0, %v820_v6  ;;  %849 = vmatpush.msra.mxu0 %v822_v8 }
  0x58   : > { %2706 = vmatmul.msk.f32.vlgmr.msra.gmra.mxu0 %vm830_vm0, %v3724_v9  ;;  %913 = vmatpush.msra.mxu2 %v892_v14 }
  0x5a   : > { %914 = vmatpush.msra.mxu2 %v891_v18 }
  0x5b   : > { %2709 = vmatmul.msk.f32.vlgmr.msra.gmra.mxu2 %vm830_vm0, %v820_v6 }
  0x5c   : > { %1132 = vmatpush.msrb.mxu2 %v1001_v19 }
  0x5f   : > { %2708 = vmatmul.msk.f32.gmra.mxu1 %vm830_vm0, %v821_v10 }
  0x63   : > { %2710 = vmatmul.msk.f32.gmra.mxu2 %vm830_vm0, %v821_v10 }
  0xd4   : > { %v885_v11 = vpop.f32.mrf.mxu1 }
  0xd5   : > { %v851_v21 = vpop.f32.mrf.mxu0  ;;  %v886_v22 = vadd.f32 %v2931_v15, %v885_v11 }
  0xd6   : > { %v852_v23 = vadd.f32 %v2932_v20, %v851_v21 }
  0xdc   : > { %v888_v16 = vpop.f32.mrf.mxu1 }
  0xdd   : > { %v889_v17 = vadd.f32 %v2931_v15, %v888_v16 }
  0xde   : > { %v916_v40 = vpop.f32.mrf.mxu2 }
  0xdf   : > { %1252 = vrot.lane.b32.xlu2 %v889_v17, %s3470_s3  ;;  %1006 = vrot.lane.b32.xlu1 %v889_v17, %s3471_s24  ;;  %v917_v43 = vadd.f32 %v2933_v41, %v916_v40 }
  0xe0   : > { %2711 = vmatpush.xpose.msk.msra.mxu3 %vm922_vm1, %v889_v17 }
  0xe4   : > { %2712 = vmatpush.xpose.msk.msra.mxu3 %vm922_vm1, %v886_v22 }
  0xe6   : > { %v919_v42 = vpop.f32.mrf.mxu2 }
  0xe7   : > { %2713 = vmatmul.msk.f32.vlgmr.msra.gmra.mxu3 %vm922_vm1, %v852_v23  ;;  %1004 = vrot.lane.b32.xlu1 %v886_v22, %s3471_s24  ;;  %v920_v44 = vadd.f32 %v2933_v41, %v919_v42 }
  0xe8   : > { %1002 = vrot.lane.b32.xlu2 %v852_v23, %s3471_s24 }
  0xe9   : > { %995 = vmatpush.msrb.mxu0 %v920_v44  ;;  %v3752_v45 = vpack.i.bf16 %v917_v43, %v920_v44 }
  0xeb   : > { %996 = vmatpush.msrb.mxu0 %v917_v43 }
  0xef   : > { %1250 = vrot.lane.b32.xlu1 %v886_v22, %s3470_s3 }
  0xf0   : > { %1248 = vrot.lane.b32.xlu2 %v852_v23, %s3470_s3 }
  0xf7   : > { %1139 = vrot.lane.b32.xlu1 %v886_v22, %s3472_s30 }
  0xf8   : > { %1137 = vrot.lane.b32.xlu2 %v852_v23, %s3472_s30 }
 0x139   : > { %v1253_v24 = vpop.permute.xlu2 %1252 }
 0x13a   : > { %2726 = vmatpush.xpose.msk.msra.mxu2 %vm922_vm1, %v1253_v24 }
 0x142   : > { %v1003_v27 = vpop.permute.xlu2 %1002 }
 0x14a   : > { %v1249_v55 = vpop.permute.xlu2 %1248 }
 0x151   : > { %v1007_v25 = vpop.permute.xlu1 %1006 }
 0x152   : > { %2715 = vmatpush.xpose.msk.msrb.mxu3 %vm922_vm1, %v1007_v25  ;;  %v1138_v61 = vpop.permute.xlu2 %1137 }
 0x159   : > { %v1005_v26 = vpop.permute.xlu1 %1004 }
 0x15a   : > { %2716 = vmatpush.xpose.msk.msrb.mxu3 %vm922_vm1, %v1005_v26 }
 0x15d   : > { %2717 = vmatmul.msk.f32.vlgmr.msrb.gmra.mxu3 %vm922_vm1, %v1003_v27 }
 0x161   : > { %v1251_v28 = vpop.permute.xlu1 %1250 }
 0x162   : > { %2727 = vmatpush.xpose.msk.msra.mxu2 %vm922_vm1, %v1251_v28 }
 0x169   : > { %v1140_v60 = vpop.permute.xlu1 %1139 }
 0x16a   : > { %v949_v29 = vpop.f32.mrf.mxu3 }
 0x16b   : > { %v952_v30 = vmul.f32 0.35355338, %v949_v29 }
 0x16d   : > { %v954_v31 = vsel %vm953_vm2, %v952_v30, -inf }
 0x16e   : > { %955 = vmax.xlane.f32.xlu0 %v954_v31 }
 0x1e0   : > { %v1031_v32 = vpop.f32.mrf.mxu3 }
 0x1e1   : > { %v1034_v33 = vmul.f32 0.35355338, %v1031_v32  ;;  %v956_v34 = vpop.xlane.xlu0 %955 }
 0x1e2   : > { %v957_v35 = vsub.f32 %v952_v30, %v956_v34 }
 0x1e3   : > { %v1035_v36 = vsel %vm953_vm2, %v1034_v33, -inf }
 0x1e4   : > { %v958_v37 = vmul.f32 1.442695, %v957_v35  ;;  %1036 = vmax.xlane.f32.xlu1 %v1035_v36 }
 0x1e6   : > { %2940 = vpow2.f32 %v958_v37 }
 0x1ec   : > { %v2941_v38 = vpop.eup %2940 }
 0x1ed   : > { %v960_v39 = vsel %vm953_vm2, %v2941_v38, 0.0 }
 0x1ee   : > { %961 = vadd.xlane.f32.xlu0 %v960_v39 }
 0x202   : > { %1141 = vrot.lane.b32.xlu0 %v889_v17, %s3472_s30 }
 0x257   : > { %v1037_v2 = vpop.xlane.xlu1 %1036 }
 0x258   : > { %v1038_v6 = vsub.f32 %v1034_v33, %v1037_v2 }
 0x25a   : > { %v1039_v8 = vmul.f32 1.442695, %v1038_v6 }
 0x261   : > { %v962_v46 = vpop.xlane.xlu0 %961 }
 0x262   : > { %2942 = vrcp.f32 %v962_v46  ;;  %v974_v50 = vand.u32 2147483648, %v962_v46  ;;  %v972_v52 = vand.u32 2147483647, %v962_v46  ;;  %vm968_vm4 = vweird.f32 %v962_v46 }
 0x264   : > { %v975_v54 = vor.u32 1.1754944e-38, %v974_v50  ;;  %vm973_vm6 = vcmp.eq.f32.partialorder %v972_v52, 8.507059e+37 }
 0x268   : > { %v2943_v47 = vpop.eup %2942 }
 0x269   : > { %v964_v48 = vmul.f32 %v2943_v47, %v962_v46  ;;  %vm969_vm3 = vweird.f32 %v2943_v47 }
 0x26a   : > { %vm970_vm5 = vmor %vm968_vm4, %vm969_vm3 }
 0x26b   : > { %v965_v49 = vsub.f32 1.0, %v964_v48 }
 0x26d   : > { %v966_v51 = vmul.f32 %v2943_v47, %v965_v49 }
 0x26f   : > { %v967_v53 = vadd.f32 %v2943_v47, %v966_v51 }
 0x271   : > { %v971_v56 = vsel %vm970_vm5, %v2943_v47, %v967_v53  ;;  %v1090_v53 = vld [vmem:[#allocation12 + $0x8] sm:$0xff] }
 0x272   : > { %v976_v57 = vsel %vm973_vm6, %v975_v54, %v971_v56  ;;  %1109 = vmatpush.msrb.mxu1 %v1090_v53  ;;  %v1441_v53 = vld [vmem:[#allocation18 + $0x128] sm:$0xff] }
 0x273   : > { %v977_v58 = vmul.f32 %v2941_v38, %v976_v57 }
 0x274   : > { %v1142_v59 = vpop.permute.xlu0 %1141 }
 0x275   : > { %2714 = vmatmul.msk.f32.vlgmr.msrb.gmra.mxu0 %vm953_vm2, %v977_v58  ;;  %2721 = vmatpush.xpose.msk.msra.mxu3 %vm922_vm1, %v1142_v59 }
 0x279   : > { %2722 = vmatpush.xpose.msk.msra.mxu3 %vm922_vm1, %v1140_v60 }
 0x27c   : > { %2723 = vmatmul.msk.f32.vlgmr.msra.gmra.mxu3 %vm922_vm1, %v1138_v61 }
 0x2f2   : > { %v998_v62 = vpop.f32.mrf.mxu0 }
 0x2f3   : > { %2720 = vmatmul.msk.f32.vlgmr.msrb.gmra.mxu2 %vm922_vm1, %v998_v62 }
 0x2fb   : > { %2728 = vmatmul.msk.f32.vlgmr.msra.gmra.mxu2 %vm922_vm1, %v1249_v55  ;;  %v1223_v55 = vld [vmem:[#allocation12 + $0x10] sm:$0xff] }
 0x2fc   : > { %1242 = vmatpush.msra.mxu1 %v1223_v55  ;;  %v1442_v55 = vld [vmem:[#allocation18 + $0x130] sm:$0xff] }
 0x2ff   : > { %v1166_v63 = vpop.f32.mrf.mxu3 }
 0x300   : > { %v1169_v0 = vmul.f32 0.35355338, %v1166_v63 }
 0x302   : > { %v1170_v1 = vsel %vm953_vm2, %v1169_v0, -inf }
 0x303   : > { %1171 = vmax.xlane.f32.xlu0 %v1170_v1 }
 0x376   : > { %v3761_v3 = vpop.f32.mrf.mxu2  ;;  %v1172_v4 = vpop.xlane.xlu0 %1171 }
 0x377   : > { %v1173_v5 = vsub.f32 %v1169_v0, %v1172_v4 }
 0x379   : > { %v1174_v7 = vmul.f32 1.442695, %v1173_v5 }
 0x37b   : > { %2944 = vpow2.f32 %v1174_v7 }
 0x37c   : > { %2946 = vpow2.f32 %v1039_v8  ;;  %v1334_v8 = vld [vmem:[#allocation12 + $0x18] sm:$0xff] }
 0x37e   : > { %v1277_v10 = vpop.f32.mrf.mxu2 }
 0x37f   : > { %v1280_v11 = vmul.f32 0.35355338, %v1277_v10 }
 0x381   : > { %v2945_v12 = vpop.eup %2944  ;;  %v1281_v13 = vsel %vm953_vm2, %v1280_v11, -inf }
 0x382   : > { %1282 = vmax.xlane.f32.xlu2 %v1281_v13  ;;  %v1176_v14 = vsel %vm953_vm2, %v2945_v12, 0.0  ;;  %v2947_v15 = vpop.eup %2946 }
 0x383   : > { %1177 = vadd.xlane.f32.xlu0 %v1176_v14  ;;  %v1041_v16 = vsel %vm953_vm2, %v2947_v15, 0.0 }
 0x38a   : > { %1042 = vadd.xlane.f32.xlu2 %v1041_v16 }
 0x397   : > { %2927 = vrot.lane.b32.xlu0 %v3752_v45, %s3472_s30 }
 0x3a2   : > { %2917 = vrot.lane.b32.xlu2 %v3752_v45, %s3471_s24 }
 0x3f5   : > { %v1283_v17 = vpop.xlane.xlu2 %1282 }
 0x3f6   : > { %v1284_v18 = vsub.f32 %v1280_v11, %v1283_v17  ;;  %v1178_v19 = vpop.xlane.xlu0 %1177 }
 0x3f7   : > { %2948 = vrcp.f32 %v1178_v19  ;;  %v1190_v44 = vand.u32 2147483648, %v1178_v19  ;;  %vm1184_vm12 = vweird.f32 %v1178_v19  ;;  %v1188_v47 = vand.u32 2147483647, %v1178_v19 }
 0x3f8   : > { %v1285_v20 = vmul.f32 1.442695, %v1284_v18 }
 0x3f9   : > { %v1191_v50 = vor.u32 1.1754944e-38, %v1190_v44  ;;  %vm1189_vm14 = vcmp.eq.f32.partialorder %v1188_v47, 8.507059e+37  ;;  %v1405_v44 = vld [vmem:[#allocation18 + $0x8] sm:$0xff]  ;;  %v1407_v47 = vld [vmem:[#allocation18 + $0x18] sm:$0xff] }
 0x3fa   : > { %2950 = vpow2.f32 %v1285_v20 }
 0x3fd   : > { %v1043_v21 = vpop.xlane.xlu2 %1042  ;;  %v2949_v22 = vpop.eup %2948 }
 0x3fe   : > { %2952 = vrcp.f32 %v1043_v21  ;;  %v1180_v24 = vmul.f32 %v2949_v22, %v1178_v19  ;;  %v1055_v32 = vand.u32 2147483648, %v1043_v21  ;;  %v1053_v36 = vand.u32 2147483647, %v1043_v21 }
 0x3ff   : > { %vm1049_vm8 = vweird.f32 %v1043_v21  ;;  %vm1185_vm10 = vweird.f32 %v2949_v22 }
 0x400   : > { %v3770_v23 = vpop.eup %2950  ;;  %v1181_v27 = vsub.f32 1.0, %v1180_v24  ;;  %v1056_v40 = vor.u32 1.1754944e-38, %v1055_v32  ;;  %vm1054_vm11 = vcmp.eq.f32.partialorder %v1053_v36, 8.507059e+37  ;;  %vm1186_vm13 = vmor %vm1184_vm12, %vm1185_vm10  ;;  %v1453_v32 = vld [vmem:[#allocation18 + $0x188] sm:$0xff] }
 0x401   : > { %v1287_v25 = vsel %vm953_vm2, %v3770_v23, 0.0  ;;  %1539 = vmatpush.msrb.mxu2 %v1453_v32  ;;  %v1437_v36 = vld [vmem:[#allocation18 + $0x108] sm:$0xff] }
 0x402   : > { %1288 = vadd.xlane.f32.xlu1 %v1287_v25  ;;  %v1182_v34 = vmul.f32 %v2949_v22, %v1181_v27  ;;  %v1465_v32 = vld [vmem:[#allocation18 + $0x1e8] sm:$0xff] }
 0x403   : > { %1540 = vmatpush.msrb.mxu2 %v1437_v36  ;;  %v1449_v36 = vld [vmem:[#allocation18 + $0x168] sm:$0xff] }
 0x404   : > { %v2953_v26 = vpop.eup %2952  ;;  %v1183_v42 = vadd.f32 %v2949_v22, %v1182_v34  ;;  %v1455_v34 = vld [vmem:[#allocation18 + $0x198] sm:$0xff] }
 0x405   : > { %v1045_v28 = vmul.f32 %v2953_v26, %v1043_v21  ;;  %v2918_v29 = vpop.permute.xlu2 %2917  ;;  %vm1050_vm7 = vweird.f32 %v2953_v26  ;;  %v3473_v21 = vmov 32.0  }
 0x406   : > { %v2919_v30 = vunpack.i.l.bf16 %v2918_v29  ;;  %v2920_v33 = vunpack.i.h.bf16 %v2918_v29  ;;  %vm1051_vm9 = vmor %vm1049_vm8, %vm1050_vm7  ;;  %v1187_v49 = vsel %vm1186_vm13, %v2949_v22, %v1183_v42  ;;  %v1423_v42 = vld [vmem:[#allocation18 + $0x98] sm:$0xff] }
 0x407   : > { %v1046_v31 = vsub.f32 1.0, %v1045_v28  ;;  %v1192_v51 = vsel %vm1189_vm14, %v1191_v50, %v1187_v49  ;;  %v1457_v49 = vld [vmem:[#allocation18 + $0x1a8] sm:$0xff]  ;;  %v1458_v50 = vld [vmem:[#allocation18 + $0x1b0] sm:$0xff] }
 0x408   : > { %1084 = vmatpush.msra.mxu0 %v2919_v30  ;;  %v1193_v52 = vmul.f32 %v2945_v12, %v1192_v51  ;;  %v1459_v51 = vld [vmem:[#allocation18 + $0x1b8] sm:$0xff] }
 0x409   : > { %v1047_v35 = vmul.f32 %v2953_v26, %v1046_v31  ;;  %v2928_v37 = vpop.permute.xlu0 %2927  ;;  %v1452_v31 = vld [vmem:[#allocation18 + $0x180] sm:$0xff] }
 0x40a   : > { %v2929_v38 = vunpack.i.l.bf16 %v2928_v37  ;;  %1085 = vmatpush.msra.mxu0 %v2920_v33  ;;  %v2930_v41 = vunpack.i.h.bf16 %v2928_v37  ;;  %v1454_v33 = vld [vmem:[#allocation18 + $0x190] sm:$0xff] }
 0x40b   : > { %v1048_v39 = vadd.f32 %v2953_v26, %v1047_v35  ;;  %v1436_v35 = vld [vmem:[#allocation18 + $0x100] sm:$0xff]  ;;  %v1438_v37 = vld [vmem:[#allocation18 + $0x110] sm:$0xff] }
 0x40c   : > { %1217 = vmatpush.msrb.mxu0 %v2929_v38  ;;  %v1439_v38 = vld [vmem:[#allocation18 + $0x118] sm:$0xff] }
 0x40d   : > { %v1052_v43 = vsel %vm1051_vm9, %v2953_v26, %v1048_v39  ;;  %v1420_v39 = vld [vmem:[#allocation18 + $0x80] sm:$0xff] }
 0x40e   : > { %v1057_v46 = vsel %vm1054_vm11, %v1056_v40, %v1052_v43  ;;  %1218 = vmatpush.msrb.mxu0 %v2930_v41  ;;  %v1421_v40 = vld [vmem:[#allocation18 + $0x88] sm:$0xff]  ;;  %v1422_v41 = vld [vmem:[#allocation18 + $0x90] sm:$0xff]  ;;  %v1404_v43 = vld [vmem:[#allocation18] sm:$0xff] }
 0x40f   : > { %v1058_v48 = vmul.f32 %v2947_v15, %v1057_v46  ;;  %v2934_v15 = vld [vmem:[#allocation13] ss:$0 sm:$0xff]  ;;  %1541 = vmatpush.msrb.mxu2 %v1421_v40  ;;  %v1406_v46 = vld [vmem:[#allocation18 + $0x10] sm:$0xff]  ;;  %v1433_v40 = vld [vmem:[#allocation18 + $0xe8] sm:$0xff] }
 0x411   : > { %2718 = vmatmul.msk.f32.vlgmr.msra.gmra.mxu0 %vm953_vm2, %v1058_v48  ;;  %1542 = vmatpush.msrb.mxu2 %v1405_v44  ;;  %v1456_v48 = vld [vmem:[#allocation18 + $0x1a0] sm:$0xff]  ;;  %v1417_v44 = vld [vmem:[#allocation18 + $0x68] sm:$0xff] }
 0x412   : > { %1353 = vmatpush.msra.mxu0 %v1334_v8 }
 0x413   : > { %1619 = vmatpush.msra.mxu2 %v1457_v49  ;;  %v1906_v49 = vld [vmem:[%s4646_s14 + $0x1f8] sm:$0xff] }
 0x415   : > { %1620 = vmatpush.msra.mxu2 %v1441_v53  ;;  %v1905_v53 = vld [vmem:[%s4646_s14 + $0x1f0] sm:$0xff] }
 0x419   : > { %2724 = vmatmul.msk.f32.vlgmr.msrb.gmra.mxu0 %vm953_vm2, %v1193_v52  ;;  %v1440_v52 = vld [vmem:[#allocation18 + $0x120] sm:$0xff] }
 0x41a   : > { %1579 = vmatpush.msrb.mxu0 %v1455_v34  ;;  %v1467_v34 = vld [vmem:[#allocation18 + $0x1f8] sm:$0xff] }
 0x41b   : > { %2922 = vrot.lane.b32.xlu1 %v3752_v45, %s3470_s3 }
 0x41c   : > { %1580 = vmatpush.msrb.mxu0 %v1439_v38  ;;  %v1451_v38 = vld [vmem:[#allocation18 + $0x178] sm:$0xff] }
 0x41e   : > { %1581 = vmatpush.msrb.mxu0 %v1423_v42  ;;  %v1435_v42 = vld [vmem:[#allocation18 + $0xf8] sm:$0xff] }
 0x420   : > { %1582 = vmatpush.msrb.mxu0 %v1407_v47  ;;  %v1419_v47 = vld [vmem:[#allocation18 + $0x78] sm:$0xff] }
 0x475   : > { %v1289_v54 = vpop.xlane.xlu1 %1288 }
 0x476   : > { %2954 = vrcp.f32 %v1289_v54  ;;  %v1301_v61 = vand.u32 2147483648, %v1289_v54  ;;  %vm1295_vm3 = vweird.f32 %v1289_v54  ;;  %v1299_v62 = vand.u32 2147483647, %v1289_v54 }
 0x477   : > { %2956 = vrcp.f32 %v3473_v21  ;;  %v1445_v21 = vld [vmem:[#allocation18 + $0x148] sm:$0xff] }
 0x478   : > { %v1302_v0 = vor.u32 1.1754944e-38, %v1301_v61  ;;  %vm1300_vm5 = vcmp.eq.f32.partialorder %v1299_v62, 8.507059e+37  ;;  %v1427_v61 = vld [vmem:[#allocation18 + $0xb8] sm:$0xff]  ;;  %v1408_v62 = vld [vmem:[#allocation18 + $0x20] sm:$0xff] }
 0x47c   : > { %v2955_v56 = vpop.eup %2954 }
 0x47d   : > { %v1291_v57 = vmul.f32 %v2955_v56, %v1289_v54  ;;  %vm1296_vm15 = vweird.f32 %v2955_v56  ;;  %v2957_v22 = vpop.eup %2956 }
 0x47e   : > { %vm1297_vm4 = vmor %vm1295_vm3, %vm1296_vm15 }
 0x47f   : > { %v1292_v58 = vsub.f32 1.0, %v1291_v57  ;;  %v1424_v57 = vld [vmem:[#allocation18 + $0xa0] sm:$0xff] }
 0x481   : > { %v1293_v59 = vmul.f32 %v2955_v56, %v1292_v58 }
 0x483   : > { %v1294_v60 = vadd.f32 %v2955_v56, %v1293_v59  ;;  %v1425_v59 = vld [vmem:[#allocation18 + $0xa8] sm:$0xff] }
 0x484   : > { %1621 = vmatpush.msra.mxu2 %v1425_v59  ;;  %v1888_v59 = vld [vmem:[%s4646_s14 + $0x168] sm:$0xff] }
 0x485   : > { %v1298_v63 = vsel %vm1297_vm4, %v2955_v56, %v1294_v60  ;;  %v1443_v56 = vld [vmem:[#allocation18 + $0x138] sm:$0xff]  ;;  %v1426_v60 = vld [vmem:[#allocation18 + $0xb0] sm:$0xff] }
 0x486   : > { %v1303_v1 = vsel %vm1300_vm5, %v1302_v0, %v1298_v63  ;;  %v1409_v63 = vld [vmem:[#allocation18 + $0x28] sm:$0xff] }
 0x487   : > { %v1304_v6 = vmul.f32 %v3770_v23, %v1303_v1  ;;  %v1371_v23 = vmul.f32 32.0, %v2957_v22  ;;  %v1411_v1 = vld [vmem:[#allocation18 + $0x38] sm:$0xff]  ;;  %1622 = vmatpush.msra.mxu2 %v1409_v63 }
 0x488   : > { %v1887_v63 = vld [vmem:[%s4646_s14 + $0x160] sm:$0xff] }
 0x489   : > { %v1372_v24 = vsub.f32 1.0, %v1371_v23  ;;  %v1447_v23 = vld [vmem:[#allocation18 + $0x158] sm:$0xff] }
 0x48b   : > { %v1373_v25 = vmul.f32 %v2957_v22, %v1372_v24  ;;  %v1428_v24 = vld [vmem:[#allocation18 + $0xc0] sm:$0xff] }
 0x48d   : > { %v2923_v45 = vpop.permute.xlu1 %2922  ;;  %v1374_v26 = vadd.f32 %v2957_v22, %v1373_v25  ;;  %v1429_v25 = vld [vmem:[#allocation18 + $0xc8] sm:$0xff] }
 0x48e   : > { %v2924_v2 = vunpack.i.l.bf16 %v2923_v45  ;;  %v1087_v4 = vpop.f32.mrf.mxu0  ;;  %v2925_v5 = vunpack.i.h.bf16 %v2923_v45  ;;  %v1410_v45 = vld [vmem:[#allocation18 + $0x30] sm:$0xff] }
 0x48f   : > { %2719 = vmatmul.msk.f32.vlgmr.msrb.gmra.mxu1 %vm922_vm1, %v1087_v4 }
 0x490   : > { %1328 = vmatpush.msrb.mxu3 %v2924_v2  ;;  %1519 = vmatpush.msrb.mxu1 %v1452_v31  ;;  %v1464_v31 = vld [vmem:[#allocation18 + $0x1e0] sm:$0xff] }
 0x492   : > { %1329 = vmatpush.msrb.mxu3 %v2925_v5  ;;  %1520 = vmatpush.msrb.mxu1 %v1436_v35  ;;  %v1448_v35 = vld [vmem:[#allocation18 + $0x160] sm:$0xff] }
 0x493   : > { %2729 = vmatmul.msk.f32.vlgmr.msrb.gmra.mxu3 %vm953_vm2, %v1304_v6 }
 0x494   : > { %1559 = vmatpush.msra.mxu3 %v1454_v33  ;;  %1521 = vmatpush.msrb.mxu1 %v1420_v39  ;;  %v1466_v33 = vld [vmem:[#allocation18 + $0x1f0] sm:$0xff]  ;;  %v1432_v39 = vld [vmem:[#allocation18 + $0xe0] sm:$0xff] }
 0x496   : > { %v1220_v7 = vpop.f32.mrf.mxu0  ;;  %1560 = vmatpush.msra.mxu3 %v1438_v37  ;;  %1522 = vmatpush.msrb.mxu1 %v1404_v43  ;;  %v1450_v37 = vld [vmem:[#allocation18 + $0x170] sm:$0xff]  ;;  %v1416_v43 = vld [vmem:[#allocation18 + $0x60] sm:$0xff] }
 0x497   : > { %2725 = vmatmul.msk.f32.vlgmr.msra.gmra.mxu1 %vm922_vm1, %v1220_v7 }
 0x498   : > { %1561 = vmatpush.msra.mxu3 %v1422_v41  ;;  %1599 = vmatpush.msra.mxu1 %v1456_v48  ;;  %v1434_v41 = vld [vmem:[#allocation18 + $0xf0] sm:$0xff] }
 0x499   : > { %v1858_v48 = vld [vmem:[%s4646_s14 + $0x78] sm:$0xff] }
 0x49a   : > { %1562 = vmatpush.msra.mxu3 %v1406_v46  ;;  %1600 = vmatpush.msra.mxu1 %v1440_v52  ;;  %v1418_v46 = vld [vmem:[#allocation18 + $0x70] sm:$0xff]  ;;  %v1857_v52 = vld [vmem:[%s4646_s14 + $0x70] sm:$0xff] }
 0x49c   : > { %1639 = vmatpush.msrb.mxu3 %v1458_v50  ;;  %1601 = vmatpush.msra.mxu1 %v1424_v57  ;;  %v1874_v50 = vld [vmem:[%s4646_s14 + $0xf8] sm:$0xff]  ;;  %v1904_v57 = vld [vmem:[%s4646_s14 + $0x1e8] sm:$0xff] }
 0x49e   : > { %1640 = vmatpush.msrb.mxu3 %v1442_v55  ;;  %1602 = vmatpush.msra.mxu1 %v1408_v62  ;;  %v1889_v55 = vld [vmem:[%s4646_s14 + $0x170] sm:$0xff]  ;;  %v1871_v62 = vld [vmem:[%s4646_s14 + $0xe0] sm:$0xff] }
 0x4a0   : > { %1641 = vmatpush.msrb.mxu3 %v1426_v60  ;;  %v1855_v60 = vld [vmem:[%s4646_s14 + $0x60] sm:$0xff] }
 0x4a2   : > { %1642 = vmatpush.msrb.mxu3 %v1410_v45  ;;  %v1902_v45 = vld [vmem:[%s4646_s14 + $0x1d8] sm:$0xff] }
 0x50c   : > { %v1111_v11 = vpop.f32.mrf.mxu1 }
 0x50d   : > { %v1135_v13 = vadd.f32 %v3761_v3, %v1111_v11 }
 0x514   : > { %v1244_v12 = vpop.f32.mrf.mxu1 }
 0x515   : > { %v1247_v14 = vadd.f32 %v1244_v12, %v1135_v13  ;;  %v2936_v12 = vld [vmem:[#allocation16] ss:$0 sm:$0xff] }
 0x516   : > { %v1331_v10 = vpop.f32.mrf.mxu3 }
 0x517   : > { %2730 = vmatmul.msk.f32.vlgmr.msra.gmra.mxu0 %vm922_vm1, %v1331_v10  ;;  %vm1375_vm1 = vweird.f32 %v2957_v22  ;;  %v2935_v10 = vld [vmem:[#allocation15] ss:$0 sm:$0xff] }
 0x518   : > { %v3786_v27 = vsel %vm1375_vm1, %v2957_v22, %v1374_v26  ;;  %1659 = vmatpush.msra.mxu0 %v1459_v51  ;;  %v1446_v22 = vld [vmem:[#allocation18 + $0x150] sm:$0xff] }
 0x519   : > { %v1430_v26 = vld [vmem:[#allocation18 + $0xd0] sm:$0xff] }
 0x51a   : > { %1660 = vmatpush.msra.mxu0 %v1443_v56  ;;  %v1890_v51 = vld [vmem:[%s4646_s14 + $0x178] sm:$0xff]  ;;  %v1856_v56 = vld [vmem:[%s4646_s14 + $0x68] sm:$0xff] }
 0x51c   : > { %1661 = vmatpush.msra.mxu0 %v1427_v61  ;;  %v1903_v61 = vld [vmem:[%s4646_s14 + $0x1e0] sm:$0xff] }
 0x51e   : > { %1662 = vmatpush.msra.mxu0 %v1411_v1  ;;  %v1870_v1 = vld [vmem:[%s4646_s14 + $0xd8] sm:$0xff] }
 0x594   : > { %v1355_v16 = vpop.f32.mrf.mxu0 }
 0x595   : > { %v1358_v17 = vadd.f32 %v1355_v16, %v1247_v14  ;;  %v1460_v16 = vld [vmem:[#allocation18 + $0x1c0] sm:$0xff] }
 0x597   : > { %v1363_v18 = vadd.f32 %v2934_v15, %v1358_v17  ;;  %v1461_v17 = vld [vmem:[#allocation18 + $0x1c8] sm:$0xff] }
 0x599   : > { %v1364_v19 = vadd.f32 %v1363_v18, %v3724_v9  ;;  %v1462_v18 = vld [vmem:[#allocation18 + $0x1d0] sm:$0xff] }
 0x59b   : > { %v1367_v20 = vsel %vm830_vm0, %v1364_v19, 0.0 }
 0x59c   : > { %1368 = vadd.xlane.f32.xlu2 %v1367_v20  ;;  %v1444_v20 = vld [vmem:[#allocation18 + $0x140] sm:$0xff] }
 0x60f   : > { %v1369_v3 = vpop.xlane.xlu2 %1368 }
 0x610   : > { %v1377_v28 = vmul.f32 %v3786_v27, %v1369_v3  ;;  %v1431_v3 = vld [vmem:[#allocation18 + $0xd8] sm:$0xff] }
 0x612   : > { %v3789_v29 = vsub.f32 %v1364_v19, %v1377_v28  ;;  %v1463_v19 = vld [vmem:[#allocation18 + $0x1d8] sm:$0xff]  ;;  %v1412_v28 = vld [vmem:[#allocation18 + $0x40] sm:$0xff] }
 0x614   : > { %v1379_v9 = vmul.f32 %v3789_v29, %v3789_v29 }
 0x616   : > { %v1380_v30 = vsel %vm830_vm0, %v1379_v9, 0.0  ;;  %v1414_v9 = vld [vmem:[#allocation18 + $0x50] sm:$0xff] }
 0x617   : > { %1381 = vadd.xlane.f32.xlu0 %v1380_v30  ;;  %v1415_v30 = vld [vmem:[#allocation18 + $0x58] sm:$0xff] }
 0x68a   : > { %v1382_v54 = vpop.xlane.xlu0 %1381 }
 0x68b   : > { %v1383_v58 = vmul.f32 %v1382_v54, %v3786_v27  ;;  %v1873_v54 = vld [vmem:[%s4646_s14 + $0xf0] sm:$0xff] }
 0x68d   : > { %v1384_v0 = vadd.f32 1e-05, %v1383_v58  ;;  %v1872_v58 = vld [vmem:[%s4646_s14 + $0xe8] sm:$0xff] }
 0x68f   : > { %2958 = vrsqrt.f32 %v1384_v0  ;;  %vm1391_vm6 = vweird.f32 %v1384_v0 }
 0x695   : > { %v2959_v2 = vpop.eup %2958 }
 0x696   : > { %v1386_v4 = vmul.f32 %v2959_v2, %v1384_v0  ;;  %vm1392_vm2 = vweird.f32 %v2959_v2  ;;  %v1854_v0 = vld [vmem:[%s4646_s14 + $0x58] sm:$0xff] }
 0x697   : > { %vm1393_vm7 = vmor %vm1391_vm6, %vm1392_vm2 }
 0x698   : > { %v1387_v5 = vmul.f32 %v2959_v2, %v1386_v4  ;;  %v1853_v4 = vld [vmem:[%s4646_s14 + $0x50] sm:$0xff] }
 0x69a   : > { %v1388_v6 = vmul.f32 0.5, %v1387_v5  ;;  %v1901_v5 = vld [vmem:[%s4646_s14 + $0x1d0] sm:$0xff] }
 0x69c   : > { %v1389_v7 = vsub.f32 1.5, %v1388_v6  ;;  %v1869_v6 = vld [vmem:[%s4646_s14 + $0xd0] sm:$0xff] }
 0x69e   : > { %v1390_v8 = vmul.f32 %v2959_v2, %v1389_v7  ;;  %v1885_v7 = vld [vmem:[%s4646_s14 + $0x150] sm:$0xff] }
 0x6a0   : > { %v1394_v11 = vsel %vm1393_vm7, %v2959_v2, %v1390_v8  ;;  %v1886_v2 = vld [vmem:[%s4646_s14 + $0x158] sm:$0xff]  ;;  %v1852_v8 = vld [vmem:[%s4646_s14 + $0x48] sm:$0xff] }
 0x6a1   : > { %v1395_v13 = vmul.f32 %v1394_v11, %v3789_v29  ;;  %v1413_v29 = vld [vmem:[#allocation18 + $0x48] sm:$0xff]  ;;  %v1868_v11 = vld [vmem:[%s4646_s14 + $0xc8] sm:$0xff] }
 0x6a3   : > { %v1399_v14 = vmul.f32 %v2935_v10, %v1395_v13  ;;  %v1900_v10 = vld [vmem:[%s4646_s14 + $0x1c8] sm:$0xff]  ;;  %v1851_v13 = vld [vmem:[%s4646_s14 + $0x40] sm:$0xff] }
 0x6a5   : > { %v3796_v15 = vadd.f32 %v2936_v12, %v1399_v14  ;;  %v1884_v12 = vld [vmem:[%s4646_s14 + $0x148] sm:$0xff]  ;;  %v1899_v14 = vld [vmem:[%s4646_s14 + $0x1c0] sm:$0xff] }
 0x6a7   : > { %2731 = vmatmul.msk.f32.vlgmr.msrb.gmra.mxu1 %vm830_vm0, %v3796_v15  ;;  %2732 = vmatmul.msk.f32.vlgmr.msrb.gmra.mxu2 %vm830_vm0, %v3796_v15 }
 0x6a8   : > { %2733 = vmatmul.msk.f32.vlgmr.msra.gmra.mxu3 %vm830_vm0, %v3796_v15  ;;  %2734 = vmatmul.msk.f32.vlgmr.msrb.gmra.mxu0 %vm830_vm0, %v3796_v15 }
 0x6a9   : > { %1679 = vmatpush.msrb.mxu1 %v1460_v16  ;;  %1699 = vmatpush.msrb.mxu2 %v1461_v17  ;;  %v1867_v16 = vld [vmem:[%s4646_s14 + $0xc0] sm:$0xff] }
 0x6aa   : > { %1719 = vmatpush.msra.mxu3 %v1462_v18  ;;  %1739 = vmatpush.msrb.mxu0 %v1463_v19  ;;  %v1883_v17 = vld [vmem:[%s4646_s14 + $0x140] sm:$0xff]  ;;  %v1850_v18 = vld [vmem:[%s4646_s14 + $0x38] sm:$0xff] }
 0x6ab   : > { %1680 = vmatpush.msrb.mxu1 %v1444_v20  ;;  %1700 = vmatpush.msrb.mxu2 %v1445_v21  ;;  %v1898_v19 = vld [vmem:[%s4646_s14 + $0x1b8] sm:$0xff] }
 0x6ac   : > { %1720 = vmatpush.msra.mxu3 %v1446_v22  ;;  %1740 = vmatpush.msrb.mxu0 %v1447_v23  ;;  %v1866_v20 = vld [vmem:[%s4646_s14 + $0xb8] sm:$0xff]  ;;  %v1849_v22 = vld [vmem:[%s4646_s14 + $0x30] sm:$0xff] }
 0x6ad   : > { %1681 = vmatpush.msrb.mxu1 %v1428_v24  ;;  %1701 = vmatpush.msrb.mxu2 %v1429_v25  ;;  %v1882_v21 = vld [vmem:[%s4646_s14 + $0x138] sm:$0xff]  ;;  %v1897_v23 = vld [vmem:[%s4646_s14 + $0x1b0] sm:$0xff] }
 0x6ae   : > { %1721 = vmatpush.msra.mxu3 %v1430_v26  ;;  %1741 = vmatpush.msrb.mxu0 %v1431_v3  ;;  %v1865_v24 = vld [vmem:[%s4646_s14 + $0xb0] sm:$0xff]  ;;  %v1848_v26 = vld [vmem:[%s4646_s14 + $0x28] sm:$0xff] }
 0x6af   : > { %2735 = vmatmul.msk.f32.vlgmr.msra.gmra.mxu1 %vm830_vm0, %v3796_v15  ;;  %2736 = vmatmul.msk.f32.vlgmr.msra.gmra.mxu2 %vm830_vm0, %v3796_v15  ;;  %v1881_v25 = vld [vmem:[%s4646_s14 + $0x130] sm:$0xff]  ;;  %v1896_v3 = vld [vmem:[%s4646_s14 + $0x1a8] sm:$0xff] }
 0x6b0   : > { %2737 = vmatmul.msk.f32.vlgmr.msrb.gmra.mxu3 %vm830_vm0, %v3796_v15  ;;  %2738 = vmatmul.msk.f32.vlgmr.msra.gmra.mxu0 %vm830_vm0, %v3796_v15 }
 0x6b1   : > { %1682 = vmatpush.msrb.mxu1 %v1412_v28  ;;  %1702 = vmatpush.msrb.mxu2 %v1413_v29  ;;  %v1864_v28 = vld [vmem:[%s4646_s14 + $0xa8] sm:$0xff] }
 0x6b2   : > { %1722 = vmatpush.msra.mxu3 %v1414_v9  ;;  %1742 = vmatpush.msrb.mxu0 %v1415_v30  ;;  %v1880_v29 = vld [vmem:[%s4646_s14 + $0x128] sm:$0xff]  ;;  %v1847_v9 = vld [vmem:[%s4646_s14 + $0x20] sm:$0xff] }
 0x6b3   : > { %1759 = vmatpush.msra.mxu1 %v1464_v31  ;;  %1779 = vmatpush.msra.mxu2 %v1465_v32  ;;  %v1895_v30 = vld [vmem:[%s4646_s14 + $0x1a0] sm:$0xff] }
 0x6b4   : > { %1799 = vmatpush.msrb.mxu3 %v1466_v33  ;;  %1819 = vmatpush.msra.mxu0 %v1467_v34  ;;  %v1863_v31 = vld [vmem:[%s4646_s14 + $0xa0] sm:$0xff]  ;;  %v1846_v33 = vld [vmem:[%s4646_s14 + $0x18] sm:$0xff] }
 0x6b5   : > { %1760 = vmatpush.msra.mxu1 %v1448_v35  ;;  %1780 = vmatpush.msra.mxu2 %v1449_v36  ;;  %v1879_v32 = vld [vmem:[%s4646_s14 + $0x120] sm:$0xff]  ;;  %v1894_v34 = vld [vmem:[%s4646_s14 + $0x198] sm:$0xff] }
 0x6b6   : > { %1800 = vmatpush.msrb.mxu3 %v1450_v37  ;;  %1820 = vmatpush.msra.mxu0 %v1451_v38  ;;  %v1862_v35 = vld [vmem:[%s4646_s14 + $0x98] sm:$0xff]  ;;  %v1845_v37 = vld [vmem:[%s4646_s14 + $0x10] sm:$0xff] }
 0x6b7   : > { %2739 = vmatmul.msk.f32.vlgmr.msrb.gmra.mxu1 %vm830_vm0, %v3796_v15  ;;  %2740 = vmatmul.msk.f32.vlgmr.msrb.gmra.mxu2 %vm830_vm0, %v3796_v15  ;;  %v1878_v36 = vld [vmem:[%s4646_s14 + $0x118] sm:$0xff]  ;;  %v1893_v38 = vld [vmem:[%s4646_s14 + $0x190] sm:$0xff] }
 0x6b8   : > { %2741 = vmatmul.msk.f32.vlgmr.msra.gmra.mxu3 %vm830_vm0, %v3796_v15  ;;  %2742 = vmatmul.msk.f32.vlgmr.msrb.gmra.mxu0 %vm830_vm0, %v3796_v15 }
 0x6b9   : > { %1761 = vmatpush.msra.mxu1 %v1432_v39  ;;  %1781 = vmatpush.msra.mxu2 %v1433_v40  ;;  %v1861_v39 = vld [vmem:[%s4646_s14 + $0x90] sm:$0xff] }
 0x6ba   : > { %1801 = vmatpush.msrb.mxu3 %v1434_v41  ;;  %1821 = vmatpush.msra.mxu0 %v1435_v42  ;;  %v1877_v40 = vld [vmem:[%s4646_s14 + $0x110] sm:$0xff]  ;;  %v1844_v41 = vld [vmem:[%s4646_s14 + $0x8] sm:$0xff] }
 0x6bb   : > { %1762 = vmatpush.msra.mxu1 %v1416_v43  ;;  %1782 = vmatpush.msra.mxu2 %v1417_v44  ;;  %v1892_v42 = vld [vmem:[%s4646_s14 + $0x188] sm:$0xff] }
 0x6bc   : > { %1802 = vmatpush.msrb.mxu3 %v1418_v46  ;;  %1822 = vmatpush.msra.mxu0 %v1419_v47  ;;  %v1860_v43 = vld [vmem:[%s4646_s14 + $0x88] sm:$0xff]  ;;  %v1843_v46 = vld [vmem:[%s4646_s14] sm:$0xff] }
 0x6bd   : > { %2103 = vmatpush.msrb.mxu1 %v1858_v48  ;;  %2123 = vmatpush.msrb.mxu2 %v1874_v50  ;;  %v1876_v44 = vld [vmem:[%s4646_s14 + $0x108] sm:$0xff]  ;;  %v1891_v47 = vld [vmem:[%s4646_s14 + $0x180] sm:$0xff]  ;;  %v1922_v48 = vld [vmem:[%s4646_s14 + $0x278] sm:$0xff] }
 0x6be   : > { %2163 = vmatpush.msrb.mxu0 %v1906_v49  ;;  %2143 = vmatpush.msra.mxu3 %v1890_v51  ;;  %v1970_v49 = vld [vmem:[%s4646_s14 + $0x3f8] sm:$0xff]  ;;  %v1859_v50 = vld [vmem:[%s4646_s14 + $0x80] sm:$0xff] }
 0x6bf   : > { %2743 = vmatmul.msk.f32.vlgmr.msra.gmra.mxu1 %vm830_vm0, %v3796_v15  ;;  %2744 = vmatmul.msk.f32.vlgmr.msra.gmra.mxu2 %vm830_vm0, %v3796_v15  ;;  %v1875_v51 = vld [vmem:[%s4646_s14 + $0x100] sm:$0xff] }
 0x6c0   : > { %2745 = vmatmul.msk.f32.vlgmr.msrb.gmra.mxu3 %vm830_vm0, %v3796_v15  ;;  %2746 = vmatmul.msk.f32.vlgmr.msra.gmra.mxu0 %vm830_vm0, %v3796_v15 }
 0x6c1   : > { %2104 = vmatpush.msrb.mxu1 %v1857_v52  ;;  %2164 = vmatpush.msrb.mxu0 %v1905_v53  ;;  %v1921_v52 = vld [vmem:[%s4646_s14 + $0x270] sm:$0xff] }
 0x6c2   : > { %2124 = vmatpush.msrb.mxu2 %v1873_v54  ;;  %2144 = vmatpush.msra.mxu3 %v1889_v55  ;;  %v1969_v53 = vld [vmem:[%s4646_s14 + $0x3f0] sm:$0xff]  ;;  %v1938_v54 = vld [vmem:[%s4646_s14 + $0x2f8] sm:$0xff] }
 0x6c3   : > { %2105 = vmatpush.msrb.mxu1 %v1856_v56  ;;  %2165 = vmatpush.msrb.mxu0 %v1904_v57  ;;  %v1954_v55 = vld [vmem:[%s4646_s14 + $0x378] sm:$0xff]  ;;  %v1920_v56 = vld [vmem:[%s4646_s14 + $0x268] sm:$0xff] }
 0x6c4   : > { %2125 = vmatpush.msrb.mxu2 %v1872_v58  ;;  %2145 = vmatpush.msra.mxu3 %v1888_v59  ;;  %v1968_v57 = vld [vmem:[%s4646_s14 + $0x3e8] sm:$0xff]  ;;  %v1937_v58 = vld [vmem:[%s4646_s14 + $0x2f0] sm:$0xff] }
 0x6c5   : > { %2106 = vmatpush.msrb.mxu1 %v1855_v60  ;;  %2166 = vmatpush.msrb.mxu0 %v1903_v61  ;;  %v1953_v59 = vld [vmem:[%s4646_s14 + $0x370] sm:$0xff]  ;;  %v1919_v60 = vld [vmem:[%s4646_s14 + $0x260] sm:$0xff] }
 0x6c6   : > { %2126 = vmatpush.msrb.mxu2 %v1871_v62  ;;  %2146 = vmatpush.msra.mxu3 %v1887_v63  ;;  %v1967_v61 = vld [vmem:[%s4646_s14 + $0x3e0] sm:$0xff]  ;;  %v1936_v62 = vld [vmem:[%s4646_s14 + $0x2e8] sm:$0xff] }
 0x6c7   : > { %2107 = vmatpush.msrb.mxu1 %v1854_v0  ;;  %2167 = vmatpush.msrb.mxu0 %v1902_v45  ;;  %v1952_v63 = vld [vmem:[%s4646_s14 + $0x368] sm:$0xff]  ;;  %v1918_v0 = vld [vmem:[%s4646_s14 + $0x258] sm:$0xff] }
 0x6c8   : > { %2127 = vmatpush.msrb.mxu2 %v1870_v1  ;;  %2147 = vmatpush.msra.mxu3 %v1886_v2  ;;  %v1966_v45 = vld [vmem:[%s4646_s14 + $0x3d8] sm:$0xff]  ;;  %v1935_v1 = vld [vmem:[%s4646_s14 + $0x2e0] sm:$0xff] }
 0x6c9   : > { %2108 = vmatpush.msrb.mxu1 %v1853_v4  ;;  %2168 = vmatpush.msrb.mxu0 %v1901_v5  ;;  %v1951_v2 = vld [vmem:[%s4646_s14 + $0x360] sm:$0xff]  ;;  %v1917_v4 = vld [vmem:[%s4646_s14 + $0x250] sm:$0xff] }
 0x6ca   : > { %2128 = vmatpush.msrb.mxu2 %v1869_v6  ;;  %2148 = vmatpush.msra.mxu3 %v1885_v7  ;;  %v1965_v5 = vld [vmem:[%s4646_s14 + $0x3d0] sm:$0xff]  ;;  %v1934_v6 = vld [vmem:[%s4646_s14 + $0x2d8] sm:$0xff] }
 0x6cb   : > { %2109 = vmatpush.msrb.mxu1 %v1852_v8  ;;  %2169 = vmatpush.msrb.mxu0 %v1900_v10  ;;  %v1950_v7 = vld [vmem:[%s4646_s14 + $0x358] sm:$0xff]  ;;  %v1916_v8 = vld [vmem:[%s4646_s14 + $0x248] sm:$0xff] }
 0x6cc   : > { %2129 = vmatpush.msrb.mxu2 %v1868_v11  ;;  %2149 = vmatpush.msra.mxu3 %v1884_v12  ;;  %v1964_v10 = vld [vmem:[%s4646_s14 + $0x3c8] sm:$0xff]  ;;  %v1933_v11 = vld [vmem:[%s4646_s14 + $0x2d0] sm:$0xff] }
 0x6cd   : > { %2110 = vmatpush.msrb.mxu1 %v1851_v13  ;;  %2170 = vmatpush.msrb.mxu0 %v1899_v14  ;;  %v1949_v12 = vld [vmem:[%s4646_s14 + $0x350] sm:$0xff]  ;;  %v1915_v13 = vld [vmem:[%s4646_s14 + $0x240] sm:$0xff] }
 0x6ce   : > { %2130 = vmatpush.msrb.mxu2 %v1867_v16  ;;  %2150 = vmatpush.msra.mxu3 %v1883_v17  ;;  %v1963_v14 = vld [vmem:[%s4646_s14 + $0x3c0] sm:$0xff]  ;;  %v1932_v16 = vld [vmem:[%s4646_s14 + $0x2c8] sm:$0xff] }
 0x6cf   : > { %2111 = vmatpush.msrb.mxu1 %v1850_v18  ;;  %2171 = vmatpush.msrb.mxu0 %v1898_v19  ;;  %v1948_v17 = vld [vmem:[%s4646_s14 + $0x348] sm:$0xff]  ;;  %v1914_v18 = vld [vmem:[%s4646_s14 + $0x238] sm:$0xff] }
 0x6d0   : > { %2131 = vmatpush.msrb.mxu2 %v1866_v20  ;;  %2151 = vmatpush.msra.mxu3 %v1882_v21  ;;  %v1962_v19 = vld [vmem:[%s4646_s14 + $0x3b8] sm:$0xff]  ;;  %v1931_v20 = vld [vmem:[%s4646_s14 + $0x2c0] sm:$0xff] }
 0x6d1   : > { %2112 = vmatpush.msrb.mxu1 %v1849_v22  ;;  %2172 = vmatpush.msrb.mxu0 %v1897_v23  ;;  %v1947_v21 = vld [vmem:[%s4646_s14 + $0x340] sm:$0xff]  ;;  %v1913_v22 = vld [vmem:[%s4646_s14 + $0x230] sm:$0xff] }
 0x6d2   : > { %2132 = vmatpush.msrb.mxu2 %v1865_v24  ;;  %2152 = vmatpush.msra.mxu3 %v1881_v25  ;;  %v1961_v23 = vld [vmem:[%s4646_s14 + $0x3b0] sm:$0xff]  ;;  %v1930_v24 = vld [vmem:[%s4646_s14 + $0x2b8] sm:$0xff] }
 0x6d3   : > { %2113 = vmatpush.msrb.mxu1 %v1848_v26  ;;  %2173 = vmatpush.msrb.mxu0 %v1896_v3  ;;  %v1946_v25 = vld [vmem:[%s4646_s14 + $0x338] sm:$0xff]  ;;  %v1912_v26 = vld [vmem:[%s4646_s14 + $0x228] sm:$0xff] }
 0x6d4   : > { %2133 = vmatpush.msrb.mxu2 %v1864_v28  ;;  %2153 = vmatpush.msra.mxu3 %v1880_v29  ;;  %v1960_v3 = vld [vmem:[%s4646_s14 + $0x3a8] sm:$0xff]  ;;  %v1929_v28 = vld [vmem:[%s4646_s14 + $0x2b0] sm:$0xff] }
 0x6d5   : > { %2114 = vmatpush.msrb.mxu1 %v1847_v9  ;;  %2174 = vmatpush.msrb.mxu0 %v1895_v30  ;;  %v1945_v29 = vld [vmem:[%s4646_s14 + $0x330] sm:$0xff]  ;;  %v1911_v9 = vld [vmem:[%s4646_s14 + $0x220] sm:$0xff] }
 0x6d6   : > { %2134 = vmatpush.msrb.mxu2 %v1863_v31  ;;  %2154 = vmatpush.msra.mxu3 %v1879_v32  ;;  %v1959_v30 = vld [vmem:[%s4646_s14 + $0x3a0] sm:$0xff]  ;;  %v1910_v31 = vld [vmem:[%s4646_s14 + $0x218] sm:$0xff] }
 0x6d7   : > { %2115 = vmatpush.msrb.mxu1 %v1846_v33  ;;  %2175 = vmatpush.msrb.mxu0 %v1894_v34  ;;  %v1958_v32 = vld [vmem:[%s4646_s14 + $0x398] sm:$0xff]  ;;  %v1909_v33 = vld [vmem:[%s4646_s14 + $0x210] sm:$0xff]  ;;  %v1928_v34 = vld [vmem:[%s4646_s14 + $0x2a8] sm:$0xff] }
 0x6d8   : > { %2135 = vmatpush.msrb.mxu2 %v1862_v35  ;;  %2155 = vmatpush.msra.mxu3 %v1878_v36  ;;  %v1944_v35 = vld [vmem:[%s4646_s14 + $0x328] sm:$0xff]  ;;  %v1957_v36 = vld [vmem:[%s4646_s14 + $0x390] sm:$0xff] }
 0x6d9   : > { %2116 = vmatpush.msrb.mxu1 %v1845_v37  ;;  %2176 = vmatpush.msrb.mxu0 %v1893_v38  ;;  %v1908_v37 = vld [vmem:[%s4646_s14 + $0x208] sm:$0xff]  ;;  %v1927_v38 = vld [vmem:[%s4646_s14 + $0x2a0] sm:$0xff] }
 0x6da   : > { %2136 = vmatpush.msrb.mxu2 %v1861_v39  ;;  %2156 = vmatpush.msra.mxu3 %v1877_v40  ;;  %v1943_v39 = vld [vmem:[%s4646_s14 + $0x320] sm:$0xff]  ;;  %v1956_v40 = vld [vmem:[%s4646_s14 + $0x388] sm:$0xff] }
 0x6db   : > { %2117 = vmatpush.msrb.mxu1 %v1844_v41  ;;  %2177 = vmatpush.msrb.mxu0 %v1892_v42  ;;  %v1907_v41 = vld [vmem:[%s4646_s14 + $0x200] sm:$0xff]  ;;  %v1926_v42 = vld [vmem:[%s4646_s14 + $0x298] sm:$0xff] }
 0x6dc   : > { %2137 = vmatpush.msrb.mxu2 %v1860_v43  ;;  %2157 = vmatpush.msra.mxu3 %v1876_v44  ;;  %v1942_v43 = vld [vmem:[%s4646_s14 + $0x318] sm:$0xff]  ;;  %v1955_v44 = vld [vmem:[%s4646_s14 + $0x380] sm:$0xff] }
 0x6dd   : > { %2118 = vmatpush.msrb.mxu1 %v1843_v46  ;;  %2178 = vmatpush.msrb.mxu0 %v1891_v47  ;;  %v1925_v46 = vld [vmem:[%s4646_s14 + $0x290] sm:$0xff] }
 0x6de   : > { %2138 = vmatpush.msrb.mxu2 %v1859_v50  ;;  %2158 = vmatpush.msra.mxu3 %v1875_v51  ;;  %v1941_v47 = vld [vmem:[%s4646_s14 + $0x310] sm:$0xff]  ;;  %v1923_v50 = vld [vmem:[%s4646_s14 + $0x280] sm:$0xff] }
 0x6df   : > { %2183 = vmatpush.msra.mxu1 %v1922_v48  ;;  %2243 = vmatpush.msra.mxu0 %v1970_v49  ;;  %v1924_v48 = vld [vmem:[%s4646_s14 + $0x288] sm:$0xff]  ;;  %v1939_v51 = vld [vmem:[%s4646_s14 + $0x300] sm:$0xff] }
 0x6e0   : > { %2203 = vmatpush.msra.mxu2 %v1938_v54  ;;  %2223 = vmatpush.msrb.mxu3 %v1954_v55  ;;  %v1940_v49 = vld [vmem:[%s4646_s14 + $0x308] sm:$0xff] }
 0x6e1   : > { %2184 = vmatpush.msra.mxu1 %v1921_v52  ;;  %2244 = vmatpush.msra.mxu0 %v1969_v53  ;;  %v4214_v52 = vld [vmem:[#allocation19] sm:$0xff] }
 0x6e2   : > { %2204 = vmatpush.msra.mxu2 %v1937_v58  ;;  %2224 = vmatpush.msrb.mxu3 %v1953_v59  ;;  %v1472_v53 = vperm.slane %v4214_v52, 0  ;;  %v1475_v54 = vperm.slane %v4214_v52, 3 }
 0x6e3   : > { %2185 = vmatpush.msra.mxu1 %v1920_v56  ;;  %2245 = vmatpush.msra.mxu0 %v1968_v57 }
 0x6e4   : > { %2205 = vmatpush.msra.mxu2 %v1936_v62  ;;  %2225 = vmatpush.msrb.mxu3 %v1952_v63  ;;  %v2034_v63 = vld [vmem:[%s4646_s14 + $0x5f8] sm:$0xff] }
 0x6e5   : > { %2186 = vmatpush.msra.mxu1 %v1919_v60  ;;  %2246 = vmatpush.msra.mxu0 %v1967_v61  ;;  %v1986_v60 = vld [vmem:[%s4646_s14 + $0x478] sm:$0xff]  ;;  %v1473_v61 = vperm.slane %v4214_v52, 1 }
 0x6e6   : > { %2206 = vmatpush.msra.mxu2 %v1935_v1  ;;  %2226 = vmatpush.msrb.mxu3 %v1951_v2  ;;  %v1476_v1 = vperm.slane %v4214_v52, 4 }
 0x6e7   : > { %2187 = vmatpush.msra.mxu1 %v1918_v0  ;;  %2247 = vmatpush.msra.mxu0 %v1966_v45  ;;  %v1474_v0 = vperm.slane %v4214_v52, 2  ;;  %v1985_v45 = vld [vmem:[%s4646_s14 + $0x470] sm:$0xff] }
 0x6e8   : > { %2207 = vmatpush.msra.mxu2 %v1934_v6  ;;  %2227 = vmatpush.msrb.mxu3 %v1950_v7 }
 0x6e9   : > { %2188 = vmatpush.msra.mxu1 %v1917_v4  ;;  %2248 = vmatpush.msra.mxu0 %v1965_v5  ;;  %v2033_v4 = vld [vmem:[%s4646_s14 + $0x5f0] sm:$0xff]  ;;  %v1479_v5 = vperm.slane %v4214_v52, 7 }
 0x6ea   : > { %2208 = vmatpush.msra.mxu2 %v1933_v11  ;;  %2228 = vmatpush.msrb.mxu3 %v1949_v12  ;;  %v2032_v12 = vld [vmem:[%s4646_s14 + $0x5e8] sm:$0xff] }
 0x6eb   : > { %2189 = vmatpush.msra.mxu1 %v1916_v8  ;;  %2249 = vmatpush.msra.mxu0 %v1964_v10  ;;  %v1984_v8 = vld [vmem:[%s4646_s14 + $0x468] sm:$0xff] }
 0x6ec   : > { %2209 = vmatpush.msra.mxu2 %v1932_v16  ;;  %2229 = vmatpush.msrb.mxu3 %v1948_v17  ;;  %v1983_v17 = vld [vmem:[%s4646_s14 + $0x460] sm:$0xff] }
 0x6ed   : > { %2190 = vmatpush.msra.mxu1 %v1915_v13  ;;  %2250 = vmatpush.msra.mxu0 %v1963_v14 }
 0x6ee   : > { %2210 = vmatpush.msra.mxu2 %v1931_v20  ;;  %2230 = vmatpush.msrb.mxu3 %v1947_v21  ;;  %v2002_v20 = vld [vmem:[%s4646_s14 + $0x4f8] sm:$0xff] }
 0x6ef   : > { %2191 = vmatpush.msra.mxu1 %v1914_v18  ;;  %2251 = vmatpush.msra.mxu0 %v1962_v19  ;;  %v2018_v21 = vld [vmem:[%s4646_s14 + $0x578] sm:$0xff] }
 0x6f0   : > { %2211 = vmatpush.msra.mxu2 %v1930_v24  ;;  %2231 = vmatpush.msrb.mxu3 %v1946_v25  ;;  %v1477_v24 = vperm.slane %v4214_v52, 5 }
 0x6f1   : > { %2192 = vmatpush.msra.mxu1 %v1913_v22  ;;  %2252 = vmatpush.msra.mxu0 %v1961_v23  ;;  %v2031_v23 = vld [vmem:[%s4646_s14 + $0x5e0] sm:$0xff] }
 0x6f2   : > { %2212 = vmatpush.msra.mxu2 %v1929_v28  ;;  %2232 = vmatpush.msrb.mxu3 %v1945_v29  ;;  %v2001_v28 = vld [vmem:[%s4646_s14 + $0x4f0] sm:$0xff] }
 0x6f3   : > { %2193 = vmatpush.msra.mxu1 %v1912_v26  ;;  %2253 = vmatpush.msra.mxu0 %v1960_v3  ;;  %v1982_v26 = vld [vmem:[%s4646_s14 + $0x458] sm:$0xff]  ;;  %v1478_v3 = vperm.slane %v4214_v52, 6  ;;  %v2017_v29 = vld [vmem:[%s4646_s14 + $0x570] sm:$0xff] }
 0x6f4   : > { %2213 = vmatpush.msra.mxu2 %v1928_v34  ;;  %2233 = vmatpush.msrb.mxu3 %v1944_v35  ;;  %v2000_v34 = vld [vmem:[%s4646_s14 + $0x4e8] sm:$0xff]  ;;  %v2026_v52 = vld [vmem:[%s4646_s14 + $0x5b8] sm:$0xff] }
 0x6f5   : > { %2194 = vmatpush.msra.mxu1 %v1911_v9  ;;  %2254 = vmatpush.msra.mxu0 %v1959_v30  ;;  %v2030_v9 = vld [vmem:[%s4646_s14 + $0x5d8] sm:$0xff]  ;;  %v2016_v35 = vld [vmem:[%s4646_s14 + $0x568] sm:$0xff] }
 0x6f6   : > { %2214 = vmatpush.msra.mxu2 %v1927_v38  ;;  %2234 = vmatpush.msrb.mxu3 %v1943_v39  ;;  %v1980_v38 = vld [vmem:[%s4646_s14 + $0x448] sm:$0xff] }
 0x6f7   : > { %2195 = vmatpush.msra.mxu1 %v1910_v31  ;;  %2255 = vmatpush.msra.mxu0 %v1958_v32  ;;  %v1981_v31 = vld [vmem:[%s4646_s14 + $0x450] sm:$0xff] }
 0x6f8   : > { %2215 = vmatpush.msra.mxu2 %v1926_v42  ;;  %2235 = vmatpush.msrb.mxu3 %v1942_v43  ;;  %v2028_v43 = vld [vmem:[%s4646_s14 + $0x5c8] sm:$0xff] }
 0x6f9   : > { %2196 = vmatpush.msra.mxu1 %v1909_v33  ;;  %2256 = vmatpush.msra.mxu0 %v1957_v36 }
 0x6fa   : > { %2216 = vmatpush.msra.mxu2 %v1925_v46  ;;  %2236 = vmatpush.msrb.mxu3 %v1941_v47  ;;  %v1998_v46 = vld [vmem:[%s4646_s14 + $0x4d8] sm:$0xff] }
 0x6fb   : > { %2197 = vmatpush.msra.mxu1 %v1908_v37  ;;  %2257 = vmatpush.msra.mxu0 %v1956_v40  ;;  %v2029_v37 = vld [vmem:[%s4646_s14 + $0x5d0] sm:$0xff]  ;;  %v1999_v40 = vld [vmem:[%s4646_s14 + $0x4e0] sm:$0xff]  ;;  %v2014_v47 = vld [vmem:[%s4646_s14 + $0x558] sm:$0xff] }
 0x6fc   : > { %2217 = vmatpush.msra.mxu2 %v1924_v48  ;;  %2237 = vmatpush.msrb.mxu3 %v1940_v49  ;;  %v2027_v48 = vld [vmem:[%s4646_s14 + $0x5c0] sm:$0xff]  ;;  %v1978_v49 = vld [vmem:[%s4646_s14 + $0x438] sm:$0xff] }
 0x6fd   : > { %2198 = vmatpush.msra.mxu1 %v1907_v41  ;;  %2258 = vmatpush.msra.mxu0 %v1955_v44  ;;  %v2015_v41 = vld [vmem:[%s4646_s14 + $0x560] sm:$0xff] }
 0x6fe   : > { %2218 = vmatpush.msra.mxu2 %v1923_v50  ;;  %2238 = vmatpush.msrb.mxu3 %v1939_v51  ;;  %v1979_v44 = vld [vmem:[%s4646_s14 + $0x440] sm:$0xff]  ;;  %v1997_v50 = vld [vmem:[%s4646_s14 + $0x4d0] sm:$0xff] }
 0x6ff   : > { %v2013_v51 = vld [vmem:[%s4646_s14 + $0x550] sm:$0xff] }
 0x724   : > { %v1524_v55 = vpop.f32.mrf.mxu1 }
 0x725   : > { %v1525_v56 = vadd.f32 %v1524_v55, %v1472_v53  ;;  %v1584_v57 = vpop.f32.mrf.mxu0  ;;  %v1977_v53 = vld [vmem:[%s4646_s14 + $0x430] sm:$0xff]  ;;  %v2012_v55 = vld [vmem:[%s4646_s14 + $0x548] sm:$0xff] }
 0x726   : > { %v1585_v58 = vadd.f32 %v1584_v57, %v1475_v54  ;;  %v1996_v54 = vld [vmem:[%s4646_s14 + $0x4c8] sm:$0xff] }
 0x727   : > { %v1827_v59 = vmax.f32 %v1525_v56, 0.0  ;;  %v2025_v56 = vld [vmem:[%s4646_s14 + $0x5b0] sm:$0xff]  ;;  %v1976_v57 = vld [vmem:[%s4646_s14 + $0x428] sm:$0xff] }
 0x728   : > { %v1830_v62 = vmax.f32 %v1585_v58, 0.0  ;;  %v1995_v58 = vld [vmem:[%s4646_s14 + $0x4c0] sm:$0xff] }
 0x729   : > { %2119 = vmatmul.f32.vlgmr.msrb.gmra.mxu1 %v1827_v59  ;;  %v2011_v59 = vld [vmem:[%s4646_s14 + $0x540] sm:$0xff] }
 0x72a   : > { %2179 = vmatmul.f32.vlgmr.msrb.gmra.mxu0 %v1830_v62  ;;  %2263 = vmatpush.msrb.mxu1 %v1986_v60  ;;  %v1544_v2 = vpop.f32.mrf.mxu2  ;;  %v4335_v60 = vld [vmem:[#allocation19 + $0x8] sm:$0xff]  ;;  %v1975_v62 = vld [vmem:[%s4646_s14 + $0x420] sm:$0xff] }
 0x72b   : > { %2323 = vmatpush.msrb.mxu0 %v2034_v63  ;;  %v1545_v6 = vadd.f32 %v1544_v2, %v1473_v61  ;;  %v1564_v7 = vpop.f32.mrf.mxu3  ;;  %v2024_v61 = vld [vmem:[%s4646_s14 + $0x5a8] sm:$0xff]  ;;  %v1994_v63 = vld [vmem:[%s4646_s14 + $0x4b8] sm:$0xff]  ;;  %v1480_v2 = vperm.slane %v4335_v60, 0 }
 0x72c   : > { %v1565_v10 = vadd.f32 %v1564_v7, %v1474_v0  ;;  %2264 = vmatpush.msrb.mxu1 %v1985_v45  ;;  %v1604_v11 = vpop.f32.mrf.mxu1  ;;  %v2010_v0 = vld [vmem:[%s4646_s14 + $0x538] sm:$0xff]  ;;  %v2023_v45 = vld [vmem:[%s4646_s14 + $0x5a0] sm:$0xff]  ;;  %v1483_v7 = vperm.slane %v4335_v60, 3 }
 0x72d   : > { %v1828_v13 = vmax.f32 %v1545_v6, 0.0  ;;  %2324 = vmatpush.msrb.mxu0 %v2033_v4  ;;  %v1605_v14 = vadd.f32 %v1604_v11, %v1476_v1  ;;  %v1664_v16 = vpop.f32.mrf.mxu0  ;;  %v1974_v1 = vld [vmem:[%s4646_s14 + $0x418] sm:$0xff]  ;;  %v1993_v4 = vld [vmem:[%s4646_s14 + $0x4b0] sm:$0xff] }
 0x72e   : > { %v1829_v18 = vmax.f32 %v1565_v10, 0.0  ;;  %v1665_v19 = vadd.f32 %v1664_v16, %v1479_v5  ;;  %2265 = vmatpush.msrb.mxu1 %v1984_v8  ;;  %v2009_v5 = vld [vmem:[%s4646_s14 + $0x530] sm:$0xff]  ;;  %v2022_v8 = vld [vmem:[%s4646_s14 + $0x598] sm:$0xff]  ;;  %v1972_v16 = vld [vmem:[%s4646_s14 + $0x408] sm:$0xff] }
 0x72f   : > { %v1831_v22 = vmax.f32 %v1605_v14, 0.0  ;;  %2325 = vmatpush.msrb.mxu0 %v2032_v12  ;;  %2139 = vmatmul.f32.vlgmr.msrb.gmra.mxu2 %v1828_v13  ;;  %v1973_v10 = vld [vmem:[%s4646_s14 + $0x410] sm:$0xff]  ;;  %v1992_v12 = vld [vmem:[%s4646_s14 + $0x4a8] sm:$0xff] }
 0x730   : > { %v1834_v25 = vmax.f32 %v1665_v19, 0.0  ;;  %2159 = vmatmul.f32.vlgmr.msra.gmra.mxu3 %v1829_v18  ;;  %2266 = vmatpush.msrb.mxu1 %v1983_v17  ;;  %v2008_v13 = vld [vmem:[%s4646_s14 + $0x528] sm:$0xff]  ;;  %v2021_v14 = vld [vmem:[%s4646_s14 + $0x590] sm:$0xff]  ;;  %v1991_v18 = vld [vmem:[%s4646_s14 + $0x4a0] sm:$0xff] }
 0x731   : > { %2283 = vmatpush.msrb.mxu2 %v2002_v20  ;;  %2303 = vmatpush.msra.mxu3 %v2018_v21  ;;  %v2007_v19 = vld [vmem:[%s4646_s14 + $0x520] sm:$0xff]  ;;  %v2020_v21 = vld [vmem:[%s4646_s14 + $0x588] sm:$0xff] }
 0x732   : > { %2326 = vmatpush.msrb.mxu0 %v2031_v23  ;;  %2199 = vmatmul.f32.vlgmr.msra.gmra.mxu1 %v1831_v22  ;;  %v1624_v30 = vpop.f32.mrf.mxu2  ;;  %v1971_v22 = vld [vmem:[%s4646_s14 + $0x400] sm:$0xff]  ;;  %v1990_v23 = vld [vmem:[%s4646_s14 + $0x498] sm:$0xff] }
 0x733   : > { %2259 = vmatmul.f32.vlgmr.msra.gmra.mxu0 %v1834_v25  ;;  %2267 = vmatpush.msrb.mxu1 %v1982_v26  ;;  %v1625_v32 = vadd.f32 %v1624_v30, %v1477_v24  ;;  %v1644_v33 = vpop.f32.mrf.mxu3  ;;  %v2006_v24 = vld [vmem:[%s4646_s14 + $0x518] sm:$0xff]  ;;  %v1481_v25 = vperm.slane %v4335_v60, 1  ;;  %v2019_v26 = vld [vmem:[%s4646_s14 + $0x580] sm:$0xff] }
 0x734   : > { %2284 = vmatpush.msrb.mxu2 %v2001_v28  ;;  %2304 = vmatpush.msra.mxu3 %v2017_v29  ;;  %v1645_v36 = vadd.f32 %v1644_v33, %v1478_v3  ;;  %v1684_v6 = vpop.f32.mrf.mxu1  ;;  %v1482_v29 = vperm.slane %v4335_v60, 2  ;;  %v1989_v33 = vld [vmem:[%s4646_s14 + $0x490] sm:$0xff] }
 0x735   : > { %2327 = vmatpush.msrb.mxu0 %v2030_v9  ;;  %v1832_v39 = vmax.f32 %v1625_v32, 0.0  ;;  %2268 = vmatpush.msrb.mxu1 %v1981_v31  ;;  %v1744_v11 = vpop.f32.mrf.mxu0  ;;  %v1685_v17 = vadd.f32 %v1684_v6, %v1480_v2  ;;  %v2050_v9 = vld [vmem:[%s4646_s14 + $0x678] sm:$0xff]  ;;  %v2061_v6 = vld [vmem:[%s4646_s14 + $0x6d0] sm:$0xff] }
 0x736   : > { %v1833_v42 = vmax.f32 %v1645_v36, 0.0  ;;  %2285 = vmatpush.msrb.mxu2 %v2000_v34  ;;  %2305 = vmatpush.msra.mxu3 %v2016_v35  ;;  %v1745_v20 = vadd.f32 %v1744_v11, %v1483_v7  ;;  %v2098_v32 = vld [vmem:[%s4646_s14 + $0x7f8] sm:$0xff]  ;;  %v2005_v34 = vld [vmem:[%s4646_s14 + $0x510] sm:$0xff]  ;;  %v2060_v11 = vld [vmem:[%s4646_s14 + $0x6c8] sm:$0xff] }
 0x737   : > { %2328 = vmatpush.msrb.mxu0 %v2029_v37  ;;  %2269 = vmatpush.msrb.mxu1 %v1980_v38  ;;  %v1835_v3 = vmax.f32 %v1685_v17, 0.0  ;;  %v2049_v35 = vld [vmem:[%s4646_s14 + $0x670] sm:$0xff]  ;;  %v1988_v38 = vld [vmem:[%s4646_s14 + $0x488] sm:$0xff]  ;;  %v2078_v2 = vld [vmem:[%s4646_s14 + $0x758] sm:$0xff] }
 0x738   : > { %2286 = vmatpush.msrb.mxu2 %v1999_v40  ;;  %2306 = vmatpush.msra.mxu3 %v2015_v41  ;;  %v1838_v30 = vmax.f32 %v1745_v20, 0.0  ;;  %v2097_v37 = vld [vmem:[%s4646_s14 + $0x7f0] sm:$0xff]  ;;  %v2004_v40 = vld [vmem:[%s4646_s14 + $0x508] sm:$0xff]  ;;  %v2075_v17 = vld [vmem:[%s4646_s14 + $0x740] sm:$0xff] }
 0x739   : > { %2329 = vmatpush.msrb.mxu0 %v2028_v43  ;;  %2219 = vmatmul.f32.vlgmr.msra.gmra.mxu2 %v1832_v39  ;;  %v2048_v41 = vld [vmem:[%s4646_s14 + $0x668] sm:$0xff]  ;;  %v1987_v43 = vld [vmem:[%s4646_s14 + $0x480] sm:$0xff]  ;;  %v2077_v7 = vld [vmem:[%s4646_s14 + $0x750] sm:$0xff] }
 0x73a   : > { %2239 = vmatmul.f32.vlgmr.msrb.gmra.mxu3 %v1833_v42  ;;  %2270 = vmatpush.msrb.mxu1 %v1979_v44  ;;  %v1704_v28 = vpop.f32.mrf.mxu2  ;;  %v2096_v42 = vld [vmem:[%s4646_s14 + $0x7e8] sm:$0xff]  ;;  %v2003_v44 = vld [vmem:[%s4646_s14 + $0x500] sm:$0xff]  ;;  %v2058_v20 = vld [vmem:[%s4646_s14 + $0x6b8] sm:$0xff] }
 0x73b   : > { %2287 = vmatpush.msrb.mxu2 %v1998_v46  ;;  %2307 = vmatpush.msra.mxu3 %v2014_v47  ;;  %v1724_v31 = vpop.f32.mrf.mxu3  ;;  %v1705_v36 = vadd.f32 %v1704_v28, %v1481_v25  ;;  %v2047_v47 = vld [vmem:[%s4646_s14 + $0x660] sm:$0xff]  ;;  %v2057_v25 = vld [vmem:[%s4646_s14 + $0x6b0] sm:$0xff]  ;;  %v1487_v28 = vperm.slane %v4335_v60, 7 }
 0x73c   : > { %2330 = vmatpush.msrb.mxu0 %v2027_v48  ;;  %2271 = vmatpush.msrb.mxu1 %v1978_v49  ;;  %v1725_v39 = vadd.f32 %v1724_v31, %v1482_v29  ;;  %v2066_v49 = vld [vmem:[%s4646_s14 + $0x6f8] sm:$0xff]  ;;  %v2056_v31 = vld [vmem:[%s4646_s14 + $0x6a8] sm:$0xff] }
 0x73d   : > { %2288 = vmatpush.msrb.mxu2 %v1997_v50  ;;  %2308 = vmatpush.msra.mxu3 %v2013_v51  ;;  %v1836_v46 = vmax.f32 %v1705_v36, 0.0  ;;  %v2082_v50 = vld [vmem:[%s4646_s14 + $0x778] sm:$0xff]  ;;  %v2095_v51 = vld [vmem:[%s4646_s14 + $0x7e0] sm:$0xff] }
 0x73e   : > { %2331 = vmatpush.msrb.mxu0 %v2026_v52  ;;  %2272 = vmatpush.msrb.mxu1 %v1977_v53  ;;  %v1837_v48 = vmax.f32 %v1725_v39, 0.0  ;;  %v2046_v52 = vld [vmem:[%s4646_s14 + $0x658] sm:$0xff]  ;;  %v2065_v53 = vld [vmem:[%s4646_s14 + $0x6f0] sm:$0xff]  ;;  %v2055_v36 = vld [vmem:[%s4646_s14 + $0x6a0] sm:$0xff] }
 0x73f   : > { %2289 = vmatpush.msrb.mxu2 %v1996_v54  ;;  %2309 = vmatpush.msra.mxu3 %v2012_v55  ;;  %v2081_v54 = vld [vmem:[%s4646_s14 + $0x770] sm:$0xff]  ;;  %v2094_v55 = vld [vmem:[%s4646_s14 + $0x7d8] sm:$0xff]  ;;  %v2084_v39 = vld [vmem:[%s4646_s14 + $0x788] sm:$0xff] }
 0x740   : > { %2332 = vmatpush.msrb.mxu0 %v2025_v56  ;;  %2273 = vmatpush.msrb.mxu1 %v1976_v57  ;;  %v2045_v56 = vld [vmem:[%s4646_s14 + $0x650] sm:$0xff]  ;;  %v2064_v57 = vld [vmem:[%s4646_s14 + $0x6e8] sm:$0xff]  ;;  %v2086_v29 = vld [vmem:[%s4646_s14 + $0x798] sm:$0xff] }
 0x741   : > { %2290 = vmatpush.msrb.mxu2 %v1995_v58  ;;  %2310 = vmatpush.msra.mxu3 %v2011_v59  ;;  %v2080_v58 = vld [vmem:[%s4646_s14 + $0x768] sm:$0xff]  ;;  %v2093_v59 = vld [vmem:[%s4646_s14 + $0x7d0] sm:$0xff] }
 0x742   : > { %2333 = vmatpush.msrb.mxu0 %v2024_v61  ;;  %2274 = vmatpush.msrb.mxu1 %v1975_v62  ;;  %v2044_v61 = vld [vmem:[%s4646_s14 + $0x648] sm:$0xff]  ;;  %v2063_v62 = vld [vmem:[%s4646_s14 + $0x6e0] sm:$0xff] }
 0x743   : > { %2291 = vmatpush.msrb.mxu2 %v1994_v63  ;;  %2311 = vmatpush.msra.mxu3 %v2010_v0  ;;  %v2079_v63 = vld [vmem:[%s4646_s14 + $0x760] sm:$0xff]  ;;  %v2092_v0 = vld [vmem:[%s4646_s14 + $0x7c8] sm:$0xff] }
 0x744   : > { %2334 = vmatpush.msrb.mxu0 %v2023_v45  ;;  %2275 = vmatpush.msrb.mxu1 %v1974_v1  ;;  %v2043_v45 = vld [vmem:[%s4646_s14 + $0x640] sm:$0xff]  ;;  %v2062_v1 = vld [vmem:[%s4646_s14 + $0x6d8] sm:$0xff] }
 0x745   : > { %2292 = vmatpush.msrb.mxu2 %v1993_v4  ;;  %2312 = vmatpush.msra.mxu3 %v2009_v5  ;;  %v2091_v4 = vld [vmem:[%s4646_s14 + $0x7c0] sm:$0xff]  ;;  %v2042_v5 = vld [vmem:[%s4646_s14 + $0x638] sm:$0xff] }
 0x746   : > { %2335 = vmatpush.msrb.mxu0 %v2022_v8  ;;  %2276 = vmatpush.msrb.mxu1 %v1973_v10  ;;  %v2090_v8 = vld [vmem:[%s4646_s14 + $0x7b8] sm:$0xff]  ;;  %v2041_v10 = vld [vmem:[%s4646_s14 + $0x630] sm:$0xff] }
 0x747   : > { %2293 = vmatpush.msrb.mxu2 %v1992_v12  ;;  %2313 = vmatpush.msra.mxu3 %v2008_v13  ;;  %v2076_v12 = vld [vmem:[%s4646_s14 + $0x748] sm:$0xff]  ;;  %v2089_v13 = vld [vmem:[%s4646_s14 + $0x7b0] sm:$0xff] }
 0x748   : > { %2336 = vmatpush.msrb.mxu0 %v2021_v14  ;;  %2277 = vmatpush.msrb.mxu1 %v1972_v16  ;;  %v2040_v14 = vld [vmem:[%s4646_s14 + $0x628] sm:$0xff]  ;;  %v2059_v16 = vld [vmem:[%s4646_s14 + $0x6c0] sm:$0xff] }
 0x749   : > { %2294 = vmatpush.msrb.mxu2 %v1991_v18  ;;  %2314 = vmatpush.msra.mxu3 %v2007_v19  ;;  %v2088_v18 = vld [vmem:[%s4646_s14 + $0x7a8] sm:$0xff]  ;;  %v2039_v19 = vld [vmem:[%s4646_s14 + $0x620] sm:$0xff] }
 0x74a   : > { %2337 = vmatpush.msrb.mxu0 %v2020_v21  ;;  %2278 = vmatpush.msrb.mxu1 %v1971_v22  ;;  %v2074_v21 = vld [vmem:[%s4646_s14 + $0x738] sm:$0xff]  ;;  %v2087_v22 = vld [vmem:[%s4646_s14 + $0x7a0] sm:$0xff] }
 0x74b   : > { %2295 = vmatpush.msrb.mxu2 %v1990_v23  ;;  %2315 = vmatpush.msra.mxu3 %v2006_v24  ;;  %v2038_v23 = vld [vmem:[%s4646_s14 + $0x618] sm:$0xff]  ;;  %v1484_v24 = vperm.slane %v4335_v60, 4 }
 0x74c   : > { %2338 = vmatpush.msrb.mxu0 %v2019_v26  ;;  %2279 = vmatmul.f32.vlgmr.msrb.gmra.mxu1 %v1835_v3  ;;  %v2073_v26 = vld [vmem:[%s4646_s14 + $0x730] sm:$0xff]  ;;  %v1764_v3 = vpop.f32.mrf.mxu1 }
 0x74d   : > { %2339 = vmatmul.f32.vlgmr.msrb.gmra.mxu0 %v1838_v30  ;;  %2343 = vmatpush.msra.mxu1 %v2050_v9  ;;  %v2037_v9 = vld [vmem:[%s4646_s14 + $0x610] sm:$0xff]  ;;  %v1824_v30 = vpop.f32.mrf.mxu0 }
 0x74e   : > { %2403 = vmatpush.msra.mxu0 %v2098_v32  ;;  %2296 = vmatpush.msrb.mxu2 %v1989_v33  ;;  %v2072_v32 = vld [vmem:[%s4646_s14 + $0x728] sm:$0xff]  ;;  %v2085_v33 = vld [vmem:[%s4646_s14 + $0x790] sm:$0xff] }
 0x74f   : > { %2316 = vmatpush.msra.mxu3 %v2005_v34  ;;  %2344 = vmatpush.msra.mxu1 %v2049_v35  ;;  %v2036_v34 = vld [vmem:[%s4646_s14 + $0x608] sm:$0xff]  ;;  %v1765_v35 = vadd.f32 %v1764_v3, %v1484_v24 }
 0x750   : > { %2404 = vmatpush.msra.mxu0 %v2097_v37  ;;  %2297 = vmatpush.msrb.mxu2 %v1988_v38  ;;  %v2071_v37 = vld [vmem:[%s4646_s14 + $0x720] sm:$0xff]  ;;  %v1825_v38 = vadd.f32 %v1824_v30, %v1487_v28 }
 0x751   : > { %2317 = vmatpush.msra.mxu3 %v2004_v40  ;;  %2345 = vmatpush.msra.mxu1 %v2048_v41  ;;  %v2035_v40 = vld [vmem:[%s4646_s14 + $0x600] sm:$0xff]  ;;  %v1485_v41 = vperm.slane %v4335_v60, 5 }
 0x752   : > { %2405 = vmatpush.msra.mxu0 %v2096_v42  ;;  %2298 = vmatpush.msrb.mxu2 %v1987_v43  ;;  %v2054_v42 = vld [vmem:[%s4646_s14 + $0x698] sm:$0xff] }
 0x753   : > { %2318 = vmatpush.msra.mxu3 %v2003_v44  ;;  %2299 = vmatmul.f32.vlgmr.msrb.gmra.mxu2 %v1836_v46  ;;  %v2070_v43 = vld [vmem:[%s4646_s14 + $0x718] sm:$0xff]  ;;  %v1784_v44 = vpop.f32.mrf.mxu2  ;;  %v1486_v46 = vperm.slane %v4335_v60, 6  ;;  %v2069_v60 = vld [vmem:[%s4646_s14 + $0x710] sm:$0xff] }
 0x754   : > { %2319 = vmatmul.f32.vlgmr.msra.gmra.mxu3 %v1837_v48  ;;  %2346 = vmatpush.msra.mxu1 %v2047_v47  ;;  %v2083_v47 = vld [vmem:[%s4646_s14 + $0x780] sm:$0xff]  ;;  %v1839_v48 = vmax.f32 %v1765_v35, 0.0 }
 0x755   : > { %2363 = vmatpush.msra.mxu2 %v2066_v49  ;;  %2383 = vmatpush.msrb.mxu3 %v2082_v50  ;;  %v1804_v49 = vpop.f32.mrf.mxu3  ;;  %v2053_v50 = vld [vmem:[%s4646_s14 + $0x690] sm:$0xff] }
 0x756   : > { %2406 = vmatpush.msra.mxu0 %v2095_v51  ;;  %2347 = vmatpush.msra.mxu1 %v2046_v52  ;;  %v1842_v51 = vmax.f32 %v1825_v38, 0.0  ;;  %v1785_v52 = vadd.f32 %v1784_v44, %v1485_v41 }
 0x757   : > { %2364 = vmatpush.msra.mxu2 %v2065_v53  ;;  %2384 = vmatpush.msrb.mxu3 %v2081_v54  ;;  %v2052_v53 = vld [vmem:[%s4646_s14 + $0x688] sm:$0xff]  ;;  %v1805_v54 = vadd.f32 %v1804_v49, %v1486_v46  ;;  %v2939_v49 = vld [vmem:[#allocation24] ss:$0 sm:$0xff] }
 0x758   : > { %2407 = vmatpush.msra.mxu0 %v2094_v55  ;;  %2348 = vmatpush.msra.mxu1 %v2045_v56  ;;  %v2068_v55 = vld [vmem:[%s4646_s14 + $0x708] sm:$0xff]  ;;  %v2051_v56 = vld [vmem:[%s4646_s14 + $0x680] sm:$0xff] }
 0x759   : > { %2365 = vmatpush.msra.mxu2 %v2064_v57  ;;  %2385 = vmatpush.msrb.mxu3 %v2080_v58  ;;  %v2067_v57 = vld [vmem:[%s4646_s14 + $0x700] sm:$0xff]  ;;  %v1840_v58 = vmax.f32 %v1785_v52, 0.0 }
 0x75a   : > { %2408 = vmatpush.msra.mxu0 %v2093_v59  ;;  %2349 = vmatpush.msra.mxu1 %v2044_v61  ;;  %v1841_v59 = vmax.f32 %v1805_v54, 0.0  ;;  %v2937_v61 = vld [vmem:[#allocation21] ss:$0 sm:$0xff] }
 0x75b   : > { %2366 = vmatpush.msra.mxu2 %v2063_v62  ;;  %2386 = vmatpush.msrb.mxu3 %v2079_v63 }
 0x75c   : > { %2409 = vmatpush.msra.mxu0 %v2092_v0  ;;  %2350 = vmatpush.msra.mxu1 %v2043_v45 }
 0x75d   : > { %2367 = vmatpush.msra.mxu2 %v2062_v1  ;;  %2387 = vmatpush.msrb.mxu3 %v2078_v2 }
 0x75e   : > { %2410 = vmatpush.msra.mxu0 %v2091_v4  ;;  %2351 = vmatpush.msra.mxu1 %v2042_v5 }
 0x75f   : > { %2368 = vmatpush.msra.mxu2 %v2061_v6  ;;  %2388 = vmatpush.msrb.mxu3 %v2077_v7 }
 0x760   : > { %2411 = vmatpush.msra.mxu0 %v2090_v8  ;;  %2352 = vmatpush.msra.mxu1 %v2041_v10 }
 0x761   : > { %2369 = vmatpush.msra.mxu2 %v2060_v11  ;;  %2389 = vmatpush.msrb.mxu3 %v2076_v12 }
 0x762   : > { %2412 = vmatpush.msra.mxu0 %v2089_v13  ;;  %2353 = vmatpush.msra.mxu1 %v2040_v14 }
 0x763   : > { %2370 = vmatpush.msra.mxu2 %v2059_v16  ;;  %2390 = vmatpush.msrb.mxu3 %v2075_v17 }
 0x764   : > { %2413 = vmatpush.msra.mxu0 %v2088_v18  ;;  %2354 = vmatpush.msra.mxu1 %v2039_v19 }
 0x765   : > { %2371 = vmatpush.msra.mxu2 %v2058_v20  ;;  %2391 = vmatpush.msrb.mxu3 %v2074_v21 }
 0x766   : > { %2414 = vmatpush.msra.mxu0 %v2087_v22  ;;  %2355 = vmatpush.msra.mxu1 %v2038_v23 }
 0x767   : > { %2372 = vmatpush.msra.mxu2 %v2057_v25  ;;  %2392 = vmatpush.msrb.mxu3 %v2073_v26 }
 0x768   : > { %2415 = vmatpush.msra.mxu0 %v2086_v29  ;;  %2356 = vmatpush.msra.mxu1 %v2037_v9 }
 0x769   : > { %2373 = vmatpush.msra.mxu2 %v2056_v31  ;;  %2393 = vmatpush.msrb.mxu3 %v2072_v32 }
 0x76a   : > { %2416 = vmatpush.msra.mxu0 %v2085_v33  ;;  %2357 = vmatpush.msra.mxu1 %v2036_v34 }
 0x76b   : > { %2374 = vmatpush.msra.mxu2 %v2055_v36  ;;  %2394 = vmatpush.msrb.mxu3 %v2071_v37 }
 0x76c   : > { %2417 = vmatpush.msra.mxu0 %v2084_v39  ;;  %2358 = vmatpush.msra.mxu1 %v2035_v40 }
 0x76d   : > { %2375 = vmatpush.msra.mxu2 %v2054_v42  ;;  %2395 = vmatpush.msrb.mxu3 %v2070_v43 }
 0x76e   : > { %2418 = vmatpush.msra.mxu0 %v2083_v47  ;;  %2359 = vmatmul.f32.vlgmr.msra.gmra.mxu1 %v1839_v48  ;;  %v2938_v47 = vld [vmem:[#allocation22] ss:$0 sm:$0xff] }
 0x76f   : > { %2419 = vmatmul.f32.vlgmr.msra.gmra.mxu0 %v1842_v51  ;;  %2376 = vmatpush.msra.mxu2 %v2053_v50 }
 0x770   : > { %2396 = vmatpush.msrb.mxu3 %v2069_v60 }
 0x771   : > { %2377 = vmatpush.msra.mxu2 %v2052_v53 }
 0x772   : > { %2397 = vmatpush.msrb.mxu3 %v2068_v55 }
 0x773   : > { %2378 = vmatpush.msra.mxu2 %v2051_v56 }
 0x774   : > { %2398 = vmatpush.msrb.mxu3 %v2067_v57  ;;  %2379 = vmatmul.f32.vlgmr.msra.gmra.mxu2 %v1840_v58 }
 0x775   : > { %2399 = vmatmul.f32.vlgmr.msrb.gmra.mxu3 %v1841_v59 }
 0x7a6   : > { %v2120_v62 = vpop.f32.mrf.mxu1 }
 0x7a7   : > { %v2121_v0 = vadd.f32 %v2937_v61, %v2120_v62  ;;  %v2180_v4 = vpop.f32.mrf.mxu0 }
 0x7af   : > { %v2200_v6 = vpop.f32.mrf.mxu1 }
 0x7b0   : > { %v2260_v13 = vpop.f32.mrf.mxu0 }
 0x7b2   : > { %v2140_v63 = vpop.f32.mrf.mxu2 }
 0x7b3   : > { %v2141_v45 = vadd.f32 %v2140_v63, %v2121_v0  ;;  %v2160_v1 = vpop.f32.mrf.mxu3 }
 0x7b5   : > { %v2161_v2 = vadd.f32 %v2160_v1, %v2141_v45 }
 0x7b7   : > { %v2181_v5 = vadd.f32 %v2180_v4, %v2161_v2 }
 0x7b9   : > { %v2201_v7 = vadd.f32 %v2200_v6, %v2181_v5 }
 0x7bc   : > { %v2220_v8 = vpop.f32.mrf.mxu2 }
 0x7bd   : > { %v2221_v10 = vadd.f32 %v2220_v8, %v2201_v7  ;;  %v2240_v11 = vpop.f32.mrf.mxu3 }
 0x7bf   : > { %v2241_v12 = vadd.f32 %v2240_v11, %v2221_v10 }
 0x7c1   : > { %v2261_v16 = vadd.f32 %v2260_v13, %v2241_v12 }
 0x7c9   : > { %v2280_v14 = vpop.f32.mrf.mxu1 }
 0x7ca   : > { %v2281_v18 = vadd.f32 %v2280_v14, %v2261_v16  ;;  %v2340_v22 = vpop.f32.mrf.mxu0 }
 0x7d6   : > { %v2300_v17 = vpop.f32.mrf.mxu2 }
 0x7d7   : > { %v2301_v19 = vadd.f32 %v2300_v17, %v2281_v18  ;;  %v2320_v20 = vpop.f32.mrf.mxu3 }
 0x7d9   : > { %v2321_v21 = vadd.f32 %v2320_v20, %v2301_v19 }
 0x7db   : > { %v2341_v24 = vadd.f32 %v2340_v22, %v2321_v21 }
 0x7eb   : > { %v2360_v23 = vpop.f32.mrf.mxu1 }
 0x7ec   : > { %v2361_v25 = vadd.f32 %v2360_v23, %v2341_v24  ;;  %v2420_v9 = vpop.f32.mrf.mxu0 }
 0x7f7   : > { %v2380_v26 = vpop.f32.mrf.mxu2 }
 0x7f8   : > { %v2381_v3 = vadd.f32 %v2380_v26, %v2361_v25  ;;  %v2400_v28 = vpop.f32.mrf.mxu3 }
 0x7fa   : > { %v2401_v29 = vadd.f32 %v2400_v28, %v2381_v3 }
 0x7fc   : > { %v2421_v30 = vadd.f32 %v2420_v9, %v2401_v29 }
 0x7fe   : > { %v2423_v31 = vadd.f32 %v2421_v30, %v3796_v15 }
 0x800   : > { %v2426_v32 = vsel %vm830_vm0, %v2423_v31, 0.0 }
 0x801   : > { %2427 = vadd.xlane.f32.xlu1 %v2426_v32 }
 0x874   : > { %v2428_v33 = vpop.xlane.xlu1 %2427 }
 0x875   : > { %v2429_v34 = vmul.f32 %v2428_v33, %v3786_v27 }
 0x877   : > { %v2430_v35 = vsub.f32 %v2423_v31, %v2429_v34 }
 0x879   : > { %v2431_v36 = vmul.f32 %v2430_v35, %v2430_v35 }
 0x87b   : > { %v2432_v37 = vsel %vm830_vm0, %v2431_v36, 0.0 }
 0x87c   : > { %2433 = vadd.xlane.f32.xlu2 %v2432_v37 }
 0x8ef   : > { %v2434_v38 = vpop.xlane.xlu2 %2433 }
 0x8f0   : > { %v2435_v39 = vmul.f32 %v2434_v38, %v3786_v27 }
 0x8f2   : > { %v2436_v40 = vadd.f32 1e-05, %v2435_v39 }
 0x8f4   : > { %2960 = vrsqrt.f32 %v2436_v40  ;;  %vm2443_vm9 = vweird.f32 %v2436_v40 }
 0x8fa   : > { %v2961_v41 = vpop.eup %2960 }
 0x8fb   : > { %v2438_v42 = vmul.f32 %v2961_v41, %v2436_v40  ;;  %vm2444_vm8 = vweird.f32 %v2961_v41 }
 0x8fc   : > { %vm2445_vm10 = vmor %vm2443_vm9, %vm2444_vm8 }
 0x8fd   : > { %v2439_v15 = vmul.f32 %v2961_v41, %v2438_v42 }
 0x8ff   : > { %v2440_v43 = vmul.f32 0.5, %v2439_v15 }
 0x901   : > { %v2441_v44 = vsub.f32 1.5, %v2440_v43 }
 0x903   : > { %v2442_v46 = vmul.f32 %v2961_v41, %v2441_v44 }
 0x905   : > { %v2446_v48 = vsel %vm2445_vm10, %v2961_v41, %v2442_v46 }
 0x906   : > { %v2447_v50 = vmul.f32 %v2446_v48, %v2430_v35 }
 0x908   : > { %v2451_v51 = vmul.f32 %v2938_v47, %v2447_v50 }
 0x90a   : > { %v2455_v27 = vadd.f32 %v2939_v49, %v2451_v51 }
 0x90c   : > { %2456 = vst.msk [vmem:[%s818_s7] sm:$0xff] %vm830_vm0, %v2455_v27 }
 0x90d PF: > { %s36_s27 = sadd.s32 1, %s3450_s27  }
 0x90e   : > { %p33_p7 = scmp.ge.s32.totalorder %s36_s27, 4  }
 0x910   :  { %35 = sbr.rel (!%p33_p7) target bundleno = 16 (0x10), region = 186 }
 0x915   :  { %2476 = vsyncpa [#allocation3], 1 }
 0x916   :  { %2478 = vsyncpa [#allocation3 + $0x1], 1 }
 0x917   :  { %2479 = vsyncpa [#allocation5], 1 }
 0x918   :  { %2480 = vsyncpa [#allocation8], 1 }
 0x919   :  { %2481 = vsyncpa [#allocation11], 1 }
 0x91a   :  { %2482 = vsyncpa [#allocation14], 1 }
 0x91b   :  { %2483 = vsyncpa [#allocation17], 1 }
 0x91c   :  { %2484 = vsyncpa [#allocation20], 1 }
 0x91d   :  { %2485 = vsyncpa [#allocation23], 1 }

</bundles_post_ra>
